<compile_context>
chip_gen: v7x
topology: tpu7x:2x2x1
jax: 0.10.0
libtpu: 0.0.40
codegen_flags: <defaults>
</compile_context>

<pallas_src>
import functools
import math

import jax
import jax.numpy as jnp
from jax.experimental import pallas as pl
from jax.experimental.pallas import tpu as pltpu

NORM_EPS = 1e-5   # RMSNorm eps
LN_EPS = 1e-5     # nn.LayerNorm default eps
NEG_INF = -1e30


# ---------------------------------------------------------------------------
# optional single-buffer pipeline mode (halves VMEM of grid-invariant operands)
# ---------------------------------------------------------------------------

def _single_buffer_mode():
    if not hasattr(pl, "Buffered"):
        return None
    for make in (lambda: pl.Buffered(buffer_count=1), lambda: pl.Buffered(1)):
        try:
            mode = make()
            pl.BlockSpec((8, 128), lambda i: (i, 0), pipeline_mode=mode)
            return mode
        except Exception:
            continue
    return None


_SINGLE_BUFFER = _single_buffer_mode()


def _vmem_limit_bytes():
    # ~85% of physical VMEM: ~54 MiB on v7x (64 MiB), ~109 MiB on v5e/v6e (128 MiB).
    try:
        cap = int(pltpu.get_tpu_info().vmem_capacity_bytes)
        return min(int(cap * 0.85), 110 << 20)
    except Exception:
        return 48 << 20   # conservative, safe on every generation


# ---------------------------------------------------------------------------
# small in-kernel helpers (operate on VMEM values)
# ---------------------------------------------------------------------------

def _rms(h, w):
    ms = jnp.mean(h * h, axis=-1, keepdims=True)
    return h * jax.lax.rsqrt(ms + NORM_EPS) * w


def _ln(h, w, b):
    mu = jnp.mean(h, axis=-1, keepdims=True)
    var = jnp.mean(jnp.square(h - mu), axis=-1, keepdims=True)
    return (h - mu) * jax.lax.rsqrt(var + LN_EPS) * w + b


def _roll_last(h, shift):
    # output[:, c] = h[:, (c - shift) mod d]  (jnp.roll semantics), static shift.
    d = h.shape[-1]
    shift = shift % d
    if d % 128 == 0:
        # lane-aligned production path: pure XLU rotate
        return pltpu.roll(h, shift=shift, axis=h.ndim - 1)
    # small / unaligned lane dim: two static slices + concat (always lowers)
    return jnp.concatenate([h[:, d - shift:], h[:, :d - shift]], axis=-1)


def _rope_full(h, cos, sin_a, sin_b, half):
    # Vectorized RoPE in the permuted per-head [real-half | imag-half] column layout:
    #   out = h*cos + roll(h, D-half)*sin_a + roll(h, half)*sin_b
    # sin_a is -sin on real positions / 0 on imag positions; sin_b the opposite sign split,
    # so cross-head contamination of the global rolls is multiplied by exact zeros.
    d = h.shape[-1]
    return h * cos + _roll_last(h, d - half) * sin_a + _roll_last(h, half) * sin_b


# ---------------------------------------------------------------------------
# Pallas kernels (one fused kernel per pipeline stage)
# ---------------------------------------------------------------------------

def _adaln_kernel(t_ref, w_ref, b_ref, s1_ref, g1_ref, s2_ref, g2_ref):
    # adaLN head: silu(t) @ W + b, emitted directly as the four (B,1,D) scale/gate rows.
    t = t_ref[...].astype(jnp.float32)
    ts = (t * jax.nn.sigmoid(t)).astype(jnp.bfloat16)
    ada = (jnp.dot(ts, w_ref[...], preferred_element_type=jnp.float32)
           + b_ref[...])                                                # (B, 4D)
    d = s1_ref.shape[-1]
    s1_ref[...] = ada[:, None, 0 * d:1 * d]    # scale_msa
    g1_ref[...] = ada[:, None, 1 * d:2 * d]    # gate_msa
    s2_ref[...] = ada[:, None, 2 * d:3 * d]    # scale_mlp
    g2_ref[...] = ada[:, None, 3 * d:4 * d]    # gate_mlp


def _qkv_kernel(x_ref, n1w_ref, sc_ref, w_ref, qw_ref, qb_ref, kw_ref, kb_ref,
                cos_ref, sina_ref, sinb_ref, q_ref, k_ref, v_ref, *, half):
    # fused: rmsnorm(x)*w*(1+scale) -> (q|k|v) = xm @ Wqkv -> LN(q), LN(k) -> RoPE(q, k)
    dim = x_ref.shape[-1]
    x = x_ref[0].astype(jnp.float32)                                    # (tq, D)
    xm = _rms(x, n1w_ref[...]) * (1.0 + sc_ref[0])
    qkv = jnp.dot(xm.astype(jnp.bfloat16), w_ref[...],
                  preferred_element_type=jnp.float32)                   # (tq, 3D)
    q = _ln(qkv[:, :dim], qw_ref[...], qb_ref[...])
    k = _ln(qkv[:, dim:2 * dim], kw_ref[...], kb_ref[...])
    cos = cos_ref[...]
    sa = sina_ref[...]
    sb = sinb_ref[...]
    q_ref[0] = _rope_full(q, cos, sa, sb, half).astype(q_ref.dtype)
    k_ref[0] = _rope_full(k, cos, sa, sb, half).astype(k_ref.dtype)
    v_ref[0] = qkv[:, 2 * dim:].astype(v_ref.dtype)


def _ykv_kernel(y_ref, ynw_ref, w_ref, kw_ref, kb_ref, ky_ref, vy_ref):
    # fused: rmsnorm(y)*w -> (ky|vy) = yn @ Wkv_y -> LN(ky)
    dim = kw_ref.shape[-1]
    y = y_ref[0].astype(jnp.float32)
    yn = _rms(y, ynw_ref[...])
    kv = jnp.dot(yn.astype(jnp.bfloat16), w_ref[...],
                 preferred_element_type=jnp.float32)                    # (L, 2D)
    ky_ref[0] = _ln(kv[:, :dim], kw_ref[...], kb_ref[...]).astype(ky_ref.dtype)
    vy_ref[0] = kv[:, dim:].astype(vy_ref.dtype)


def _attn_wo_kernel(q_ref, k_ref, v_ref, xm_ref, ky_ref, vy_ref, ym_ref, g_ref,
                    wo_ref, x_ref, n2w_ref, gmsa_ref, o_ref,
                    self_acc, cross_acc, *, n_heads, scale):
    # Fused: self-attn + cross-attn (all heads, lane-dense I/O, per-head results written
    # straight into VMEM scratch, gate hoisted) -> @ Wo -> attn_norm2 -> tanh(gate_msa)
    # residual add.  Keeps the (tq, D) attention output entirely in VMEM.
    dim = q_ref.shape[-1]
    hd = dim // n_heads
    q = (q_ref[0].astype(jnp.float32) * scale).astype(jnp.bfloat16)     # (tq, D)
    k = k_ref[0]                                                        # (S, D)
    v = v_ref[0]
    ky = ky_ref[0]                                                      # (L, D)
    vy = vy_ref[0]
    xbias = jnp.where(xm_ref[0] != 0, 0.0, NEG_INF).astype(jnp.float32)   # (1, S)
    ybias = jnp.where(ym_ref[0] != 0, 0.0, NEG_INF).astype(jnp.float32)   # (1, L)

    def sdpa(qh, kh, vh, bias):
        s = jnp.dot(qh, kh.T, preferred_element_type=jnp.float32) + bias
        s = s - jnp.max(s, axis=-1, keepdims=True)
        p = jnp.exp(s)
        p = p * pl.reciprocal(jnp.sum(p, axis=-1, keepdims=True), approx=True)
        return jnp.dot(p.astype(jnp.bfloat16), vh, preferred_element_type=jnp.float32)

    # TODO(synk): switch to lax.fori_loop with hd-aligned dynamic lane slices for
    # production head counts (head_dim multiple of 128); static unroll is fine here.
    for h in range(n_heads):
        sl = slice(h * hd, (h + 1) * hd)
        self_acc[:, sl] = sdpa(q[:, sl], k[:, sl], v[:, sl], xbias)
        cross_acc[:, sl] = sdpa(q[:, sl], ky[:, sl], vy[:, sl], ybias)

    attn = self_acc[...] + cross_acc[...] * g_ref[0]        # one full-width gate multiply
    h_out = jnp.dot(attn.astype(jnp.bfloat16), wo_ref[...],
                    preferred_element_type=jnp.float32)                  # (tq, D)
    o_ref[0] = (x_ref[0].astype(jnp.float32)
                + jnp.tanh(gmsa_ref[0]) * _rms(h_out, n2w_ref[...])).astype(o_ref.dtype)


def _ffn_kernel(x_ref, n1w_ref, sc_ref, w1_ref, w3_ref, w2_ref, n2w_ref, g_ref,
                o_ref, acc_ref, xm_ref):
    # K-tiled SwiGLU FFN: per hidden-tile j, acc += silu(xm@w1_j)*(xm@w3_j) @ w2_j.
    # Modulated-norm input cached in bf16 scratch at j==0; rmsnorm + tanh(gate) residual
    # finalize at the last tile.  Reduction axis (j) is last and "arbitrary".
    j = pl.program_id(2)

    @pl.when(j == 0)
    def _():
        x = x_ref[0].astype(jnp.float32)
        xm_ref[...] = (_rms(x, n1w_ref[...]) * (1.0 + sc_ref[0])).astype(jnp.bfloat16)
        acc_ref[...] = jnp.zeros_like(acc_ref)

    xm = xm_ref[...]
    h1 = jnp.dot(xm, w1_ref[...], preferred_element_type=jnp.float32)    # (tq, th)
    h3 = jnp.dot(xm, w3_ref[...], preferred_element_type=jnp.float32)
    g = (h1 * jax.nn.sigmoid(h1)) * h3
    acc_ref[...] += jnp.dot(g.astype(jnp.bfloat16), w2_ref[...],
                            preferred_element_type=jnp.float32)          # (tq, D)

    @pl.when(j == pl.num_programs(2) - 1)
    def _():
        x = x_ref[0].astype(jnp.float32)
        o_ref[0] = (x + jnp.tanh(g_ref[0]) * _rms(acc_ref[...], n2w_ref[...])
                    ).astype(o_ref.dtype)


# ---------------------------------------------------------------------------
# Module forward (wrapper: BlockSpecs / grids only; no HBM-materializing glue)
# ---------------------------------------------------------------------------

def _row_tile(seqlen):
    # NOTE: on v5e/v6e (128 MiB VMEM) 512 is also a good choice for the mem-bound stages.
    for t in (256, 128):
        if seqlen % t == 0:
            return t
    return seqlen


def _hidden_tile(hidden):
    for t in (512, 256, 128):
        if hidden % t == 0:
            return t
    return hidden


def transformer_block(x, x_mask, rope_cos, rope_sin_a, rope_sin_b, y, y_mask,
                      adaln_input, p, *, n_heads):
    B, S, D = x.shape
    _, L, Yd = y.shape
    hd = D // n_heads
    half = hd // 2
    scale = math.sqrt(1.0 / hd)      # == F.sdpa default 1/sqrt(head_dim)
    hidden = p["w2"].shape[0]
    ts = _row_tile(S)
    nt = S // ts
    th = _hidden_tile(hidden)
    nh = hidden // th
    vmem = _vmem_limit_bytes()

    def cparams(sem=None):
        return pltpu.CompilerParams(dimension_semantics=sem, vmem_limit_bytes=vmem)

    def spec(shape, imap, single=False):
        # single=True -> one VMEM buffer (no double-buffering) for operands whose block
        # index never changes (or only changes with b): halves their VMEM footprint.
        if single and _SINGLE_BUFFER is not None:
            return pl.BlockSpec(shape, imap, pipeline_mode=_SINGLE_BUFFER)
        return pl.BlockSpec(shape, imap)

    # --- adaLN modulation: silu(adaln_input) @ W + b -> four (B,1,D) scale/gate rows ---
    scale_msa, gate_msa, scale_mlp, gate_mlp = pl.pallas_call(
        _adaln_kernel,
        out_shape=[jax.ShapeDtypeStruct((B, 1, D), jnp.float32)] * 4,
        compiler_params=cparams(),
    )(adaln_input, p["adaln_w"], p["adaln_b"])

    xm32 = x_mask.astype(jnp.int32).reshape(B, 1, S)
    ym32 = y_mask.astype(jnp.int32).reshape(B, 1, L)

    # --- fused QKV projection (attn_norm1 + modulate + matmul + q/k LN + vector RoPE) ---
    q, k, v = pl.pallas_call(
        functools.partial(_qkv_kernel, half=half),
        grid=(B, nt),
        in_specs=[
            spec((1, ts, D), lambda b, t: (b, t, 0)),                    # x tile
            spec((1, D), lambda b, t: (0, 0), single=True),              # attn_norm1 w
            spec((1, 1, D), lambda b, t: (b, 0, 0), single=True),        # scale_msa
            spec((D, 3 * D), lambda b, t: (0, 0), single=True),          # Wqkv (bf16)
            spec((1, D), lambda b, t: (0, 0), single=True),              # q_norm w
            spec((1, D), lambda b, t: (0, 0), single=True),              # q_norm b
            spec((1, D), lambda b, t: (0, 0), single=True),              # k_norm w
            spec((1, D), lambda b, t: (0, 0), single=True),              # k_norm b
            spec((ts, D), lambda b, t: (t, 0)),                          # cos table
            spec((ts, D), lambda b, t: (t, 0)),                          # sin_a table
            spec((ts, D), lambda b, t: (t, 0)),                          # sin_b table
        ],
        out_specs=[spec((1, ts, D), lambda b, t: (b, t, 0))] * 3,
        out_shape=[jax.ShapeDtypeStruct((B, S, D), jnp.bfloat16)] * 3,
        compiler_params=cparams(("parallel", "parallel")),
    )(x, p["attn_norm1_w"], scale_msa, p["wqkv"],
      p["q_norm_w"], p["q_norm_b"], p["k_norm_w"], p["k_norm_b"],
      rope_cos, rope_sin_a, rope_sin_b)

    # --- fused cross K/V projection on conditioning y (attn_y_norm + matmul + ky LN) ---
    ky, vy = pl.pallas_call(
        _ykv_kernel,
        grid=(B,),
        in_specs=[
            spec((1, L, Yd), lambda b: (b, 0, 0)),
            spec((1, Yd), lambda b: (0, 0), single=True),
            spec((Yd, 2 * D), lambda b: (0, 0), single=True),
            spec((1, D), lambda b: (0, 0), single=True),
            spec((1, D), lambda b: (0, 0), single=True),
        ],
        out_specs=[spec((1, L, D), lambda b: (b, 0, 0))] * 2,
        out_shape=[jax.ShapeDtypeStruct((B, L, D), jnp.bfloat16)] * 2,
        compiler_params=cparams(("parallel",)),
    )(y, p["attn_y_norm_w"], p["wkv_y"], p["ky_norm_w"], p["ky_norm_b"])

    # --- fused attention (self + gated cross) + Wo + attn_norm2 + gated residual ---
    # residual stream leaves this stage in bf16.
    x_mid = pl.pallas_call(
        functools.partial(_attn_wo_kernel, n_heads=n_heads, scale=scale),
        grid=(B, nt),
        in_specs=[
            spec((1, ts, D), lambda b, t: (b, t, 0)),                    # q tile
            spec((1, S, D), lambda b, t: (b, 0, 0), single=True),        # k (resident / b)
            spec((1, S, D), lambda b, t: (b, 0, 0), single=True),        # v
            spec((1, 1, S), lambda b, t: (b, 0, 0), single=True),        # x key mask
            spec((1, L, D), lambda b, t: (b, 0, 0), single=True),        # ky
            spec((1, L, D), lambda b, t: (b, 0, 0), single=True),        # vy
            spec((1, 1, L), lambda b, t: (b, 0, 0), single=True),        # y key mask
            spec((1, 1, D), lambda b, t: (0, 0, 0), single=True),        # tanh(gate)/head
            spec((D, D), lambda b, t: (0, 0), single=True),              # Wo (bf16)
            spec((1, ts, D), lambda b, t: (b, t, 0)),                    # residual x tile
            spec((1, D), lambda b, t: (0, 0), single=True),              # attn_norm2 w
            spec((1, 1, D), lambda b, t: (b, 0, 0), single=True),        # gate_msa
        ],
        out_specs=spec((1, ts, D), lambda b, t: (b, t, 0)),
        out_shape=jax.ShapeDtypeStruct((B, S, D), jnp.bfloat16),
        scratch_shapes=[pltpu.VMEM((ts, D), jnp.float32),                # self-attn acc
                        pltpu.VMEM((ts, D), jnp.float32)],               # cross-attn acc
        compiler_params=cparams(("parallel", "parallel")),
    )(q, k, v, xm32, ky, vy, ym32, p["gate_vec"], p["wo"], x,
      p["attn_norm2_w"], gate_msa)

    # --- K-tiled SwiGLU FFN + ffn_norm2 + tanh(gate_mlp) residual ---
    out = pl.pallas_call(
        _ffn_kernel,
        grid=(B, nt, nh),
        in_specs=[
            spec((1, ts, D), lambda b, t, j: (b, t, 0)),                 # x_mid (bf16)
            spec((1, D), lambda b, t, j: (0, 0), single=True),           # ffn_norm1 w
            spec((1, 1, D), lambda b, t, j: (b, 0, 0), single=True),     # scale_mlp
            spec((D, th), lambda b, t, j: (0, j)),                       # w1 tile (stream)
            spec((D, th), lambda b, t, j: (0, j)),                       # w3 tile (stream)
            spec((th, D), lambda b, t, j: (j, 0)),                       # w2 tile (stream)
            spec((1, D), lambda b, t, j: (0, 0), single=True),           # ffn_norm2 w
            spec((1, 1, D), lambda b, t, j: (b, 0, 0), single=True),     # gate_mlp
        ],
        out_specs=spec((1, ts, D), lambda b, t, j: (b, t, 0)),
        out_shape=jax.ShapeDtypeStruct((B, S, D), x.dtype),
        scratch_shapes=[pltpu.VMEM((ts, D), jnp.float32),                # f32 accumulator
                        pltpu.VMEM((ts, D), jnp.bfloat16)],              # cached xm
        compiler_params=cparams(("parallel", "parallel", "arbitrary")),
    )(x_mid, p["ffn_norm1_w"], scale_mlp, p["w1"], p["w3"], p["w2"],
      p["ffn_norm2_w"], gate_mlp)
    return out


# ---------------------------------------------------------------------------
# Weight / table layout preparation (once), deterministic init & driver
# ---------------------------------------------------------------------------

def _rope_perm(dim, n_heads):
    # Column permutation taking the interleaved RoPE pair layout [r0,i0,r1,i1,...] of each
    # head to a half-split layout [r0..r_{h/2-1}, i0..i_{h/2-1}]; applied consistently to
    # wq/wk/wk_y columns and q/k/ky LayerNorm params so q·k scores are unchanged
    # (full-axis LN is permutation-invariant with permuted affine params).
    hd = dim // n_heads
    half = hd // 2
    idx = []
    for h in range(n_heads):
        base = h * hd
        idx.extend(base + 2 * j for j in range(half))        # real components
        idx.extend(base + 2 * j + 1 for j in range(half))    # imag components
    return jnp.asarray(idx, dtype=jnp.int32)


def prepare_params(p, dim, n_heads):
    """One-time prep: fuse QKV / KV_y weights, RoPE-permute q/k/ky columns, cast matmul
    weights to bf16, reshape per-channel params to (1, D) rows."""
    hd = dim // n_heads
    perm = _rope_perm(dim, n_heads)
    pc = lambda w: w[:, perm]       # permute projection output columns
    pv = lambda v: v[perm]          # permute per-channel norm params
    bf = lambda w: w.astype(jnp.bfloat16)
    rowf = lambda v: v.reshape(1, -1).astype(jnp.float32)
    return {
        "wqkv": bf(jnp.concatenate([pc(p["wq"]), pc(p["wk"]), p["wv"]], axis=1)),
        "wkv_y": bf(jnp.concatenate([pc(p["wk_y"]), p["wv_y"]], axis=1)),
        "wo": bf(p["wo"]),
        "w1": bf(p["w1"]), "w3": bf(p["w3"]), "w2": bf(p["w2"]),
        "adaln_w": bf(p["adaln_w"]),
        "adaln_b": rowf(p["adaln_b"]),
        "q_norm_w": rowf(pv(p["q_norm_w"])), "q_norm_b": rowf(pv(p["q_norm_b"])),
        "k_norm_w": rowf(pv(p["k_norm_w"])), "k_norm_b": rowf(pv(p["k_norm_b"])),
        "ky_norm_w": rowf(pv(p["ky_norm_w"])), "ky_norm_b": rowf(pv(p["ky_norm_b"])),
        "attn_norm1_w": rowf(p["attn_norm1_w"]),
        "attn_norm2_w": rowf(p["attn_norm2_w"]),
        "ffn_norm1_w": rowf(p["ffn_norm1_w"]),
        "ffn_norm2_w": rowf(p["ffn_norm2_w"]),
        "attn_y_norm_w": rowf(p["attn_y_norm_w"]),
        "gate_vec": jnp.repeat(jnp.tanh(p["gate"].astype(jnp.float32)), hd).reshape(1, 1, dim),
    }


def prepare_rope_tables(cos, sin, n_heads):
    """Build full-width (S, D) RoPE tables in the permuted per-head half-split layout:
    cos duplicated per half; sin split by sign (and zero-padded on the opposite half) so
    the in-kernel rotation is h*cos + roll(h, D-half)*sin_a + roll(h, half)*sin_b."""
    z = jnp.zeros_like(sin)
    cos_full = jnp.tile(jnp.concatenate([cos, cos], axis=1), (1, n_heads))
    sin_a = jnp.tile(jnp.concatenate([-sin, z], axis=1), (1, n_heads))
    sin_b = jnp.tile(jnp.concatenate([z, sin], axis=1), (1, n_heads))
    f32 = jnp.float32
    return cos_full.astype(f32), sin_a.astype(f32), sin_b.astype(f32)


def ffn_hidden_dim(dim, multiple_of):
    hidden = 4 * dim
    hidden = int(2 * hidden / 3)
    return multiple_of * ((hidden + multiple_of - 1) // multiple_of)


def init_params(key, dim, n_heads, y_dim, hidden_dim):
    def dense(k, shp, s=0.05):
        return s * jax.random.normal(k, shp, dtype=jnp.float32)
    ks = jax.random.split(key, 12)
    # NOTE: PyTorch inits adaLN weights and the cross-attn gate to zeros; we use small
    # random values so the modulated / gated paths are actually exercised numerically.
    return {
        "wq": dense(ks[0], (dim, dim)),
        "wk": dense(ks[1], (dim, dim)),
        "wv": dense(ks[2], (dim, dim)),
        "wo": dense(ks[3], (dim, dim)),
        "wk_y": dense(ks[4], (y_dim, dim)),
        "wv_y": dense(ks[5], (y_dim, dim)),
        "gate": 0.1 * jax.random.normal(ks[6], (n_heads,), dtype=jnp.float32),
        "q_norm_w": jnp.ones((dim,), jnp.float32),
        "q_norm_b": jnp.zeros((dim,), jnp.float32),
        "k_norm_w": jnp.ones((dim,), jnp.float32),
        "k_norm_b": jnp.zeros((dim,), jnp.float32),
        "ky_norm_w": jnp.ones((dim,), jnp.float32),
        "ky_norm_b": jnp.zeros((dim,), jnp.float32),
        "w1": dense(ks[7], (dim, hidden_dim)),
        "w3": dense(ks[8], (dim, hidden_dim)),
        "w2": dense(ks[9], (hidden_dim, dim)),
        "attn_norm1_w": jnp.ones((dim,), jnp.float32),
        "attn_norm2_w": jnp.ones((dim,), jnp.float32),
        "ffn_norm1_w": jnp.ones((dim,), jnp.float32),
        "ffn_norm2_w": jnp.ones((dim,), jnp.float32),
        "attn_y_norm_w": jnp.ones((y_dim,), jnp.float32),
        "adaln_w": dense(ks[10], (min(dim, 1024), 4 * dim)),
        "adaln_b": dense(ks[11], (4 * dim,)),
    }


def precompute_freqs(seqlen, head_dim, theta=10000.0):
    inv = 1.0 / (theta ** (jnp.arange(0, head_dim, 2, dtype=jnp.float32) / head_dim))
    t = jnp.arange(seqlen, dtype=jnp.float32)
    ang = jnp.outer(t, inv)                    # (S, head_dim//2)
    return jnp.cos(ang), jnp.sin(ang)          # real/imag of freqs_cis


if __name__ == "__main__":
    B, S, L = 2, 16, 8
    dim, n_heads, y_dim = 64, 4, 32
    multiple_of = 32
    head_dim = dim // n_heads
    hidden_dim = ffn_hidden_dim(dim, multiple_of)   # 192

    key = jax.random.PRNGKey(0)
    k_p, k_x, k_y, k_a = jax.random.split(key, 4)

    raw = init_params(k_p, dim, n_heads, y_dim, hidden_dim)
    params = prepare_params(raw, dim, n_heads)

    x = jax.random.normal(k_x, (B, S, dim), dtype=jnp.float32)
    y = jax.random.normal(k_y, (B, L, y_dim), dtype=jnp.float32)
    adaln_input = jax.random.normal(k_a, (B, min(dim, 1024)), dtype=jnp.float32)

    # key-padding masks (True = keep); mask out a few trailing positions in batch 1
    x_mask = jnp.ones((B, S), dtype=bool).at[1, -3:].set(False)
    y_mask = jnp.ones((B, L), dtype=bool).at[1, -2:].set(False)

    cos, sin = precompute_freqs(S, head_dim)                 # (S, head_dim//2)
    rope_cos, rope_sin_a, rope_sin_b = prepare_rope_tables(cos, sin, n_heads)  # (S, D)

    fwd = jax.jit(transformer_block, static_argnames=("n_heads",))
    out = fwd(x, x_mask, rope_cos, rope_sin_a, rope_sin_b, y, y_mask,
              adaln_input, params, n_heads=n_heads)
    out = jax.block_until_ready(out)
    assert out.shape == (B, S, dim) and bool(jnp.all(jnp.isfinite(out)))
    print("KERNEL_OK")
</pallas_src>

<mosaic_0001>
module attributes {stable_mosaic.version = 11 : i64} {
  func.func @_ykv_kernel(%arg0: i32, %arg1: memref<1x8x32xf32, #tpu.memory_space<vmem>>, %arg2: memref<1x32xf32, #tpu.memory_space<vmem>>, %arg3: memref<32x128xbf16, #tpu.memory_space<vmem>>, %arg4: memref<1x64xf32, #tpu.memory_space<vmem>>, %arg5: memref<1x64xf32, #tpu.memory_space<vmem>>, %arg6: memref<1x8x64xbf16, #tpu.memory_space<vmem>>, %arg7: memref<1x8x64xbf16, #tpu.memory_space<vmem>>) attributes {dimension_semantics = [#tpu.dimension_semantics<parallel>], iteration_bounds = array<i64: 2>, scalar_prefetch = 0 : i64, scratch_operands = 0 : i64, tpu.core_type = #tpu.core_type<tc>, window_params = [{transform_indices = @transform_0, window_bounds = array<i64: 1, 8, 32>}, {pipeline_mode = #tpu.pipeline_mode<synchronous>, transform_indices = @transform_1, window_bounds = array<i64: 1, 32>}, {pipeline_mode = #tpu.pipeline_mode<synchronous>, transform_indices = @transform_2, window_bounds = array<i64: 32, 128>}, {pipeline_mode = #tpu.pipeline_mode<synchronous>, transform_indices = @transform_3, window_bounds = array<i64: 1, 64>}, {pipeline_mode = #tpu.pipeline_mode<synchronous>, transform_indices = @transform_4, window_bounds = array<i64: 1, 64>}, {transform_indices = @transform_5, window_bounds = array<i64: 1, 8, 64>}, {transform_indices = @transform_6, window_bounds = array<i64: 1, 8, 64>}]} {
    %c0 = arith.constant 0 : index
    %c0_0 = arith.constant 0 : index
    %c0_1 = arith.constant 0 : index
    %0 = vector.load %arg1[%c0, %c0_0, %c0_1] : memref<1x8x32xf32, #tpu.memory_space<vmem>>, vector<1x8x32xf32>
    %1 = vector.shape_cast %0 : vector<1x8x32xf32> to vector<8x32xf32>
    %c0_2 = arith.constant 0 : index
    %c0_3 = arith.constant 0 : index
    %2 = vector.load %arg2[%c0_2, %c0_3] : memref<1x32xf32, #tpu.memory_space<vmem>>, vector<1x32xf32>
    %3 = arith.mulf %1, %1 : vector<8x32xf32>
    %cst = arith.constant dense<0.000000e+00> : vector<8xf32>
    %4 = vector.multi_reduction <add>, %3, %cst [1] : vector<8x32xf32> to vector<8xf32>
    %5 = vector.shape_cast %4 : vector<8xf32> to vector<8x1xf32>
    %cst_4 = arith.constant 3.200000e+01 : f32
    %6 = vector.broadcast %cst_4 : f32 to vector<8x1xf32>
    %7 = arith.divf %5, %6 : vector<8x1xf32>
    %cst_5 = arith.constant 9.99999974E-6 : f32
    %8 = vector.broadcast %cst_5 : f32 to vector<8x1xf32>
    %9 = arith.addf %7, %8 : vector<8x1xf32>
    %10 = math.rsqrt %9 : vector<8x1xf32>
    %11 = vector.broadcast %10 : vector<8x1xf32> to vector<8x32xf32>
    %12 = arith.mulf %1, %11 : vector<8x32xf32>
    %13 = vector.broadcast %2 : vector<1x32xf32> to vector<8x32xf32>
    %14 = arith.mulf %12, %13 : vector<8x32xf32>
    %15 = arith.truncf %14 : vector<8x32xf32> to vector<8x32xbf16>
    %c0_6 = arith.constant 0 : index
    %c0_7 = arith.constant 0 : index
    %16 = vector.load %arg3[%c0_6, %c0_7] : memref<32x128xbf16, #tpu.memory_space<vmem>>, vector<32x128xbf16>
    %cst_8 = arith.constant dense<0.000000e+00> : vector<8x128xf32>
    %17 = tpu.matmul %15, %16, %cst_8 {dimension_numbers = #tpu.dot_dimension_numbers<[1], [0], [0], [1], [0, 0, 1, 1], [], []>} : vector<8x32xbf16>, vector<32x128xbf16>, vector<8x128xf32> -> vector<8x128xf32>
    %18 = vector.extract_strided_slice %17 {offsets = [0, 0], sizes = [8, 64], strides = [1, 1]} : vector<8x128xf32> to vector<8x64xf32>
    %c0_9 = arith.constant 0 : index
    %c0_10 = arith.constant 0 : index
    %19 = vector.load %arg4[%c0_9, %c0_10] : memref<1x64xf32, #tpu.memory_space<vmem>>, vector<1x64xf32>
    %c0_11 = arith.constant 0 : index
    %c0_12 = arith.constant 0 : index
    %20 = vector.load %arg5[%c0_11, %c0_12] : memref<1x64xf32, #tpu.memory_space<vmem>>, vector<1x64xf32>
    %cst_13 = arith.constant dense<0.000000e+00> : vector<8xf32>
    %21 = vector.multi_reduction <add>, %18, %cst_13 [1] : vector<8x64xf32> to vector<8xf32>
    %22 = vector.shape_cast %21 : vector<8xf32> to vector<8x1xf32>
    %cst_14 = arith.constant 6.400000e+01 : f32
    %23 = vector.broadcast %cst_14 : f32 to vector<8x1xf32>
    %24 = arith.divf %22, %23 : vector<8x1xf32>
    %25 = vector.broadcast %24 : vector<8x1xf32> to vector<8x64xf32>
    %26 = arith.subf %18, %25 : vector<8x64xf32>
    %27 = arith.mulf %26, %26 : vector<8x64xf32>
    %cst_15 = arith.constant dense<0.000000e+00> : vector<8xf32>
    %28 = vector.multi_reduction <add>, %27, %cst_15 [1] : vector<8x64xf32> to vector<8xf32>
    %29 = vector.shape_cast %28 : vector<8xf32> to vector<8x1xf32>
    %cst_16 = arith.constant 6.400000e+01 : f32
    %30 = vector.broadcast %cst_16 : f32 to vector<8x1xf32>
    %31 = arith.divf %29, %30 : vector<8x1xf32>
    %32 = vector.broadcast %24 : vector<8x1xf32> to vector<8x64xf32>
    %33 = arith.subf %18, %32 : vector<8x64xf32>
    %cst_17 = arith.constant 9.99999974E-6 : f32
    %34 = vector.broadcast %cst_17 : f32 to vector<8x1xf32>
    %35 = arith.addf %31, %34 : vector<8x1xf32>
    %36 = math.rsqrt %35 : vector<8x1xf32>
    %37 = vector.broadcast %36 : vector<8x1xf32> to vector<8x64xf32>
    %38 = arith.mulf %33, %37 : vector<8x64xf32>
    %39 = vector.broadcast %19 : vector<1x64xf32> to vector<8x64xf32>
    %40 = arith.mulf %38, %39 : vector<8x64xf32>
    %41 = vector.broadcast %20 : vector<1x64xf32> to vector<8x64xf32>
    %42 = arith.addf %40, %41 : vector<8x64xf32>
    %43 = arith.truncf %42 : vector<8x64xf32> to vector<8x64xbf16>
    %c0_18 = arith.constant 0 : index
    %c0_19 = arith.constant 0 : index
    %c0_20 = arith.constant 0 : index
    %44 = vector.load %arg6[%c0_18, %c0_19, %c0_20] : memref<1x8x64xbf16, #tpu.memory_space<vmem>>, vector<1x8x64xbf16>
    %45 = vector.shape_cast %44 : vector<1x8x64xbf16> to vector<8x64xbf16>
    %46 = vector.shape_cast %43 : vector<8x64xbf16> to vector<1x8x64xbf16>
    tpu.vector_store %arg6[%c0_18, %c0_19, %c0_20], %46 {strides = array<i32>} : memref<1x8x64xbf16, #tpu.memory_space<vmem>>, vector<1x8x64xbf16>,
    %47 = vector.extract_strided_slice %17 {offsets = [0, 64], sizes = [8, 64], strides = [1, 1]} : vector<8x128xf32> to vector<8x64xf32>
    %48 = arith.truncf %47 : vector<8x64xf32> to vector<8x64xbf16>
    %c0_21 = arith.constant 0 : index
    %c0_22 = arith.constant 0 : index
    %c0_23 = arith.constant 0 : index
    %49 = vector.load %arg7[%c0_21, %c0_22, %c0_23] : memref<1x8x64xbf16, #tpu.memory_space<vmem>>, vector<1x8x64xbf16>
    %50 = vector.shape_cast %49 : vector<1x8x64xbf16> to vector<8x64xbf16>
    %51 = vector.shape_cast %48 : vector<8x64xbf16> to vector<1x8x64xbf16>
    tpu.vector_store %arg7[%c0_21, %c0_22, %c0_23], %51 {strides = array<i32>} : memref<1x8x64xbf16, #tpu.memory_space<vmem>>, vector<1x8x64xbf16>,
    return
  }
  func.func @transform_0(%arg0: i32) -> (i32, i32, i32) {
    %c0_i32 = arith.constant 0 : i32
    %c0_i32_0 = arith.constant 0 : i32
    %c0_i32_1 = arith.constant 0 : i32
    return %arg0, %c0_i32, %c0_i32_0 : i32, i32, i32
  }
  func.func @transform_1(%arg0: i32) -> (i32, i32) {
    %c0_i32 = arith.constant 0 : i32
    %c0_i32_0 = arith.constant 0 : i32
    %c0_i32_1 = arith.constant 0 : i32
    return %c0_i32, %c0_i32_0 : i32, i32
  }
  func.func @transform_2(%arg0: i32) -> (i32, i32) {
    %c0_i32 = arith.constant 0 : i32
    %c0_i32_0 = arith.constant 0 : i32
    %c0_i32_1 = arith.constant 0 : i32
    return %c0_i32, %c0_i32_0 : i32, i32
  }
  func.func @transform_3(%arg0: i32) -> (i32, i32) {
    %c0_i32 = arith.constant 0 : i32
    %c0_i32_0 = arith.constant 0 : i32
    %c0_i32_1 = arith.constant 0 : i32
    return %c0_i32, %c0_i32_0 : i32, i32
  }
  func.func @transform_4(%arg0: i32) -> (i32, i32) {
    %c0_i32 = arith.constant 0 : i32
    %c0_i32_0 = arith.constant 0 : i32
    %c0_i32_1 = arith.constant 0 : i32
    return %c0_i32, %c0_i32_0 : i32, i32
  }
  func.func @transform_5(%arg0: i32) -> (i32, i32, i32) {
    %c0_i32 = arith.constant 0 : i32
    %c0_i32_0 = arith.constant 0 : i32
    %c0_i32_1 = arith.constant 0 : i32
    return %arg0, %c0_i32, %c0_i32_0 : i32, i32, i32
  }
  func.func @transform_6(%arg0: i32) -> (i32, i32, i32) {
    %c0_i32 = arith.constant 0 : i32
    %c0_i32_0 = arith.constant 0 : i32
    %c0_i32_1 = arith.constant 0 : i32
    return %arg0, %c0_i32, %c0_i32_0 : i32, i32, i32
  }
}

module attributes {stable_mosaic.version = 11 : i64} {
  func.func @_adaln_kernel(%arg0: memref<2x64xf32, #tpu.memory_space<vmem>>, %arg1: memref<64x256xbf16, #tpu.memory_space<vmem>>, %arg2: memref<1x256xf32, #tpu.memory_space<vmem>>, %arg3: memref<2x1x64xf32, #tpu.memory_space<vmem>>, %arg4: memref<2x1x64xf32, #tpu.memory_space<vmem>>, %arg5: memref<2x1x64xf32, #tpu.memory_space<vmem>>, %arg6: memref<2x1x64xf32, #tpu.memory_space<vmem>>) attributes {dimension_semantics = [], scalar_prefetch = 0 : i64, scratch_operands = 0 : i64, tpu.core_type = #tpu.core_type<tc>} {
    %c0 = arith.constant 0 : index
    %c0_0 = arith.constant 0 : index
    %0 = vector.load %arg0[%c0, %c0_0] : memref<2x64xf32, #tpu.memory_space<vmem>>, vector<2x64xf32>
    %1 = arith.negf %0 : vector<2x64xf32>
    %2 = math.exp %1 : vector<2x64xf32>
    %cst = arith.constant 1.000000e+00 : f32
    %3 = vector.broadcast %cst : f32 to vector<2x64xf32>
    %4 = arith.addf %3, %2 : vector<2x64xf32>
    %5 = arith.divf %3, %4 : vector<2x64xf32>
    %6 = arith.mulf %0, %5 : vector<2x64xf32>
    %7 = arith.truncf %6 : vector<2x64xf32> to vector<2x64xbf16>
    %c0_1 = arith.constant 0 : index
    %c0_2 = arith.constant 0 : index
    %8 = vector.load %arg1[%c0_1, %c0_2] : memref<64x256xbf16, #tpu.memory_space<vmem>>, vector<64x256xbf16>
    %cst_3 = arith.constant dense<0.000000e+00> : vector<2x256xf32>
    %9 = tpu.matmul %7, %8, %cst_3 {dimension_numbers = #tpu.dot_dimension_numbers<[1], [0], [0], [1], [0, 0, 1, 1], [], []>} : vector<2x64xbf16>, vector<64x256xbf16>, vector<2x256xf32> -> vector<2x256xf32>
    %c0_4 = arith.constant 0 : index
    %c0_5 = arith.constant 0 : index
    %10 = vector.load %arg2[%c0_4, %c0_5] : memref<1x256xf32, #tpu.memory_space<vmem>>, vector<1x256xf32>
    %11 = vector.broadcast %10 : vector<1x256xf32> to vector<2x256xf32>
    %12 = arith.addf %9, %11 : vector<2x256xf32>
    %13 = vector.extract_strided_slice %12 {offsets = [0, 0], sizes = [2, 64], strides = [1, 1]} : vector<2x256xf32> to vector<2x64xf32>
    %14 = vector.shape_cast %13 : vector<2x64xf32> to vector<2x1x64xf32>
    %c0_6 = arith.constant 0 : index
    %c0_7 = arith.constant 0 : index
    %c0_8 = arith.constant 0 : index
    %15 = vector.load %arg3[%c0_6, %c0_7, %c0_8] : memref<2x1x64xf32, #tpu.memory_space<vmem>>, vector<2x1x64xf32>
    tpu.vector_store %arg3[%c0_6, %c0_7, %c0_8], %14 {strides = array<i32>} : memref<2x1x64xf32, #tpu.memory_space<vmem>>, vector<2x1x64xf32>,
    %16 = vector.extract_strided_slice %12 {offsets = [0, 64], sizes = [2, 64], strides = [1, 1]} : vector<2x256xf32> to vector<2x64xf32>
    %17 = vector.shape_cast %16 : vector<2x64xf32> to vector<2x1x64xf32>
    %c0_9 = arith.constant 0 : index
    %c0_10 = arith.constant 0 : index
    %c0_11 = arith.constant 0 : index
    %18 = vector.load %arg4[%c0_9, %c0_10, %c0_11] : memref<2x1x64xf32, #tpu.memory_space<vmem>>, vector<2x1x64xf32>
    tpu.vector_store %arg4[%c0_9, %c0_10, %c0_11], %17 {strides = array<i32>} : memref<2x1x64xf32, #tpu.memory_space<vmem>>, vector<2x1x64xf32>,
    %19 = vector.extract_strided_slice %12 {offsets = [0, 128], sizes = [2, 64], strides = [1, 1]} : vector<2x256xf32> to vector<2x64xf32>
    %20 = vector.shape_cast %19 : vector<2x64xf32> to vector<2x1x64xf32>
    %c0_12 = arith.constant 0 : index
    %c0_13 = arith.constant 0 : index
    %c0_14 = arith.constant 0 : index
    %21 = vector.load %arg5[%c0_12, %c0_13, %c0_14] : memref<2x1x64xf32, #tpu.memory_space<vmem>>, vector<2x1x64xf32>
    tpu.vector_store %arg5[%c0_12, %c0_13, %c0_14], %20 {strides = array<i32>} : memref<2x1x64xf32, #tpu.memory_space<vmem>>, vector<2x1x64xf32>,
    %22 = vector.extract_strided_slice %12 {offsets = [0, 192], sizes = [2, 64], strides = [1, 1]} : vector<2x256xf32> to vector<2x64xf32>
    %23 = vector.shape_cast %22 : vector<2x64xf32> to vector<2x1x64xf32>
    %c0_15 = arith.constant 0 : index
    %c0_16 = arith.constant 0 : index
    %c0_17 = arith.constant 0 : index
    %24 = vector.load %arg6[%c0_15, %c0_16, %c0_17] : memref<2x1x64xf32, #tpu.memory_space<vmem>>, vector<2x1x64xf32>
    tpu.vector_store %arg6[%c0_15, %c0_16, %c0_17], %23 {strides = array<i32>} : memref<2x1x64xf32, #tpu.memory_space<vmem>>, vector<2x1x64xf32>,
    return
  }
}

module attributes {stable_mosaic.version = 11 : i64} {
  func.func @_qkv_kernel(%arg0: i32, %arg1: i32, %arg2: memref<1x16x64xf32, #tpu.memory_space<vmem>>, %arg3: memref<1x64xf32, #tpu.memory_space<vmem>>, %arg4: memref<1x1x64xf32, #tpu.memory_space<vmem>>, %arg5: memref<64x192xbf16, #tpu.memory_space<vmem>>, %arg6: memref<1x64xf32, #tpu.memory_space<vmem>>, %arg7: memref<1x64xf32, #tpu.memory_space<vmem>>, %arg8: memref<1x64xf32, #tpu.memory_space<vmem>>, %arg9: memref<1x64xf32, #tpu.memory_space<vmem>>, %arg10: memref<16x64xf32, #tpu.memory_space<vmem>>, %arg11: memref<16x64xf32, #tpu.memory_space<vmem>>, %arg12: memref<16x64xf32, #tpu.memory_space<vmem>>, %arg13: memref<1x16x64xbf16, #tpu.memory_space<vmem>>, %arg14: memref<1x16x64xbf16, #tpu.memory_space<vmem>>, %arg15: memref<1x16x64xbf16, #tpu.memory_space<vmem>>) attributes {dimension_semantics = [#tpu.dimension_semantics<parallel>, #tpu.dimension_semantics<parallel>], iteration_bounds = array<i64: 2, 1>, scalar_prefetch = 0 : i64, scratch_operands = 0 : i64, tpu.core_type = #tpu.core_type<tc>, window_params = [{transform_indices = @transform_0, window_bounds = array<i64: 1, 16, 64>}, {pipeline_mode = #tpu.pipeline_mode<synchronous>, transform_indices = @transform_1, window_bounds = array<i64: 1, 64>}, {pipeline_mode = #tpu.pipeline_mode<synchronous>, transform_indices = @transform_2, window_bounds = array<i64: 1, 1, 64>}, {pipeline_mode = #tpu.pipeline_mode<synchronous>, transform_indices = @transform_3, window_bounds = array<i64: 64, 192>}, {pipeline_mode = #tpu.pipeline_mode<synchronous>, transform_indices = @transform_4, window_bounds = array<i64: 1, 64>}, {pipeline_mode = #tpu.pipeline_mode<synchronous>, transform_indices = @transform_5, window_bounds = array<i64: 1, 64>}, {pipeline_mode = #tpu.pipeline_mode<synchronous>, transform_indices = @transform_6, window_bounds = array<i64: 1, 64>}, {pipeline_mode = #tpu.pipeline_mode<synchronous>, transform_indices = @transform_7, window_bounds = array<i64: 1, 64>}, {transform_indices = @transform_8, window_bounds = array<i64: 16, 64>}, {transform_indices = @transform_9, window_bounds = array<i64: 16, 64>}, {transform_indices = @transform_10, window_bounds = array<i64: 16, 64>}, {transform_indices = @transform_11, window_bounds = array<i64: 1, 16, 64>}, {transform_indices = @transform_12, window_bounds = array<i64: 1, 16, 64>}, {transform_indices = @transform_13, window_bounds = array<i64: 1, 16, 64>}]} {
    %c0 = arith.constant 0 : index
    %c0_0 = arith.constant 0 : index
    %c0_1 = arith.constant 0 : index
    %0 = vector.load %arg2[%c0, %c0_0, %c0_1] : memref<1x16x64xf32, #tpu.memory_space<vmem>>, vector<1x16x64xf32>
    %1 = vector.shape_cast %0 : vector<1x16x64xf32> to vector<16x64xf32>
    %c0_2 = arith.constant 0 : index
    %c0_3 = arith.constant 0 : index
    %2 = vector.load %arg3[%c0_2, %c0_3] : memref<1x64xf32, #tpu.memory_space<vmem>>, vector<1x64xf32>
    %3 = arith.mulf %1, %1 : vector<16x64xf32>
    %cst = arith.constant dense<0.000000e+00> : vector<16xf32>
    %4 = vector.multi_reduction <add>, %3, %cst [1] : vector<16x64xf32> to vector<16xf32>
    %5 = vector.shape_cast %4 : vector<16xf32> to vector<16x1xf32>
    %cst_4 = arith.constant 6.400000e+01 : f32
    %6 = vector.broadcast %cst_4 : f32 to vector<16x1xf32>
    %7 = arith.divf %5, %6 : vector<16x1xf32>
    %cst_5 = arith.constant 9.99999974E-6 : f32
    %8 = vector.broadcast %cst_5 : f32 to vector<16x1xf32>
    %9 = arith.addf %7, %8 : vector<16x1xf32>
    %10 = math.rsqrt %9 : vector<16x1xf32>
    %11 = vector.broadcast %10 : vector<16x1xf32> to vector<16x64xf32>
    %12 = arith.mulf %1, %11 : vector<16x64xf32>
    %13 = vector.broadcast %2 : vector<1x64xf32> to vector<16x64xf32>
    %14 = arith.mulf %12, %13 : vector<16x64xf32>
    %c0_6 = arith.constant 0 : index
    %c0_7 = arith.constant 0 : index
    %c0_8 = arith.constant 0 : index
    %15 = vector.load %arg4[%c0_6, %c0_7, %c0_8] : memref<1x1x64xf32, #tpu.memory_space<vmem>>, vector<1x1x64xf32>
    %16 = vector.shape_cast %15 : vector<1x1x64xf32> to vector<1x64xf32>
    %cst_9 = arith.constant 1.000000e+00 : f32
    %17 = vector.broadcast %cst_9 : f32 to vector<1x64xf32>
    %18 = arith.addf %17, %16 : vector<1x64xf32>
    %19 = vector.broadcast %18 : vector<1x64xf32> to vector<16x64xf32>
    %20 = arith.mulf %14, %19 : vector<16x64xf32>
    %21 = arith.truncf %20 : vector<16x64xf32> to vector<16x64xbf16>
    %c0_10 = arith.constant 0 : index
    %c0_11 = arith.constant 0 : index
    %22 = vector.load %arg5[%c0_10, %c0_11] : memref<64x192xbf16, #tpu.memory_space<vmem>>, vector<64x192xbf16>
    %cst_12 = arith.constant dense<0.000000e+00> : vector<16x192xf32>
    %23 = tpu.matmul %21, %22, %cst_12 {dimension_numbers = #tpu.dot_dimension_numbers<[1], [0], [0], [1], [0, 0, 1, 1], [], []>} : vector<16x64xbf16>, vector<64x192xbf16>, vector<16x192xf32> -> vector<16x192xf32>
    %24 = vector.extract_strided_slice %23 {offsets = [0, 0], sizes = [16, 64], strides = [1, 1]} : vector<16x192xf32> to vector<16x64xf32>
    %c0_13 = arith.constant 0 : index
    %c0_14 = arith.constant 0 : index
    %25 = vector.load %arg6[%c0_13, %c0_14] : memref<1x64xf32, #tpu.memory_space<vmem>>, vector<1x64xf32>
    %c0_15 = arith.constant 0 : index
    %c0_16 = arith.constant 0 : index
    %26 = vector.load %arg7[%c0_15, %c0_16] : memref<1x64xf32, #tpu.memory_space<vmem>>, vector<1x64xf32>
    %cst_17 = arith.constant dense<0.000000e+00> : vector<16xf32>
    %27 = vector.multi_reduction <add>, %24, %cst_17 [1] : vector<16x64xf32> to vector<16xf32>
    %28 = vector.shape_cast %27 : vector<16xf32> to vector<16x1xf32>
    %cst_18 = arith.constant 6.400000e+01 : f32
    %29 = vector.broadcast %cst_18 : f32 to vector<16x1xf32>
    %30 = arith.divf %28, %29 : vector<16x1xf32>
    %31 = vector.broadcast %30 : vector<16x1xf32> to vector<16x64xf32>
    %32 = arith.subf %24, %31 : vector<16x64xf32>
    %33 = arith.mulf %32, %32 : vector<16x64xf32>
    %cst_19 = arith.constant dense<0.000000e+00> : vector<16xf32>
    %34 = vector.multi_reduction <add>, %33, %cst_19 [1] : vector<16x64xf32> to vector<16xf32>
    %35 = vector.shape_cast %34 : vector<16xf32> to vector<16x1xf32>
    %cst_20 = arith.constant 6.400000e+01 : f32
    %36 = vector.broadcast %cst_20 : f32 to vector<16x1xf32>
    %37 = arith.divf %35, %36 : vector<16x1xf32>
    %38 = vector.broadcast %30 : vector<16x1xf32> to vector<16x64xf32>
    %39 = arith.subf %24, %38 : vector<16x64xf32>
    %cst_21 = arith.constant 9.99999974E-6 : f32
    %40 = vector.broadcast %cst_21 : f32 to vector<16x1xf32>
    %41 = arith.addf %37, %40 : vector<16x1xf32>
    %42 = math.rsqrt %41 : vector<16x1xf32>
    %43 = vector.broadcast %42 : vector<16x1xf32> to vector<16x64xf32>
    %44 = arith.mulf %39, %43 : vector<16x64xf32>
    %45 = vector.broadcast %25 : vector<1x64xf32> to vector<16x64xf32>
    %46 = arith.mulf %44, %45 : vector<16x64xf32>
    %47 = vector.broadcast %26 : vector<1x64xf32> to vector<16x64xf32>
    %48 = arith.addf %46, %47 : vector<16x64xf32>
    %49 = vector.extract_strided_slice %23 {offsets = [0, 64], sizes = [16, 64], strides = [1, 1]} : vector<16x192xf32> to vector<16x64xf32>
    %c0_22 = arith.constant 0 : index
    %c0_23 = arith.constant 0 : index
    %50 = vector.load %arg8[%c0_22, %c0_23] : memref<1x64xf32, #tpu.memory_space<vmem>>, vector<1x64xf32>
    %c0_24 = arith.constant 0 : index
    %c0_25 = arith.constant 0 : index
    %51 = vector.load %arg9[%c0_24, %c0_25] : memref<1x64xf32, #tpu.memory_space<vmem>>, vector<1x64xf32>
    %cst_26 = arith.constant dense<0.000000e+00> : vector<16xf32>
    %52 = vector.multi_reduction <add>, %49, %cst_26 [1] : vector<16x64xf32> to vector<16xf32>
    %53 = vector.shape_cast %52 : vector<16xf32> to vector<16x1xf32>
    %cst_27 = arith.constant 6.400000e+01 : f32
    %54 = vector.broadcast %cst_27 : f32 to vector<16x1xf32>
    %55 = arith.divf %53, %54 : vector<16x1xf32>
    %56 = vector.broadcast %55 : vector<16x1xf32> to vector<16x64xf32>
    %57 = arith.subf %49, %56 : vector<16x64xf32>
    %58 = arith.mulf %57, %57 : vector<16x64xf32>
    %cst_28 = arith.constant dense<0.000000e+00> : vector<16xf32>
    %59 = vector.multi_reduction <add>, %58, %cst_28 [1] : vector<16x64xf32> to vector<16xf32>
    %60 = vector.shape_cast %59 : vector<16xf32> to vector<16x1xf32>
    %cst_29 = arith.constant 6.400000e+01 : f32
    %61 = vector.broadcast %cst_29 : f32 to vector<16x1xf32>
    %62 = arith.divf %60, %61 : vector<16x1xf32>
    %63 = vector.broadcast %55 : vector<16x1xf32> to vector<16x64xf32>
    %64 = arith.subf %49, %63 : vector<16x64xf32>
    %cst_30 = arith.constant 9.99999974E-6 : f32
    %65 = vector.broadcast %cst_30 : f32 to vector<16x1xf32>
    %66 = arith.addf %62, %65 : vector<16x1xf32>
    %67 = math.rsqrt %66 : vector<16x1xf32>
    %68 = vector.broadcast %67 : vector<16x1xf32> to vector<16x64xf32>
    %69 = arith.mulf %64, %68 : vector<16x64xf32>
    %70 = vector.broadcast %50 : vector<1x64xf32> to vector<16x64xf32>
    %71 = arith.mulf %69, %70 : vector<16x64xf32>
    %72 = vector.broadcast %51 : vector<1x64xf32> to vector<16x64xf32>
    %73 = arith.addf %71, %72 : vector<16x64xf32>
    %c0_31 = arith.constant 0 : index
    %c0_32 = arith.constant 0 : index
    %74 = vector.load %arg10[%c0_31, %c0_32] : memref<16x64xf32, #tpu.memory_space<vmem>>, vector<16x64xf32>
    %c0_33 = arith.constant 0 : index
    %c0_34 = arith.constant 0 : index
    %75 = vector.load %arg11[%c0_33, %c0_34] : memref<16x64xf32, #tpu.memory_space<vmem>>, vector<16x64xf32>
    %c0_35 = arith.constant 0 : index
    %c0_36 = arith.constant 0 : index
    %76 = vector.load %arg12[%c0_35, %c0_36] : memref<16x64xf32, #tpu.memory_space<vmem>>, vector<16x64xf32>
    %77 = arith.mulf %48, %74 : vector<16x64xf32>
    %78 = vector.extract_strided_slice %48 {offsets = [0, 8], sizes = [16, 56], strides = [1, 1]} : vector<16x64xf32> to vector<16x56xf32>
    %79 = vector.extract_strided_slice %48 {offsets = [0, 0], sizes = [16, 8], strides = [1, 1]} : vector<16x64xf32> to vector<16x8xf32>
    %80 = tpu.concatenate %78, %79 in 1 : vector<16x56xf32>, vector<16x8xf32> -> vector<16x64xf32>
    %81 = arith.mulf %80, %75 : vector<16x64xf32>
    %82 = arith.addf %77, %81 : vector<16x64xf32>
    %83 = vector.extract_strided_slice %48 {offsets = [0, 56], sizes = [16, 8], strides = [1, 1]} : vector<16x64xf32> to vector<16x8xf32>
    %84 = vector.extract_strided_slice %48 {offsets = [0, 0], sizes = [16, 56], strides = [1, 1]} : vector<16x64xf32> to vector<16x56xf32>
    %85 = tpu.concatenate %83, %84 in 1 : vector<16x8xf32>, vector<16x56xf32> -> vector<16x64xf32>
    %86 = arith.mulf %85, %76 : vector<16x64xf32>
    %87 = arith.addf %82, %86 : vector<16x64xf32>
    %88 = arith.truncf %87 : vector<16x64xf32> to vector<16x64xbf16>
    %c0_37 = arith.constant 0 : index
    %c0_38 = arith.constant 0 : index
    %c0_39 = arith.constant 0 : index
    %89 = vector.load %arg13[%c0_37, %c0_38, %c0_39] : memref<1x16x64xbf16, #tpu.memory_space<vmem>>, vector<1x16x64xbf16>
    %90 = vector.shape_cast %89 : vector<1x16x64xbf16> to vector<16x64xbf16>
    %91 = vector.shape_cast %88 : vector<16x64xbf16> to vector<1x16x64xbf16>
    tpu.vector_store %arg13[%c0_37, %c0_38, %c0_39], %91 {strides = array<i32>} : memref<1x16x64xbf16, #tpu.memory_space<vmem>>, vector<1x16x64xbf16>,
    %92 = arith.mulf %73, %74 : vector<16x64xf32>
    %93 = vector.extract_strided_slice %73 {offsets = [0, 8], sizes = [16, 56], strides = [1, 1]} : vector<16x64xf32> to vector<16x56xf32>
    %94 = vector.extract_strided_slice %73 {offsets = [0, 0], sizes = [16, 8], strides = [1, 1]} : vector<16x64xf32> to vector<16x8xf32>
    %95 = tpu.concatenate %93, %94 in 1 : vector<16x56xf32>, vector<16x8xf32> -> vector<16x64xf32>
    %96 = arith.mulf %95, %75 : vector<16x64xf32>
    %97 = arith.addf %92, %96 : vector<16x64xf32>
    %98 = vector.extract_strided_slice %73 {offsets = [0, 56], sizes = [16, 8], strides = [1, 1]} : vector<16x64xf32> to vector<16x8xf32>
    %99 = vector.extract_strided_slice %73 {offsets = [0, 0], sizes = [16, 56], strides = [1, 1]} : vector<16x64xf32> to vector<16x56xf32>
    %100 = tpu.concatenate %98, %99 in 1 : vector<16x8xf32>, vector<16x56xf32> -> vector<16x64xf32>
    %101 = arith.mulf %100, %76 : vector<16x64xf32>
    %102 = arith.addf %97, %101 : vector<16x64xf32>
    %103 = arith.truncf %102 : vector<16x64xf32> to vector<16x64xbf16>
    %c0_40 = arith.constant 0 : index
    %c0_41 = arith.constant 0 : index
    %c0_42 = arith.constant 0 : index
    %104 = vector.load %arg14[%c0_40, %c0_41, %c0_42] : memref<1x16x64xbf16, #tpu.memory_space<vmem>>, vector<1x16x64xbf16>
    %105 = vector.shape_cast %104 : vector<1x16x64xbf16> to vector<16x64xbf16>
    %106 = vector.shape_cast %103 : vector<16x64xbf16> to vector<1x16x64xbf16>
    tpu.vector_store %arg14[%c0_40, %c0_41, %c0_42], %106 {strides = array<i32>} : memref<1x16x64xbf16, #tpu.memory_space<vmem>>, vector<1x16x64xbf16>,
    %107 = vector.extract_strided_slice %23 {offsets = [0, 128], sizes = [16, 64], strides = [1, 1]} : vector<16x192xf32> to vector<16x64xf32>
    %108 = arith.truncf %107 : vector<16x64xf32> to vector<16x64xbf16>
    %c0_43 = arith.constant 0 : index
    %c0_44 = arith.constant 0 : index
    %c0_45 = arith.constant 0 : index
    %109 = vector.load %arg15[%c0_43, %c0_44, %c0_45] : memref<1x16x64xbf16, #tpu.memory_space<vmem>>, vector<1x16x64xbf16>
    %110 = vector.shape_cast %109 : vector<1x16x64xbf16> to vector<16x64xbf16>
    %111 = vector.shape_cast %108 : vector<16x64xbf16> to vector<1x16x64xbf16>
    tpu.vector_store %arg15[%c0_43, %c0_44, %c0_45], %111 {strides = array<i32>} : memref<1x16x64xbf16, #tpu.memory_space<vmem>>, vector<1x16x64xbf16>,
    return
  }
  func.func @transform_0(%arg0: i32, %arg1: i32) -> (i32, i32, i32) {
    %c0_i32 = arith.constant 0 : i32
    %c0_i32_0 = arith.constant 0 : i32
    return %arg0, %arg1, %c0_i32 : i32, i32, i32
  }
  func.func @transform_1(%arg0: i32, %arg1: i32) -> (i32, i32) {
    %c0_i32 = arith.constant 0 : i32
    %c0_i32_0 = arith.constant 0 : i32
    %c0_i32_1 = arith.constant 0 : i32
    return %c0_i32, %c0_i32_0 : i32, i32
  }
  func.func @transform_2(%arg0: i32, %arg1: i32) -> (i32, i32, i32) {
    %c0_i32 = arith.constant 0 : i32
    %c0_i32_0 = arith.constant 0 : i32
    %c0_i32_1 = arith.constant 0 : i32
    return %arg0, %c0_i32, %c0_i32_0 : i32, i32, i32
  }
  func.func @transform_3(%arg0: i32, %arg1: i32) -> (i32, i32) {
    %c0_i32 = arith.constant 0 : i32
    %c0_i32_0 = arith.constant 0 : i32
    %c0_i32_1 = arith.constant 0 : i32
    return %c0_i32, %c0_i32_0 : i32, i32
  }
  func.func @transform_4(%arg0: i32, %arg1: i32) -> (i32, i32) {
    %c0_i32 = arith.constant 0 : i32
    %c0_i32_0 = arith.constant 0 : i32
    %c0_i32_1 = arith.constant 0 : i32
    return %c0_i32, %c0_i32_0 : i32, i32
  }
  func.func @transform_5(%arg0: i32, %arg1: i32) -> (i32, i32) {
    %c0_i32 = arith.constant 0 : i32
    %c0_i32_0 = arith.constant 0 : i32
    %c0_i32_1 = arith.constant 0 : i32
    return %c0_i32, %c0_i32_0 : i32, i32
  }
  func.func @transform_6(%arg0: i32, %arg1: i32) -> (i32, i32) {
    %c0_i32 = arith.constant 0 : i32
    %c0_i32_0 = arith.constant 0 : i32
    %c0_i32_1 = arith.constant 0 : i32
    return %c0_i32, %c0_i32_0 : i32, i32
  }
  func.func @transform_7(%arg0: i32, %arg1: i32) -> (i32, i32) {
    %c0_i32 = arith.constant 0 : i32
    %c0_i32_0 = arith.constant 0 : i32
    %c0_i32_1 = arith.constant 0 : i32
    return %c0_i32, %c0_i32_0 : i32, i32
  }
  func.func @transform_8(%arg0: i32, %arg1: i32) -> (i32, i32) {
    %c0_i32 = arith.constant 0 : i32
    %c0_i32_0 = arith.constant 0 : i32
    return %arg1, %c0_i32 : i32, i32
  }
  func.func @transform_9(%arg0: i32, %arg1: i32) -> (i32, i32) {
    %c0_i32 = arith.constant 0 : i32
    %c0_i32_0 = arith.constant 0 : i32
    return %arg1, %c0_i32 : i32, i32
  }
  func.func @transform_10(%arg0: i32, %arg1: i32) -> (i32, i32) {
    %c0_i32 = arith.constant 0 : i32
    %c0_i32_0 = arith.constant 0 : i32
    return %arg1, %c0_i32 : i32, i32
  }
  func.func @transform_11(%arg0: i32, %arg1: i32) -> (i32, i32, i32) {
    %c0_i32 = arith.constant 0 : i32
    %c0_i32_0 = arith.constant 0 : i32
    return %arg0, %arg1, %c0_i32 : i32, i32, i32
  }
  func.func @transform_12(%arg0: i32, %arg1: i32) -> (i32, i32, i32) {
    %c0_i32 = arith.constant 0 : i32
    %c0_i32_0 = arith.constant 0 : i32
    return %arg0, %arg1, %c0_i32 : i32, i32, i32
  }
  func.func @transform_13(%arg0: i32, %arg1: i32) -> (i32, i32, i32) {
    %c0_i32 = arith.constant 0 : i32
    %c0_i32_0 = arith.constant 0 : i32
    return %arg0, %arg1, %c0_i32 : i32, i32, i32
  }
}

module attributes {stable_mosaic.version = 11 : i64} {
  func.func @_attn_wo_kernel(%arg0: i32, %arg1: i32, %arg2: memref<1x16x64xbf16, #tpu.memory_space<vmem>>, %arg3: memref<1x16x64xbf16, #tpu.memory_space<vmem>>, %arg4: memref<1x16x64xbf16, #tpu.memory_space<vmem>>, %arg5: memref<1x1x16xi32, #tpu.memory_space<vmem>>, %arg6: memref<1x8x64xbf16, #tpu.memory_space<vmem>>, %arg7: memref<1x8x64xbf16, #tpu.memory_space<vmem>>, %arg8: memref<1x1x8xi32, #tpu.memory_space<vmem>>, %arg9: memref<1x1x64xf32, #tpu.memory_space<vmem>>, %arg10: memref<64x64xbf16, #tpu.memory_space<vmem>>, %arg11: memref<1x16x64xf32, #tpu.memory_space<vmem>>, %arg12: memref<1x64xf32, #tpu.memory_space<vmem>>, %arg13: memref<1x1x64xf32, #tpu.memory_space<vmem>>, %arg14: memref<1x16x64xbf16, #tpu.memory_space<vmem>>, %arg15: memref<16x64xf32, #tpu.memory_space<vmem>>, %arg16: memref<16x64xf32, #tpu.memory_space<vmem>>) attributes {dimension_semantics = [#tpu.dimension_semantics<parallel>, #tpu.dimension_semantics<parallel>], iteration_bounds = array<i64: 2, 1>, scalar_prefetch = 0 : i64, scratch_operands = 2 : i64, tpu.core_type = #tpu.core_type<tc>, window_params = [{transform_indices = @transform_0, window_bounds = array<i64: 1, 16, 64>}, {pipeline_mode = #tpu.pipeline_mode<synchronous>, transform_indices = @transform_1, window_bounds = array<i64: 1, 16, 64>}, {pipeline_mode = #tpu.pipeline_mode<synchronous>, transform_indices = @transform_2, window_bounds = array<i64: 1, 16, 64>}, {pipeline_mode = #tpu.pipeline_mode<synchronous>, transform_indices = @transform_3, window_bounds = array<i64: 1, 1, 16>}, {pipeline_mode = #tpu.pipeline_mode<synchronous>, transform_indices = @transform_4, window_bounds = array<i64: 1, 8, 64>}, {pipeline_mode = #tpu.pipeline_mode<synchronous>, transform_indices = @transform_5, window_bounds = array<i64: 1, 8, 64>}, {pipeline_mode = #tpu.pipeline_mode<synchronous>, transform_indices = @transform_6, window_bounds = array<i64: 1, 1, 8>}, {pipeline_mode = #tpu.pipeline_mode<synchronous>, transform_indices = @transform_7, window_bounds = array<i64: 1, 1, 64>}, {pipeline_mode = #tpu.pipeline_mode<synchronous>, transform_indices = @transform_8, window_bounds = array<i64: 64, 64>}, {transform_indices = @transform_9, window_bounds = array<i64: 1, 16, 64>}, {pipeline_mode = #tpu.pipeline_mode<synchronous>, transform_indices = @transform_10, window_bounds = array<i64: 1, 64>}, {pipeline_mode = #tpu.pipeline_mode<synchronous>, transform_indices = @transform_11, window_bounds = array<i64: 1, 1, 64>}, {transform_indices = @transform_12, window_bounds = array<i64: 1, 16, 64>}]} {
    %c0 = arith.constant 0 : index
    %c0_0 = arith.constant 0 : index
    %c0_1 = arith.constant 0 : index
    %0 = vector.load %arg2[%c0, %c0_0, %c0_1] : memref<1x16x64xbf16, #tpu.memory_space<vmem>>, vector<1x16x64xbf16>
    %1 = vector.shape_cast %0 : vector<1x16x64xbf16> to vector<16x64xbf16>
    %2 = arith.extf %1 : vector<16x64xbf16> to vector<16x64xf32>
    %cst = arith.constant 2.500000e-01 : f32
    %3 = vector.broadcast %cst : f32 to vector<16x64xf32>
    %4 = arith.mulf %2, %3 : vector<16x64xf32>
    %5 = arith.truncf %4 : vector<16x64xf32> to vector<16x64xbf16>
    %c0_2 = arith.constant 0 : index
    %c0_3 = arith.constant 0 : index
    %c0_4 = arith.constant 0 : index
    %6 = vector.load %arg3[%c0_2, %c0_3, %c0_4] : memref<1x16x64xbf16, #tpu.memory_space<vmem>>, vector<1x16x64xbf16>
    %7 = vector.shape_cast %6 : vector<1x16x64xbf16> to vector<16x64xbf16>
    %c0_5 = arith.constant 0 : index
    %c0_6 = arith.constant 0 : index
    %c0_7 = arith.constant 0 : index
    %8 = vector.load %arg4[%c0_5, %c0_6, %c0_7] : memref<1x16x64xbf16, #tpu.memory_space<vmem>>, vector<1x16x64xbf16>
    %9 = vector.shape_cast %8 : vector<1x16x64xbf16> to vector<16x64xbf16>
    %c0_8 = arith.constant 0 : index
    %c0_9 = arith.constant 0 : index
    %c0_10 = arith.constant 0 : index
    %10 = vector.load %arg6[%c0_8, %c0_9, %c0_10] : memref<1x8x64xbf16, #tpu.memory_space<vmem>>, vector<1x8x64xbf16>
    %11 = vector.shape_cast %10 : vector<1x8x64xbf16> to vector<8x64xbf16>
    %c0_11 = arith.constant 0 : index
    %c0_12 = arith.constant 0 : index
    %c0_13 = arith.constant 0 : index
    %12 = vector.load %arg7[%c0_11, %c0_12, %c0_13] : memref<1x8x64xbf16, #tpu.memory_space<vmem>>, vector<1x8x64xbf16>
    %13 = vector.shape_cast %12 : vector<1x8x64xbf16> to vector<8x64xbf16>
    %c0_14 = arith.constant 0 : index
    %c0_15 = arith.constant 0 : index
    %c0_16 = arith.constant 0 : index
    %14 = vector.load %arg5[%c0_14, %c0_15, %c0_16] : memref<1x1x16xi32, #tpu.memory_space<vmem>>, vector<1x1x16xi32>
    %15 = vector.shape_cast %14 : vector<1x1x16xi32> to vector<1x16xi32>
    %c0_i32 = arith.constant 0 : i32
    %16 = vector.broadcast %c0_i32 : i32 to vector<1x16xi32>
    %17 = arith.cmpi ne, %15, %16 : vector<1x16xi32>
    %cst_17 = arith.constant 0.000000e+00 : f32
    %cst_18 = arith.constant -1.000000e+30 : f32
    %18 = vector.broadcast %cst_17 : f32 to vector<1x16xf32>
    %19 = vector.broadcast %cst_18 : f32 to vector<1x16xf32>
    %20 = arith.select %17, %18, %19 : vector<1x16xi1>, vector<1x16xf32>
    %c0_19 = arith.constant 0 : index
    %c0_20 = arith.constant 0 : index
    %c0_21 = arith.constant 0 : index
    %21 = vector.load %arg8[%c0_19, %c0_20, %c0_21] : memref<1x1x8xi32, #tpu.memory_space<vmem>>, vector<1x1x8xi32>
    %22 = vector.shape_cast %21 : vector<1x1x8xi32> to vector<1x8xi32>
    %c0_i32_22 = arith.constant 0 : i32
    %23 = vector.broadcast %c0_i32_22 : i32 to vector<1x8xi32>
    %24 = arith.cmpi ne, %22, %23 : vector<1x8xi32>
    %cst_23 = arith.constant 0.000000e+00 : f32
    %cst_24 = arith.constant -1.000000e+30 : f32
    %25 = vector.broadcast %cst_23 : f32 to vector<1x8xf32>
    %26 = vector.broadcast %cst_24 : f32 to vector<1x8xf32>
    %27 = arith.select %24, %25, %26 : vector<1x8xi1>, vector<1x8xf32>
    %28 = vector.extract_strided_slice %5 {offsets = [0, 0], sizes = [16, 16], strides = [1, 1]} : vector<16x64xbf16> to vector<16x16xbf16>
    %29 = vector.extract_strided_slice %7 {offsets = [0, 0], sizes = [16, 16], strides = [1, 1]} : vector<16x64xbf16> to vector<16x16xbf16>
    %30 = vector.extract_strided_slice %9 {offsets = [0, 0], sizes = [16, 16], strides = [1, 1]} : vector<16x64xbf16> to vector<16x16xbf16>
    %31 = tpu.transpose %29, [1, 0] : vector<16x16xbf16> -> vector<16x16xbf16>
    %cst_25 = arith.constant dense<0.000000e+00> : vector<16x16xf32>
    %32 = tpu.matmul %28, %31, %cst_25 {dimension_numbers = #tpu.dot_dimension_numbers<[1], [0], [0], [1], [0, 0, 1, 1], [], []>} : vector<16x16xbf16>, vector<16x16xbf16>, vector<16x16xf32> -> vector<16x16xf32>
    %33 = vector.broadcast %20 : vector<1x16xf32> to vector<16x16xf32>
    %34 = arith.addf %32, %33 : vector<16x16xf32>
    %cst_26 = arith.constant dense<0xFF800000> : vector<16xf32>
    %35 = vector.multi_reduction <maximumf>, %34, %cst_26 [1] : vector<16x16xf32> to vector<16xf32>
    %36 = vector.shape_cast %35 : vector<16xf32> to vector<16x1xf32>
    %37 = vector.broadcast %36 : vector<16x1xf32> to vector<16x16xf32>
    %38 = arith.subf %34, %37 : vector<16x16xf32>
    %39 = math.exp %38 : vector<16x16xf32>
    %cst_27 = arith.constant dense<0.000000e+00> : vector<16xf32>
    %40 = vector.multi_reduction <add>, %39, %cst_27 [1] : vector<16x16xf32> to vector<16xf32>
    %41 = vector.shape_cast %40 : vector<16xf32> to vector<16x1xf32>
    %42 = tpu.reciprocal %41 {approx = true} : vector<16x1xf32> -> vector<16x1xf32>
    %43 = vector.broadcast %42 : vector<16x1xf32> to vector<16x16xf32>
    %44 = arith.mulf %39, %43 : vector<16x16xf32>
    %45 = arith.truncf %44 : vector<16x16xf32> to vector<16x16xbf16>
    %cst_28 = arith.constant dense<0.000000e+00> : vector<16x16xf32>
    %46 = tpu.matmul %45, %30, %cst_28 {dimension_numbers = #tpu.dot_dimension_numbers<[1], [0], [0], [1], [0, 0, 1, 1], [], []>} : vector<16x16xbf16>, vector<16x16xbf16>, vector<16x16xf32> -> vector<16x16xf32>
    %c0_29 = arith.constant 0 : index
    %c0_30 = arith.constant 0 : index
    %47 = vector.load %arg15[%c0_29, %c0_30] : memref<16x64xf32, #tpu.memory_space<vmem>>, vector<16x16xf32>
    tpu.vector_store %arg15[%c0_29, %c0_30], %46 {strides = array<i32>} : memref<16x64xf32, #tpu.memory_space<vmem>>, vector<16x16xf32>,
    %48 = vector.extract_strided_slice %5 {offsets = [0, 0], sizes = [16, 16], strides = [1, 1]} : vector<16x64xbf16> to vector<16x16xbf16>
    %49 = vector.extract_strided_slice %11 {offsets = [0, 0], sizes = [8, 16], strides = [1, 1]} : vector<8x64xbf16> to vector<8x16xbf16>
    %50 = vector.extract_strided_slice %13 {offsets = [0, 0], sizes = [8, 16], strides = [1, 1]} : vector<8x64xbf16> to vector<8x16xbf16>
    %51 = tpu.transpose %49, [1, 0] : vector<8x16xbf16> -> vector<16x8xbf16>
    %cst_31 = arith.constant dense<0.000000e+00> : vector<16x8xf32>
    %52 = tpu.matmul %48, %51, %cst_31 {dimension_numbers = #tpu.dot_dimension_numbers<[1], [0], [0], [1], [0, 0, 1, 1], [], []>} : vector<16x16xbf16>, vector<16x8xbf16>, vector<16x8xf32> -> vector<16x8xf32>
    %53 = vector.broadcast %27 : vector<1x8xf32> to vector<16x8xf32>
    %54 = arith.addf %52, %53 : vector<16x8xf32>
    %cst_32 = arith.constant dense<0xFF800000> : vector<16xf32>
    %55 = vector.multi_reduction <maximumf>, %54, %cst_32 [1] : vector<16x8xf32> to vector<16xf32>
    %56 = vector.shape_cast %55 : vector<16xf32> to vector<16x1xf32>
    %57 = vector.broadcast %56 : vector<16x1xf32> to vector<16x8xf32>
    %58 = arith.subf %54, %57 : vector<16x8xf32>
    %59 = math.exp %58 : vector<16x8xf32>
    %cst_33 = arith.constant dense<0.000000e+00> : vector<16xf32>
    %60 = vector.multi_reduction <add>, %59, %cst_33 [1] : vector<16x8xf32> to vector<16xf32>
    %61 = vector.shape_cast %60 : vector<16xf32> to vector<16x1xf32>
    %62 = tpu.reciprocal %61 {approx = true} : vector<16x1xf32> -> vector<16x1xf32>
    %63 = vector.broadcast %62 : vector<16x1xf32> to vector<16x8xf32>
    %64 = arith.mulf %59, %63 : vector<16x8xf32>
    %65 = arith.truncf %64 : vector<16x8xf32> to vector<16x8xbf16>
    %cst_34 = arith.constant dense<0.000000e+00> : vector<16x16xf32>
    %66 = tpu.matmul %65, %50, %cst_34 {dimension_numbers = #tpu.dot_dimension_numbers<[1], [0], [0], [1], [0, 0, 1, 1], [], []>} : vector<16x8xbf16>, vector<8x16xbf16>, vector<16x16xf32> -> vector<16x16xf32>
    %c0_35 = arith.constant 0 : index
    %c0_36 = arith.constant 0 : index
    %67 = vector.load %arg16[%c0_35, %c0_36] : memref<16x64xf32, #tpu.memory_space<vmem>>, vector<16x16xf32>
    tpu.vector_store %arg16[%c0_35, %c0_36], %66 {strides = array<i32>} : memref<16x64xf32, #tpu.memory_space<vmem>>, vector<16x16xf32>,
    %68 = vector.extract_strided_slice %5 {offsets = [0, 16], sizes = [16, 16], strides = [1, 1]} : vector<16x64xbf16> to vector<16x16xbf16>
    %69 = vector.extract_strided_slice %7 {offsets = [0, 16], sizes = [16, 16], strides = [1, 1]} : vector<16x64xbf16> to vector<16x16xbf16>
    %70 = vector.extract_strided_slice %9 {offsets = [0, 16], sizes = [16, 16], strides = [1, 1]} : vector<16x64xbf16> to vector<16x16xbf16>
    %71 = tpu.transpose %69, [1, 0] : vector<16x16xbf16> -> vector<16x16xbf16>
    %cst_37 = arith.constant dense<0.000000e+00> : vector<16x16xf32>
    %72 = tpu.matmul %68, %71, %cst_37 {dimension_numbers = #tpu.dot_dimension_numbers<[1], [0], [0], [1], [0, 0, 1, 1], [], []>} : vector<16x16xbf16>, vector<16x16xbf16>, vector<16x16xf32> -> vector<16x16xf32>
    %73 = vector.broadcast %20 : vector<1x16xf32> to vector<16x16xf32>
    %74 = arith.addf %72, %73 : vector<16x16xf32>
    %cst_38 = arith.constant dense<0xFF800000> : vector<16xf32>
    %75 = vector.multi_reduction <maximumf>, %74, %cst_38 [1] : vector<16x16xf32> to vector<16xf32>
    %76 = vector.shape_cast %75 : vector<16xf32> to vector<16x1xf32>
    %77 = vector.broadcast %76 : vector<16x1xf32> to vector<16x16xf32>
    %78 = arith.subf %74, %77 : vector<16x16xf32>
    %79 = math.exp %78 : vector<16x16xf32>
    %cst_39 = arith.constant dense<0.000000e+00> : vector<16xf32>
    %80 = vector.multi_reduction <add>, %79, %cst_39 [1] : vector<16x16xf32> to vector<16xf32>
    %81 = vector.shape_cast %80 : vector<16xf32> to vector<16x1xf32>
    %82 = tpu.reciprocal %81 {approx = true} : vector<16x1xf32> -> vector<16x1xf32>
    %83 = vector.broadcast %82 : vector<16x1xf32> to vector<16x16xf32>
    %84 = arith.mulf %79, %83 : vector<16x16xf32>
    %85 = arith.truncf %84 : vector<16x16xf32> to vector<16x16xbf16>
    %cst_40 = arith.constant dense<0.000000e+00> : vector<16x16xf32>
    %86 = tpu.matmul %85, %70, %cst_40 {dimension_numbers = #tpu.dot_dimension_numbers<[1], [0], [0], [1], [0, 0, 1, 1], [], []>} : vector<16x16xbf16>, vector<16x16xbf16>, vector<16x16xf32> -> vector<16x16xf32>
    %c0_41 = arith.constant 0 : index
    %c16 = arith.constant 16 : index
    %87 = vector.load %arg15[%c0_41, %c16] : memref<16x64xf32, #tpu.memory_space<vmem>>, vector<16x16xf32>
    tpu.vector_store %arg15[%c0_41, %c16], %86 {strides = array<i32>} : memref<16x64xf32, #tpu.memory_space<vmem>>, vector<16x16xf32>,
    %88 = vector.extract_strided_slice %5 {offsets = [0, 16], sizes = [16, 16], strides = [1, 1]} : vector<16x64xbf16> to vector<16x16xbf16>
    %89 = vector.extract_strided_slice %11 {offsets = [0, 16], sizes = [8, 16], strides = [1, 1]} : vector<8x64xbf16> to vector<8x16xbf16>
    %90 = vector.extract_strided_slice %13 {offsets = [0, 16], sizes = [8, 16], strides = [1, 1]} : vector<8x64xbf16> to vector<8x16xbf16>
    %91 = tpu.transpose %89, [1, 0] : vector<8x16xbf16> -> vector<16x8xbf16>
    %cst_42 = arith.constant dense<0.000000e+00> : vector<16x8xf32>
    %92 = tpu.matmul %88, %91, %cst_42 {dimension_numbers = #tpu.dot_dimension_numbers<[1], [0], [0], [1], [0, 0, 1, 1], [], []>} : vector<16x16xbf16>, vector<16x8xbf16>, vector<16x8xf32> -> vector<16x8xf32>
    %93 = vector.broadcast %27 : vector<1x8xf32> to vector<16x8xf32>
    %94 = arith.addf %92, %93 : vector<16x8xf32>
    %cst_43 = arith.constant dense<0xFF800000> : vector<16xf32>
    %95 = vector.multi_reduction <maximumf>, %94, %cst_43 [1] : vector<16x8xf32> to vector<16xf32>
    %96 = vector.shape_cast %95 : vector<16xf32> to vector<16x1xf32>
    %97 = vector.broadcast %96 : vector<16x1xf32> to vector<16x8xf32>
    %98 = arith.subf %94, %97 : vector<16x8xf32>
    %99 = math.exp %98 : vector<16x8xf32>
    %cst_44 = arith.constant dense<0.000000e+00> : vector<16xf32>
    %100 = vector.multi_reduction <add>, %99, %cst_44 [1] : vector<16x8xf32> to vector<16xf32>
    %101 = vector.shape_cast %100 : vector<16xf32> to vector<16x1xf32>
    %102 = tpu.reciprocal %101 {approx = true} : vector<16x1xf32> -> vector<16x1xf32>
    %103 = vector.broadcast %102 : vector<16x1xf32> to vector<16x8xf32>
    %104 = arith.mulf %99, %103 : vector<16x8xf32>
    %105 = arith.truncf %104 : vector<16x8xf32> to vector<16x8xbf16>
    %cst_45 = arith.constant dense<0.000000e+00> : vector<16x16xf32>
    %106 = tpu.matmul %105, %90, %cst_45 {dimension_numbers = #tpu.dot_dimension_numbers<[1], [0], [0], [1], [0, 0, 1, 1], [], []>} : vector<16x8xbf16>, vector<8x16xbf16>, vector<16x16xf32> -> vector<16x16xf32>
    %c0_46 = arith.constant 0 : index
    %c16_47 = arith.constant 16 : index
    %107 = vector.load %arg16[%c0_46, %c16_47] : memref<16x64xf32, #tpu.memory_space<vmem>>, vector<16x16xf32>
    tpu.vector_store %arg16[%c0_46, %c16_47], %106 {strides = array<i32>} : memref<16x64xf32, #tpu.memory_space<vmem>>, vector<16x16xf32>,
    %108 = vector.extract_strided_slice %5 {offsets = [0, 32], sizes = [16, 16], strides = [1, 1]} : vector<16x64xbf16> to vector<16x16xbf16>
    %109 = vector.extract_strided_slice %7 {offsets = [0, 32], sizes = [16, 16], strides = [1, 1]} : vector<16x64xbf16> to vector<16x16xbf16>
    %110 = vector.extract_strided_slice %9 {offsets = [0, 32], sizes = [16, 16], strides = [1, 1]} : vector<16x64xbf16> to vector<16x16xbf16>
    %111 = tpu.transpose %109, [1, 0] : vector<16x16xbf16> -> vector<16x16xbf16>
    %cst_48 = arith.constant dense<0.000000e+00> : vector<16x16xf32>
    %112 = tpu.matmul %108, %111, %cst_48 {dimension_numbers = #tpu.dot_dimension_numbers<[1], [0], [0], [1], [0, 0, 1, 1], [], []>} : vector<16x16xbf16>, vector<16x16xbf16>, vector<16x16xf32> -> vector<16x16xf32>
    %113 = vector.broadcast %20 : vector<1x16xf32> to vector<16x16xf32>
    %114 = arith.addf %112, %113 : vector<16x16xf32>
    %cst_49 = arith.constant dense<0xFF800000> : vector<16xf32>
    %115 = vector.multi_reduction <maximumf>, %114, %cst_49 [1] : vector<16x16xf32> to vector<16xf32>
    %116 = vector.shape_cast %115 : vector<16xf32> to vector<16x1xf32>
    %117 = vector.broadcast %116 : vector<16x1xf32> to vector<16x16xf32>
    %118 = arith.subf %114, %117 : vector<16x16xf32>
    %119 = math.exp %118 : vector<16x16xf32>
    %cst_50 = arith.constant dense<0.000000e+00> : vector<16xf32>
    %120 = vector.multi_reduction <add>, %119, %cst_50 [1] : vector<16x16xf32> to vector<16xf32>
    %121 = vector.shape_cast %120 : vector<16xf32> to vector<16x1xf32>
    %122 = tpu.reciprocal %121 {approx = true} : vector<16x1xf32> -> vector<16x1xf32>
    %123 = vector.broadcast %122 : vector<16x1xf32> to vector<16x16xf32>
    %124 = arith.mulf %119, %123 : vector<16x16xf32>
    %125 = arith.truncf %124 : vector<16x16xf32> to vector<16x16xbf16>
    %cst_51 = arith.constant dense<0.000000e+00> : vector<16x16xf32>
    %126 = tpu.matmul %125, %110, %cst_51 {dimension_numbers = #tpu.dot_dimension_numbers<[1], [0], [0], [1], [0, 0, 1, 1], [], []>} : vector<16x16xbf16>, vector<16x16xbf16>, vector<16x16xf32> -> vector<16x16xf32>
    %c0_52 = arith.constant 0 : index
    %c32 = arith.constant 32 : index
    %127 = vector.load %arg15[%c0_52, %c32] : memref<16x64xf32, #tpu.memory_space<vmem>>, vector<16x16xf32>
    tpu.vector_store %arg15[%c0_52, %c32], %126 {strides = array<i32>} : memref<16x64xf32, #tpu.memory_space<vmem>>, vector<16x16xf32>,
    %128 = vector.extract_strided_slice %5 {offsets = [0, 32], sizes = [16, 16], strides = [1, 1]} : vector<16x64xbf16> to vector<16x16xbf16>
    %129 = vector.extract_strided_slice %11 {offsets = [0, 32], sizes = [8, 16], strides = [1, 1]} : vector<8x64xbf16> to vector<8x16xbf16>
    %130 = vector.extract_strided_slice %13 {offsets = [0, 32], sizes = [8, 16], strides = [1, 1]} : vector<8x64xbf16> to vector<8x16xbf16>
    %131 = tpu.transpose %129, [1, 0] : vector<8x16xbf16> -> vector<16x8xbf16>
    %cst_53 = arith.constant dense<0.000000e+00> : vector<16x8xf32>
    %132 = tpu.matmul %128, %131, %cst_53 {dimension_numbers = #tpu.dot_dimension_numbers<[1], [0], [0], [1], [0, 0, 1, 1], [], []>} : vector<16x16xbf16>, vector<16x8xbf16>, vector<16x8xf32> -> vector<16x8xf32>
    %133 = vector.broadcast %27 : vector<1x8xf32> to vector<16x8xf32>
    %134 = arith.addf %132, %133 : vector<16x8xf32>
    %cst_54 = arith.constant dense<0xFF800000> : vector<16xf32>
    %135 = vector.multi_reduction <maximumf>, %134, %cst_54 [1] : vector<16x8xf32> to vector<16xf32>
    %136 = vector.shape_cast %135 : vector<16xf32> to vector<16x1xf32>
    %137 = vector.broadcast %136 : vector<16x1xf32> to vector<16x8xf32>
    %138 = arith.subf %134, %137 : vector<16x8xf32>
    %139 = math.exp %138 : vector<16x8xf32>
    %cst_55 = arith.constant dense<0.000000e+00> : vector<16xf32>
    %140 = vector.multi_reduction <add>, %139, %cst_55 [1] : vector<16x8xf32> to vector<16xf32>
    %141 = vector.shape_cast %140 : vector<16xf32> to vector<16x1xf32>
    %142 = tpu.reciprocal %141 {approx = true} : vector<16x1xf32> -> vector<16x1xf32>
    %143 = vector.broadcast %142 : vector<16x1xf32> to vector<16x8xf32>
    %144 = arith.mulf %139, %143 : vector<16x8xf32>
    %145 = arith.truncf %144 : vector<16x8xf32> to vector<16x8xbf16>
    %cst_56 = arith.constant dense<0.000000e+00> : vector<16x16xf32>
    %146 = tpu.matmul %145, %130, %cst_56 {dimension_numbers = #tpu.dot_dimension_numbers<[1], [0], [0], [1], [0, 0, 1, 1], [], []>} : vector<16x8xbf16>, vector<8x16xbf16>, vector<16x16xf32> -> vector<16x16xf32>
    %c0_57 = arith.constant 0 : index
    %c32_58 = arith.constant 32 : index
    %147 = vector.load %arg16[%c0_57, %c32_58] : memref<16x64xf32, #tpu.memory_space<vmem>>, vector<16x16xf32>
    tpu.vector_store %arg16[%c0_57, %c32_58], %146 {strides = array<i32>} : memref<16x64xf32, #tpu.memory_space<vmem>>, vector<16x16xf32>,
    %148 = vector.extract_strided_slice %5 {offsets = [0, 48], sizes = [16, 16], strides = [1, 1]} : vector<16x64xbf16> to vector<16x16xbf16>
    %149 = vector.extract_strided_slice %7 {offsets = [0, 48], sizes = [16, 16], strides = [1, 1]} : vector<16x64xbf16> to vector<16x16xbf16>
    %150 = vector.extract_strided_slice %9 {offsets = [0, 48], sizes = [16, 16], strides = [1, 1]} : vector<16x64xbf16> to vector<16x16xbf16>
    %151 = tpu.transpose %149, [1, 0] : vector<16x16xbf16> -> vector<16x16xbf16>
    %cst_59 = arith.constant dense<0.000000e+00> : vector<16x16xf32>
    %152 = tpu.matmul %148, %151, %cst_59 {dimension_numbers = #tpu.dot_dimension_numbers<[1], [0], [0], [1], [0, 0, 1, 1], [], []>} : vector<16x16xbf16>, vector<16x16xbf16>, vector<16x16xf32> -> vector<16x16xf32>
    %153 = vector.broadcast %20 : vector<1x16xf32> to vector<16x16xf32>
    %154 = arith.addf %152, %153 : vector<16x16xf32>
    %cst_60 = arith.constant dense<0xFF800000> : vector<16xf32>
    %155 = vector.multi_reduction <maximumf>, %154, %cst_60 [1] : vector<16x16xf32> to vector<16xf32>
    %156 = vector.shape_cast %155 : vector<16xf32> to vector<16x1xf32>
    %157 = vector.broadcast %156 : vector<16x1xf32> to vector<16x16xf32>
    %158 = arith.subf %154, %157 : vector<16x16xf32>
    %159 = math.exp %158 : vector<16x16xf32>
    %cst_61 = arith.constant dense<0.000000e+00> : vector<16xf32>
    %160 = vector.multi_reduction <add>, %159, %cst_61 [1] : vector<16x16xf32> to vector<16xf32>
    %161 = vector.shape_cast %160 : vector<16xf32> to vector<16x1xf32>
    %162 = tpu.reciprocal %161 {approx = true} : vector<16x1xf32> -> vector<16x1xf32>
    %163 = vector.broadcast %162 : vector<16x1xf32> to vector<16x16xf32>
    %164 = arith.mulf %159, %163 : vector<16x16xf32>
    %165 = arith.truncf %164 : vector<16x16xf32> to vector<16x16xbf16>
    %cst_62 = arith.constant dense<0.000000e+00> : vector<16x16xf32>
    %166 = tpu.matmul %165, %150, %cst_62 {dimension_numbers = #tpu.dot_dimension_numbers<[1], [0], [0], [1], [0, 0, 1, 1], [], []>} : vector<16x16xbf16>, vector<16x16xbf16>, vector<16x16xf32> -> vector<16x16xf32>
    %c0_63 = arith.constant 0 : index
    %c48 = arith.constant 48 : index
    %167 = vector.load %arg15[%c0_63, %c48] : memref<16x64xf32, #tpu.memory_space<vmem>>, vector<16x16xf32>
    tpu.vector_store %arg15[%c0_63, %c48], %166 {strides = array<i32>} : memref<16x64xf32, #tpu.memory_space<vmem>>, vector<16x16xf32>,
    %168 = vector.extract_strided_slice %5 {offsets = [0, 48], sizes = [16, 16], strides = [1, 1]} : vector<16x64xbf16> to vector<16x16xbf16>
    %169 = vector.extract_strided_slice %11 {offsets = [0, 48], sizes = [8, 16], strides = [1, 1]} : vector<8x64xbf16> to vector<8x16xbf16>
    %170 = vector.extract_strided_slice %13 {offsets = [0, 48], sizes = [8, 16], strides = [1, 1]} : vector<8x64xbf16> to vector<8x16xbf16>
    %171 = tpu.transpose %169, [1, 0] : vector<8x16xbf16> -> vector<16x8xbf16>
    %cst_64 = arith.constant dense<0.000000e+00> : vector<16x8xf32>
    %172 = tpu.matmul %168, %171, %cst_64 {dimension_numbers = #tpu.dot_dimension_numbers<[1], [0], [0], [1], [0, 0, 1, 1], [], []>} : vector<16x16xbf16>, vector<16x8xbf16>, vector<16x8xf32> -> vector<16x8xf32>
    %173 = vector.broadcast %27 : vector<1x8xf32> to vector<16x8xf32>
    %174 = arith.addf %172, %173 : vector<16x8xf32>
    %cst_65 = arith.constant dense<0xFF800000> : vector<16xf32>
    %175 = vector.multi_reduction <maximumf>, %174, %cst_65 [1] : vector<16x8xf32> to vector<16xf32>
    %176 = vector.shape_cast %175 : vector<16xf32> to vector<16x1xf32>
    %177 = vector.broadcast %176 : vector<16x1xf32> to vector<16x8xf32>
    %178 = arith.subf %174, %177 : vector<16x8xf32>
    %179 = math.exp %178 : vector<16x8xf32>
    %cst_66 = arith.constant dense<0.000000e+00> : vector<16xf32>
    %180 = vector.multi_reduction <add>, %179, %cst_66 [1] : vector<16x8xf32> to vector<16xf32>
    %181 = vector.shape_cast %180 : vector<16xf32> to vector<16x1xf32>
    %182 = tpu.reciprocal %181 {approx = true} : vector<16x1xf32> -> vector<16x1xf32>
    %183 = vector.broadcast %182 : vector<16x1xf32> to vector<16x8xf32>
    %184 = arith.mulf %179, %183 : vector<16x8xf32>
    %185 = arith.truncf %184 : vector<16x8xf32> to vector<16x8xbf16>
    %cst_67 = arith.constant dense<0.000000e+00> : vector<16x16xf32>
    %186 = tpu.matmul %185, %170, %cst_67 {dimension_numbers = #tpu.dot_dimension_numbers<[1], [0], [0], [1], [0, 0, 1, 1], [], []>} : vector<16x8xbf16>, vector<8x16xbf16>, vector<16x16xf32> -> vector<16x16xf32>
    %c0_68 = arith.constant 0 : index
    %c48_69 = arith.constant 48 : index
    %187 = vector.load %arg16[%c0_68, %c48_69] : memref<16x64xf32, #tpu.memory_space<vmem>>, vector<16x16xf32>
    tpu.vector_store %arg16[%c0_68, %c48_69], %186 {strides = array<i32>} : memref<16x64xf32, #tpu.memory_space<vmem>>, vector<16x16xf32>,
    %c0_70 = arith.constant 0 : index
    %c0_71 = arith.constant 0 : index
    %188 = vector.load %arg15[%c0_70, %c0_71] : memref<16x64xf32, #tpu.memory_space<vmem>>, vector<16x64xf32>
    %c0_72 = arith.constant 0 : index
    %c0_73 = arith.constant 0 : index
    %189 = vector.load %arg16[%c0_72, %c0_73] : memref<16x64xf32, #tpu.memory_space<vmem>>, vector<16x64xf32>
    %c0_74 = arith.constant 0 : index
    %c0_75 = arith.constant 0 : index
    %c0_76 = arith.constant 0 : index
    %190 = vector.load %arg9[%c0_74, %c0_75, %c0_76] : memref<1x1x64xf32, #tpu.memory_space<vmem>>, vector<1x1x64xf32>
    %191 = vector.shape_cast %190 : vector<1x1x64xf32> to vector<1x64xf32>
    %192 = vector.broadcast %191 : vector<1x64xf32> to vector<16x64xf32>
    %193 = arith.mulf %189, %192 : vector<16x64xf32>
    %194 = arith.addf %188, %193 : vector<16x64xf32>
    %195 = arith.truncf %194 : vector<16x64xf32> to vector<16x64xbf16>
    %c0_77 = arith.constant 0 : index
    %c0_78 = arith.constant 0 : index
    %196 = vector.load %arg10[%c0_77, %c0_78] : memref<64x64xbf16, #tpu.memory_space<vmem>>, vector<64x64xbf16>
    %cst_79 = arith.constant dense<0.000000e+00> : vector<16x64xf32>
    %197 = tpu.matmul %195, %196, %cst_79 {dimension_numbers = #tpu.dot_dimension_numbers<[1], [0], [0], [1], [0, 0, 1, 1], [], []>} : vector<16x64xbf16>, vector<64x64xbf16>, vector<16x64xf32> -> vector<16x64xf32>
    %c0_80 = arith.constant 0 : index
    %c0_81 = arith.constant 0 : index
    %c0_82 = arith.constant 0 : index
    %198 = vector.load %arg11[%c0_80, %c0_81, %c0_82] : memref<1x16x64xf32, #tpu.memory_space<vmem>>, vector<1x16x64xf32>
    %199 = vector.shape_cast %198 : vector<1x16x64xf32> to vector<16x64xf32>
    %c0_83 = arith.constant 0 : index
    %c0_84 = arith.constant 0 : index
    %c0_85 = arith.constant 0 : index
    %200 = vector.load %arg13[%c0_83, %c0_84, %c0_85] : memref<1x1x64xf32, #tpu.memory_space<vmem>>, vector<1x1x64xf32>
    %201 = vector.shape_cast %200 : vector<1x1x64xf32> to vector<1x64xf32>
    %202 = math.tanh %201 : vector<1x64xf32>
    %c0_86 = arith.constant 0 : index
    %c0_87 = arith.constant 0 : index
    %203 = vector.load %arg12[%c0_86, %c0_87] : memref<1x64xf32, #tpu.memory_space<vmem>>, vector<1x64xf32>
    %204 = arith.mulf %197, %197 : vector<16x64xf32>
    %cst_88 = arith.constant dense<0.000000e+00> : vector<16xf32>
    %205 = vector.multi_reduction <add>, %204, %cst_88 [1] : vector<16x64xf32> to vector<16xf32>
    %206 = vector.shape_cast %205 : vector<16xf32> to vector<16x1xf32>
    %cst_89 = arith.constant 6.400000e+01 : f32
    %207 = vector.broadcast %cst_89 : f32 to vector<16x1xf32>
    %208 = arith.divf %206, %207 : vector<16x1xf32>
    %cst_90 = arith.constant 9.99999974E-6 : f32
    %209 = vector.broadcast %cst_90 : f32 to vector<16x1xf32>
    %210 = arith.addf %208, %209 : vector<16x1xf32>
    %211 = math.rsqrt %210 : vector<16x1xf32>
    %212 = vector.broadcast %211 : vector<16x1xf32> to vector<16x64xf32>
    %213 = arith.mulf %197, %212 : vector<16x64xf32>
    %214 = vector.broadcast %203 : vector<1x64xf32> to vector<16x64xf32>
    %215 = arith.mulf %213, %214 : vector<16x64xf32>
    %216 = vector.broadcast %202 : vector<1x64xf32> to vector<16x64xf32>
    %217 = arith.mulf %216, %215 : vector<16x64xf32>
    %218 = arith.addf %199, %217 : vector<16x64xf32>
    %219 = arith.truncf %218 : vector<16x64xf32> to vector<16x64xbf16>
    %c0_91 = arith.constant 0 : index
    %c0_92 = arith.constant 0 : index
    %c0_93 = arith.constant 0 : index
    %220 = vector.load %arg14[%c0_91, %c0_92, %c0_93] : memref<1x16x64xbf16, #tpu.memory_space<vmem>>, vector<1x16x64xbf16>
    %221 = vector.shape_cast %220 : vector<1x16x64xbf16> to vector<16x64xbf16>
    %222 = vector.shape_cast %219 : vector<16x64xbf16> to vector<1x16x64xbf16>
    tpu.vector_store %arg14[%c0_91, %c0_92, %c0_93], %222 {strides = array<i32>} : memref<1x16x64xbf16, #tpu.memory_space<vmem>>, vector<1x16x64xbf16>,
    return
  }
  func.func @transform_0(%arg0: i32, %arg1: i32) -> (i32, i32, i32) {
    %c0_i32 = arith.constant 0 : i32
    %c0_i32_0 = arith.constant 0 : i32
    return %arg0, %arg1, %c0_i32 : i32, i32, i32
  }
  func.func @transform_1(%arg0: i32, %arg1: i32) -> (i32, i32, i32) {
    %c0_i32 = arith.constant 0 : i32
    %c0_i32_0 = arith.constant 0 : i32
    %c0_i32_1 = arith.constant 0 : i32
    return %arg0, %c0_i32, %c0_i32_0 : i32, i32, i32
  }
  func.func @transform_2(%arg0: i32, %arg1: i32) -> (i32, i32, i32) {
    %c0_i32 = arith.constant 0 : i32
    %c0_i32_0 = arith.constant 0 : i32
    %c0_i32_1 = arith.constant 0 : i32
    return %arg0, %c0_i32, %c0_i32_0 : i32, i32, i32
  }
  func.func @transform_3(%arg0: i32, %arg1: i32) -> (i32, i32, i32) {
    %c0_i32 = arith.constant 0 : i32
    %c0_i32_0 = arith.constant 0 : i32
    %c0_i32_1 = arith.constant 0 : i32
    return %arg0, %c0_i32, %c0_i32_0 : i32, i32, i32
  }
  func.func @transform_4(%arg0: i32, %arg1: i32) -> (i32, i32, i32) {
    %c0_i32 = arith.constant 0 : i32
    %c0_i32_0 = arith.constant 0 : i32
    %c0_i32_1 = arith.constant 0 : i32
    return %arg0, %c0_i32, %c0_i32_0 : i32, i32, i32
  }
  func.func @transform_5(%arg0: i32, %arg1: i32) -> (i32, i32, i32) {
    %c0_i32 = arith.constant 0 : i32
    %c0_i32_0 = arith.constant 0 : i32
    %c0_i32_1 = arith.constant 0 : i32
    return %arg0, %c0_i32, %c0_i32_0 : i32, i32, i32
  }
  func.func @transform_6(%arg0: i32, %arg1: i32) -> (i32, i32, i32) {
    %c0_i32 = arith.constant 0 : i32
    %c0_i32_0 = arith.constant 0 : i32
    %c0_i32_1 = arith.constant 0 : i32
    return %arg0, %c0_i32, %c0_i32_0 : i32, i32, i32
  }
  func.func @transform_7(%arg0: i32, %arg1: i32) -> (i32, i32, i32) {
    %c0_i32 = arith.constant 0 : i32
    %c0_i32_0 = arith.constant 0 : i32
    %c0_i32_1 = arith.constant 0 : i32
    %c0_i32_2 = arith.constant 0 : i32
    return %c0_i32, %c0_i32_0, %c0_i32_1 : i32, i32, i32
  }
  func.func @transform_8(%arg0: i32, %arg1: i32) -> (i32, i32) {
    %c0_i32 = arith.constant 0 : i32
    %c0_i32_0 = arith.constant 0 : i32
    %c0_i32_1 = arith.constant 0 : i32
    return %c0_i32, %c0_i32_0 : i32, i32
  }
  func.func @transform_9(%arg0: i32, %arg1: i32) -> (i32, i32, i32) {
    %c0_i32 = arith.constant 0 : i32
    %c0_i32_0 = arith.constant 0 : i32
    return %arg0, %arg1, %c0_i32 : i32, i32, i32
  }
  func.func @transform_10(%arg0: i32, %arg1: i32) -> (i32, i32) {
    %c0_i32 = arith.constant 0 : i32
    %c0_i32_0 = arith.constant 0 : i32
    %c0_i32_1 = arith.constant 0 : i32
    return %c0_i32, %c0_i32_0 : i32, i32
  }
  func.func @transform_11(%arg0: i32, %arg1: i32) -> (i32, i32, i32) {
    %c0_i32 = arith.constant 0 : i32
    %c0_i32_0 = arith.constant 0 : i32
    %c0_i32_1 = arith.constant 0 : i32
    return %arg0, %c0_i32, %c0_i32_0 : i32, i32, i32
  }
  func.func @transform_12(%arg0: i32, %arg1: i32) -> (i32, i32, i32) {
    %c0_i32 = arith.constant 0 : i32
    %c0_i32_0 = arith.constant 0 : i32
    return %arg0, %arg1, %c0_i32 : i32, i32, i32
  }
}

module attributes {stable_mosaic.version = 11 : i64} {
  func.func @_ffn_kernel(%arg0: i32, %arg1: i32, %arg2: i32, %arg3: memref<1x16x64xbf16, #tpu.memory_space<vmem>>, %arg4: memref<1x64xf32, #tpu.memory_space<vmem>>, %arg5: memref<1x1x64xf32, #tpu.memory_space<vmem>>, %arg6: memref<64x192xbf16, #tpu.memory_space<vmem>>, %arg7: memref<64x192xbf16, #tpu.memory_space<vmem>>, %arg8: memref<192x64xbf16, #tpu.memory_space<vmem>>, %arg9: memref<1x64xf32, #tpu.memory_space<vmem>>, %arg10: memref<1x1x64xf32, #tpu.memory_space<vmem>>, %arg11: memref<1x16x64xf32, #tpu.memory_space<vmem>>, %arg12: memref<16x64xf32, #tpu.memory_space<vmem>>, %arg13: memref<16x64xbf16, #tpu.memory_space<vmem>>) attributes {dimension_semantics = [#tpu.dimension_semantics<parallel>, #tpu.dimension_semantics<parallel>, #tpu.dimension_semantics<arbitrary>], iteration_bounds = array<i64: 2, 1, 1>, scalar_prefetch = 0 : i64, scratch_operands = 2 : i64, tpu.core_type = #tpu.core_type<tc>, window_params = [{transform_indices = @transform_0, window_bounds = array<i64: 1, 16, 64>}, {pipeline_mode = #tpu.pipeline_mode<synchronous>, transform_indices = @transform_1, window_bounds = array<i64: 1, 64>}, {pipeline_mode = #tpu.pipeline_mode<synchronous>, transform_indices = @transform_2, window_bounds = array<i64: 1, 1, 64>}, {transform_indices = @transform_3, window_bounds = array<i64: 64, 192>}, {transform_indices = @transform_4, window_bounds = array<i64: 64, 192>}, {transform_indices = @transform_5, window_bounds = array<i64: 192, 64>}, {pipeline_mode = #tpu.pipeline_mode<synchronous>, transform_indices = @transform_6, window_bounds = array<i64: 1, 64>}, {pipeline_mode = #tpu.pipeline_mode<synchronous>, transform_indices = @transform_7, window_bounds = array<i64: 1, 1, 64>}, {transform_indices = @transform_8, window_bounds = array<i64: 1, 16, 64>}]} {
    %c0_i32 = arith.constant 0 : i32
    %0 = arith.cmpi eq, %arg2, %c0_i32 : i32
    %1 = arith.extui %0 : i1 to i32
    %c0_i32_0 = arith.constant 0 : i32
    %2 = arith.cmpi ne, %1, %c0_i32_0 : i32
    scf.if %2 {
      %c0_17 = arith.constant 0 : index
      %c0_18 = arith.constant 0 : index
      %c0_19 = arith.constant 0 : index
      %24 = vector.load %arg3[%c0_17, %c0_18, %c0_19] : memref<1x16x64xbf16, #tpu.memory_space<vmem>>, vector<1x16x64xbf16>
      %25 = vector.shape_cast %24 : vector<1x16x64xbf16> to vector<16x64xbf16>
      %26 = arith.extf %25 : vector<16x64xbf16> to vector<16x64xf32>
      %c0_20 = arith.constant 0 : index
      %c0_21 = arith.constant 0 : index
      %27 = vector.load %arg4[%c0_20, %c0_21] : memref<1x64xf32, #tpu.memory_space<vmem>>, vector<1x64xf32>
      %28 = arith.mulf %26, %26 : vector<16x64xf32>
      %cst_22 = arith.constant dense<0.000000e+00> : vector<16xf32>
      %29 = vector.multi_reduction <add>, %28, %cst_22 [1] : vector<16x64xf32> to vector<16xf32>
      %30 = vector.shape_cast %29 : vector<16xf32> to vector<16x1xf32>
      %cst_23 = arith.constant 6.400000e+01 : f32
      %31 = vector.broadcast %cst_23 : f32 to vector<16x1xf32>
      %32 = arith.divf %30, %31 : vector<16x1xf32>
      %cst_24 = arith.constant 9.99999974E-6 : f32
      %33 = vector.broadcast %cst_24 : f32 to vector<16x1xf32>
      %34 = arith.addf %32, %33 : vector<16x1xf32>
      %35 = math.rsqrt %34 : vector<16x1xf32>
      %36 = vector.broadcast %35 : vector<16x1xf32> to vector<16x64xf32>
      %37 = arith.mulf %26, %36 : vector<16x64xf32>
      %38 = vector.broadcast %27 : vector<1x64xf32> to vector<16x64xf32>
      %39 = arith.mulf %37, %38 : vector<16x64xf32>
      %c0_25 = arith.constant 0 : index
      %c0_26 = arith.constant 0 : index
      %c0_27 = arith.constant 0 : index
      %40 = vector.load %arg5[%c0_25, %c0_26, %c0_27] : memref<1x1x64xf32, #tpu.memory_space<vmem>>, vector<1x1x64xf32>
      %41 = vector.shape_cast %40 : vector<1x1x64xf32> to vector<1x64xf32>
      %cst_28 = arith.constant 1.000000e+00 : f32
      %42 = vector.broadcast %cst_28 : f32 to vector<1x64xf32>
      %43 = arith.addf %42, %41 : vector<1x64xf32>
      %44 = vector.broadcast %43 : vector<1x64xf32> to vector<16x64xf32>
      %45 = arith.mulf %39, %44 : vector<16x64xf32>
      %46 = arith.truncf %45 : vector<16x64xf32> to vector<16x64xbf16>
      %c0_29 = arith.constant 0 : index
      %c0_30 = arith.constant 0 : index
      %47 = vector.load %arg13[%c0_29, %c0_30] : memref<16x64xbf16, #tpu.memory_space<vmem>>, vector<16x64xbf16>
      tpu.vector_store %arg13[%c0_29, %c0_30], %46 {strides = array<i32>} : memref<16x64xbf16, #tpu.memory_space<vmem>>, vector<16x64xbf16>,
      %cst_31 = arith.constant 0.000000e+00 : f32
      %48 = vector.broadcast %cst_31 : f32 to vector<16x64xf32>
      %c0_32 = arith.constant 0 : index
      %c0_33 = arith.constant 0 : index
      %49 = vector.load %arg12[%c0_32, %c0_33] : memref<16x64xf32, #tpu.memory_space<vmem>>, vector<16x64xf32>
      tpu.vector_store %arg12[%c0_32, %c0_33], %48 {strides = array<i32>} : memref<16x64xf32, #tpu.memory_space<vmem>>, vector<16x64xf32>,
    } else {
    }
    %c0 = arith.constant 0 : index
    %c0_1 = arith.constant 0 : index
    %3 = vector.load %arg13[%c0, %c0_1] : memref<16x64xbf16, #tpu.memory_space<vmem>>, vector<16x64xbf16>
    %c0_2 = arith.constant 0 : index
    %c0_3 = arith.constant 0 : index
    %4 = vector.load %arg6[%c0_2, %c0_3] : memref<64x192xbf16, #tpu.memory_space<vmem>>, vector<64x192xbf16>
    %cst = arith.constant dense<0.000000e+00> : vector<16x192xf32>
    %5 = tpu.matmul %3, %4, %cst {dimension_numbers = #tpu.dot_dimension_numbers<[1], [0], [0], [1], [0, 0, 1, 1], [], []>} : vector<16x64xbf16>, vector<64x192xbf16>, vector<16x192xf32> -> vector<16x192xf32>
    %c0_4 = arith.constant 0 : index
    %c0_5 = arith.constant 0 : index
    %6 = vector.load %arg7[%c0_4, %c0_5] : memref<64x192xbf16, #tpu.memory_space<vmem>>, vector<64x192xbf16>
    %cst_6 = arith.constant dense<0.000000e+00> : vector<16x192xf32>
    %7 = tpu.matmul %3, %6, %cst_6 {dimension_numbers = #tpu.dot_dimension_numbers<[1], [0], [0], [1], [0, 0, 1, 1], [], []>} : vector<16x64xbf16>, vector<64x192xbf16>, vector<16x192xf32> -> vector<16x192xf32>
    %8 = arith.negf %5 : vector<16x192xf32>
    %9 = math.exp %8 : vector<16x192xf32>
    %cst_7 = arith.constant 1.000000e+00 : f32
    %10 = vector.broadcast %cst_7 : f32 to vector<16x192xf32>
    %11 = arith.addf %10, %9 : vector<16x192xf32>
    %12 = arith.divf %10, %11 : vector<16x192xf32>
    %13 = arith.mulf %5, %12 : vector<16x192xf32>
    %14 = arith.mulf %13, %7 : vector<16x192xf32>
    %c0_8 = arith.constant 0 : index
    %c0_9 = arith.constant 0 : index
    %15 = vector.load %arg12[%c0_8, %c0_9] : memref<16x64xf32, #tpu.memory_space<vmem>>, vector<16x64xf32>
    %16 = arith.truncf %14 : vector<16x192xf32> to vector<16x192xbf16>
    %c0_10 = arith.constant 0 : index
    %c0_11 = arith.constant 0 : index
    %17 = vector.load %arg8[%c0_10, %c0_11] : memref<192x64xbf16, #tpu.memory_space<vmem>>, vector<192x64xbf16>
    %cst_12 = arith.constant dense<0.000000e+00> : vector<16x64xf32>
    %18 = tpu.matmul %16, %17, %cst_12 {dimension_numbers = #tpu.dot_dimension_numbers<[1], [0], [0], [1], [0, 0, 1, 1], [], []>} : vector<16x192xbf16>, vector<192x64xbf16>, vector<16x64xf32> -> vector<16x64xf32>
    %19 = arith.addf %15, %18 : vector<16x64xf32>
    %c0_13 = arith.constant 0 : index
    %c0_14 = arith.constant 0 : index
    %20 = vector.load %arg12[%c0_13, %c0_14] : memref<16x64xf32, #tpu.memory_space<vmem>>, vector<16x64xf32>
    tpu.vector_store %arg12[%c0_13, %c0_14], %19 {strides = array<i32>} : memref<16x64xf32, #tpu.memory_space<vmem>>, vector<16x64xf32>,
    %c0_i32_15 = arith.constant 0 : i32
    %21 = arith.cmpi eq, %arg2, %c0_i32_15 : i32
    %22 = arith.extui %21 : i1 to i32
    %c0_i32_16 = arith.constant 0 : i32
    %23 = arith.cmpi ne, %22, %c0_i32_16 : i32
    scf.if %23 {
      %c0_17 = arith.constant 0 : index
      %c0_18 = arith.constant 0 : index
      %c0_19 = arith.constant 0 : index
      %24 = vector.load %arg3[%c0_17, %c0_18, %c0_19] : memref<1x16x64xbf16, #tpu.memory_space<vmem>>, vector<1x16x64xbf16>
      %25 = vector.shape_cast %24 : vector<1x16x64xbf16> to vector<16x64xbf16>
      %26 = arith.extf %25 : vector<16x64xbf16> to vector<16x64xf32>
      %c0_20 = arith.constant 0 : index
      %c0_21 = arith.constant 0 : index
      %c0_22 = arith.constant 0 : index
      %27 = vector.load %arg10[%c0_20, %c0_21, %c0_22] : memref<1x1x64xf32, #tpu.memory_space<vmem>>, vector<1x1x64xf32>
      %28 = vector.shape_cast %27 : vector<1x1x64xf32> to vector<1x64xf32>
      %29 = math.tanh %28 : vector<1x64xf32>
      %c0_23 = arith.constant 0 : index
      %c0_24 = arith.constant 0 : index
      %30 = vector.load %arg12[%c0_23, %c0_24] : memref<16x64xf32, #tpu.memory_space<vmem>>, vector<16x64xf32>
      %c0_25 = arith.constant 0 : index
      %c0_26 = arith.constant 0 : index
      %31 = vector.load %arg9[%c0_25, %c0_26] : memref<1x64xf32, #tpu.memory_space<vmem>>, vector<1x64xf32>
      %32 = arith.mulf %30, %30 : vector<16x64xf32>
      %cst_27 = arith.constant dense<0.000000e+00> : vector<16xf32>
      %33 = vector.multi_reduction <add>, %32, %cst_27 [1] : vector<16x64xf32> to vector<16xf32>
      %34 = vector.shape_cast %33 : vector<16xf32> to vector<16x1xf32>
      %cst_28 = arith.constant 6.400000e+01 : f32
      %35 = vector.broadcast %cst_28 : f32 to vector<16x1xf32>
      %36 = arith.divf %34, %35 : vector<16x1xf32>
      %cst_29 = arith.constant 9.99999974E-6 : f32
      %37 = vector.broadcast %cst_29 : f32 to vector<16x1xf32>
      %38 = arith.addf %36, %37 : vector<16x1xf32>
      %39 = math.rsqrt %38 : vector<16x1xf32>
      %40 = vector.broadcast %39 : vector<16x1xf32> to vector<16x64xf32>
      %41 = arith.mulf %30, %40 : vector<16x64xf32>
      %42 = vector.broadcast %31 : vector<1x64xf32> to vector<16x64xf32>
      %43 = arith.mulf %41, %42 : vector<16x64xf32>
      %44 = vector.broadcast %29 : vector<1x64xf32> to vector<16x64xf32>
      %45 = arith.mulf %44, %43 : vector<16x64xf32>
      %46 = arith.addf %26, %45 : vector<16x64xf32>
      %c0_30 = arith.constant 0 : index
      %c0_31 = arith.constant 0 : index
      %c0_32 = arith.constant 0 : index
      %47 = vector.load %arg11[%c0_30, %c0_31, %c0_32] : memref<1x16x64xf32, #tpu.memory_space<vmem>>, vector<1x16x64xf32>
      %48 = vector.shape_cast %47 : vector<1x16x64xf32> to vector<16x64xf32>
      %49 = vector.shape_cast %46 : vector<16x64xf32> to vector<1x16x64xf32>
      tpu.vector_store %arg11[%c0_30, %c0_31, %c0_32], %49 {strides = array<i32>} : memref<1x16x64xf32, #tpu.memory_space<vmem>>, vector<1x16x64xf32>,
    } else {
    }
    return
  }
  func.func @transform_0(%arg0: i32, %arg1: i32, %arg2: i32) -> (i32, i32, i32) {
    %c0_i32 = arith.constant 0 : i32
    %c0_i32_0 = arith.constant 0 : i32
    return %arg0, %arg1, %c0_i32 : i32, i32, i32
  }
  func.func @transform_1(%arg0: i32, %arg1: i32, %arg2: i32) -> (i32, i32) {
    %c0_i32 = arith.constant 0 : i32
    %c0_i32_0 = arith.constant 0 : i32
    %c0_i32_1 = arith.constant 0 : i32
    return %c0_i32, %c0_i32_0 : i32, i32
  }
  func.func @transform_2(%arg0: i32, %arg1: i32, %arg2: i32) -> (i32, i32, i32) {
    %c0_i32 = arith.constant 0 : i32
    %c0_i32_0 = arith.constant 0 : i32
    %c0_i32_1 = arith.constant 0 : i32
    return %arg0, %c0_i32, %c0_i32_0 : i32, i32, i32
  }
  func.func @transform_3(%arg0: i32, %arg1: i32, %arg2: i32) -> (i32, i32) {
    %c0_i32 = arith.constant 0 : i32
    %c0_i32_0 = arith.constant 0 : i32
    return %c0_i32, %arg2 : i32, i32
  }
  func.func @transform_4(%arg0: i32, %arg1: i32, %arg2: i32) -> (i32, i32) {
    %c0_i32 = arith.constant 0 : i32
    %c0_i32_0 = arith.constant 0 : i32
    return %c0_i32, %arg2 : i32, i32
  }
  func.func @transform_5(%arg0: i32, %arg1: i32, %arg2: i32) -> (i32, i32) {
    %c0_i32 = arith.constant 0 : i32
    %c0_i32_0 = arith.constant 0 : i32
    return %arg2, %c0_i32 : i32, i32
  }
  func.func @transform_6(%arg0: i32, %arg1: i32, %arg2: i32) -> (i32, i32) {
    %c0_i32 = arith.constant 0 : i32
    %c0_i32_0 = arith.constant 0 : i32
    %c0_i32_1 = arith.constant 0 : i32
    return %c0_i32, %c0_i32_0 : i32, i32
  }
  func.func @transform_7(%arg0: i32, %arg1: i32, %arg2: i32) -> (i32, i32, i32) {
    %c0_i32 = arith.constant 0 : i32
    %c0_i32_0 = arith.constant 0 : i32
    %c0_i32_1 = arith.constant 0 : i32
    return %arg0, %c0_i32, %c0_i32_0 : i32, i32, i32
  }
  func.func @transform_8(%arg0: i32, %arg1: i32, %arg2: i32) -> (i32, i32, i32) {
    %c0_i32 = arith.constant 0 : i32
    %c0_i32_0 = arith.constant 0 : i32
    return %arg0, %arg1, %c0_i32 : i32, i32, i32
  }
}

</mosaic_0001>

<bundles_post_ra>
// kernel: transformer_block.7
= control target key start
LH: loop header
LB: loop body
LE: loop exit
PB: predicated region body
PF: predicated region fallthrough
CT: control target
= control target key end

     0   :  { %12 = vsyncpa [#allocation3], 0  ;;  %s806_s0 = inlined_call_operand.hbm [shape: f32[2,8,32], index: 0, kind: input, shape index: {}]   ;;  %s807_s1 = inlined_call_operand.vmem [shape: f32[1,32], index: 1, kind: input, shape index: {}]   ;;  %s808_s2 = inlined_call_operand.vmem [shape: bf16[32,128], index: 2, kind: input, shape index: {}]   ;;  %s809_s3 = inlined_call_operand.vmem [shape: f32[1,64], index: 3, kind: input, shape index: {}]   ;;  %s810_s4 = inlined_call_operand.vmem [shape: f32[1,64], index: 4, kind: input, shape index: {}]   ;;  %s811_s5 = inlined_call_operand.vmem [shape: bf16[2,8,64], index: 5, kind: output, shape index: {0}]   ;;  %s812_s6 = inlined_call_operand.vmem [shape: bf16[2,8,64], index: 6, kind: output, shape index: {1}]  }
   0x1   :  { %14 = vsyncpa [#allocation3 + $0x1], 0  ;;  %s679_s21 = smov 0   ;;  %s681_s22 = smov 0  }
   0x2   :  { %s683_s23 = smov 0   ;;  %s685_s24 = smov 0  }
   0x3 LB: > { %s698_s25 = sadd.s32 4294967295, %s638_s24   ;;  %s701_s26 = sadd.s32 1, %s638_s24   ;;  %s638_s24 = sphi %s685_s24, %s820_s24   ;;  %s634_s23 = sphi %s683_s23, %s819_s23   ;;  %s630_s22 = sphi %s681_s22, %s818_s22   ;;  %s626_s21 = sphi %s679_s21, %s817_s21  }
   0x4   : > { %s24_s27 = ssub.s32 %s638_s24, %s701_s26  ;;  %s27_s28 = sadd.s32 1, %s634_s23 }
   0x5   : > { %p25_p0 = scmp.eq.s32.totalorder %s24_s27, 0  ;;  %p34_p1 = scmp.ne.s32.totalorder %s634_s23, %s630_s22 }
   0x6   : > { %p35_p2 = scmp.eq.s32.totalorder %s638_s24, 0  ;;  %p40_p3 = scmp.ne.s32.totalorder %s630_s22, %s626_s21 }
   0x7   : > { %s711_s29 = scalar_select %p25_p0, %s634_s23, %s27_s28  }
   0x8   : > { %p36_p4 = por %p35_p2, %p34_p1  ;;  %p41_p5 = scmp.eq.s32.totalorder %s698_s25, 0 }
   0x9   : > { %p532_p6 = scmp.lt.s32.totalorder %s638_s24, 2  ;;  %s212_s7 = sand.u32 1, %s634_s23  }
   0xa   : > { %p715_p7 = por %p41_p5, %p40_p3  ;;  %s499_s8 = sshll.u32 %s212_s7, 3 }
   0xb   : > { %s500_s9 = sshll.u32 %s638_s24, 7  ;;  %s216_s13 = scalar_lea.vmem [#allocation2], %s499_s8 }
   0xc   : > { %s724_s12 = scalar_lea.hbm %s806_s0, %s500_s9  ;;  %s223_s14 = sshll.u32 %s216_s13, 4  ;;  %s726_s14 = int_to_ptr.vmem [resolvable:$true] %s223_s14 }
   0xd   : > { %p728_p8 = pnand %p532_p6, %p36_p4  ;;  %s213_s16 = scalar_lea.sflag [#allocation3], %s212_s7 }
   0xe   : > { %s574_s17 = scalar_lea.hbm %s724_s12, 128  ;;  %s579_s20 = scalar_lea.hbm %s806_s0, 256 }
   0xf   : > { %p575_p11 = scmp.ne.s32.totalorder %s724_s12, %s574_s17  ;;  %p576_p12 = pneg %p728_p8 }
  0x10   : > { %p580_p1 = scmp.lt.u32.totalorder %s724_s12, %s806_s0  ;;  %p581_p2 = scmp.lt.u32.totalorder %s579_s20, %s574_s17 }
  0x11   : > { %p577_p13 = pnand %p576_p12, %p575_p11  ;;  %p583_p4 = scmp.lt.u32.totalorder %s574_s17, %s724_s12 }
  0x12   : > { %p582_p3 = por %p581_p2, %p580_p1 }
  0x13   : > { %p578_p0 = pneg %p577_p13 }
  0x14   : > { %p584_p5 = por %p583_p4, %p582_p3 }
  0x16   : > { %p585_p6 = pnand %p584_p5, %p578_p0 }
  0x18   : > { %588 = shalt.err (!%p585_p6)
}
  0x19   : > { %s589_s28 = scalar_lea.vmem %s726_s14, 128  ;;  %s640_s7 = smov [#allocation2]  }
  0x1a   : > { %p590_p11 = scmp.ne.s32.totalorder %s726_s14, %s589_s28  ;;  %s594_s8 = sshll.u32 %s640_s7, 4  ;;  %s595_s8 = int_to_ptr.vmem [resolvable:$false] %s594_s8 }
  0x1b   : > { %s596_s9 = scalar_lea.vmem %s595_s8, 256  ;;  %p597_p10 = scmp.lt.s32.totalorder %s726_s14, %s595_s8 }
  0x1c   : > { %p592_p13 = pnand %p590_p11, %p576_p12  ;;  %p598_p1 = scmp.lt.s32.totalorder %s596_s9, %s589_s28 }
  0x1e   : > { %p593_p9 = pneg %p592_p13  ;;  %p599_p2 = por %p598_p1, %p597_p10 }
  0x20   : > { %p600_p3 = pnand %p599_p2, %p593_p9 }
  0x22   : > { %603 = shalt.err (!%p600_p3)
}
  0x23   : > { %531 = dma.hbm_to_vmem [thread:$0]  (!%p728_p8), %s724_s12, 128, %s726_s14, %s213_s16  }
  0x24   : > { %p815_p0 = scmp.lt.s32.totalorder %s638_s24, 3  ;;  %p816_p4 = scmp.ge.s32.totalorder %s638_s24, 1 }
  0x26   : > { %p229_p12 = pnand %p816_p4, %p815_p0 }
  0x27   : > { %s234_s10 = sand.u32 (!%p229_p12), 1, %s630_s22  }
  0x28   : > { %232 = sbr.rel (%p229_p12) target bundleno = 743 (0x2e7), region = 40  ;;  %s502_s11 = sshll.u32 (!%p229_p12), %s234_s10, 3 }
  0x29   : > { %s235_s13 = scalar_lea.sflag (!%p229_p12), [#allocation3], %s234_s10  ;;  %s238_s17 = scalar_lea.vmem (!%p229_p12), [#allocation2], %s502_s11 }
  0x2f   : > { %621 = dma.done.wait (%p715_p7), %s235_s13, 128  }
  0x30   : > { %623 = vsyncadd (%p715_p7), %s235_s13, 4294967168  ;;  %v279_v0 = vld [vmem:[%s238_s17] sm:$0xff]  ;;  %vm282_vm0 = vcmask 261120   ;;  %v568_v3 = vld [vmem:[%s808_s2] sm:$0xff]   ;;  %v641_v4 = vmov 0.0   ;;  %vm642_vm1 = vmmov 0  }
  0x31   : > { %v281_v1 = vmul.f32 %v279_v0, %v279_v0  ;;  %518 = vmatprep.subr.bf16.mxu0 %v641_v4  ;;  %522 = vmatprep.mubr.msk.bf16.mxu0 %vm642_vm1, %v641_v4  ;;  %v569_v5 = vld [vmem:[%s808_s2 + $0x8] sm:$0xff]   ;;  %v505_v10 = vld [vmem:[%s807_s1] ss:$0 sm:$0xff]  ;;  %vm360_vm2 = vcmask 523264   ;;  %s643_s18 = smov 64   ;;  %p270_p7 = scmp.lt.s32.totalorder %s698_s25, 1 }
  0x32   : > { %519 = vmatpush3.bf16.msra.mxu0 %v568_v3  ;;  %vm390_vm3 = vcmask 519168   ;;  %v509_v30 = vld [vmem:[%s809_s3] ss:$0 sm:$0xff] }
  0x33   : > { %v283_v2 = vsel %vm282_vm0, %v281_v1, 0.0  ;;  %520 = vmatprep.subr.bf16.mxu0 %v641_v4  ;;  %s822_s25 = smov (!%p270_p7, %s698_s25), 1  ;;  %v510_v32 = vld [vmem:[%s810_s4] ss:$0 sm:$0xff] }
  0x34   : > { %284 = vadd.xlane.f32.xlu0 %v283_v2  ;;  %s503_s19 = sshll.u32 %s822_s25, 2 }
  0x35   : > { %s277_s27 = scalar_lea.vmem %s812_s6, %s503_s19  ;;  %s273_s11 = scalar_lea.vmem %s811_s5, %s503_s19 }
  0x36   : > { %521 = vmatpush3.bf16.msra.mxu0 %v569_v5 }
  0xc1   : > { %v285_v6 = vpop.xlane.xlu0 %284 }
  0xc2   : > { %v287_v7 = vmul.f32 0.03125, %v285_v6 }
  0xc4   : > { %v288_v8 = vadd.f32 1e-05, %v287_v7 }
  0xc6   : > { %570 = vrsqrt.f32 %v288_v8 }
  0xd0   : > { %v571_v9 = vpop.eup %570 }
  0xd1   : > { %v290_v11 = vmul.f32 %v571_v9, %v279_v0 }
  0xd3   : > { %v297_v12 = vmul.f32 %v505_v10, %v290_v11 }
  0xd5   : > { %v298_v13 = vpack.c.bf16 %v297_v12, %v297_v12 }
  0xd7   : > { %523 = vmatmul.mubr.msk.bf16.vlgmr.msra.gmra.mrb[0].mxu0 %vm282_vm0, %v298_v13 }
 0x1aa   : > { %v352_v14 = vpop.f32.mrb[0].mxu0 }
 0x1ab   : > { %v524_v15 = vpop.f32.mrb[1].mxu0  ;;  %v361_v16 = vsel %vm360_vm2, %v352_v14, 0.0  ;;  %v514_v24 = vpack.c.bf16 %v352_v14, %v352_v14 }
 0x1ac   : > { %362 = vadd.xlane.f32.xlu0 %v361_v16  ;;  %v355_v17 = vpop.f32.mrb[2].mxu0 }
 0x1ad   : > { %v525_v18 = vpop.f32.mrb[3].mxu0 }
 0x239   : > { %v363_v19 = vpop.xlane.xlu0 %362 }
 0x23a   : > { %v365_v20 = vmul.f32 0.015625, %v363_v19 }
 0x23c   : > { %v366_v21 = vsub.f32 %v352_v14, %v365_v20 }
 0x23e   : > { %v367_v22 = vmul.f32 %v366_v21, %v366_v21 }
 0x240   : > { %v368_v23 = vsel %vm360_vm2, %v367_v22, 0.0 }
 0x241   : > { %369 = vadd.xlane.f32.xlu1 %v368_v23 }
 0x252   : > { %396 = vrot.lane.b32.xlu1 %v514_v24, %s643_s18 }
 0x2ce   : > { %v370_v25 = vpop.xlane.xlu1 %369 }
 0x2cf   : > { %v371_v26 = vmul.f32 0.015625, %v370_v25 }
 0x2d1   : > { %v372_v27 = vadd.f32 1e-05, %v371_v26 }
 0x2d2   : > { %v397_v28 = vpop.permute.xlu1 %396 }
 0x2d3   : > { %572 = vrsqrt.f32 %v372_v27  ;;  %399 = vst.msk [vmem:[%s277_s27] sm:$0xf] %vm390_vm3, %v397_v28 }
 0x2dd   : > { %v573_v29 = vpop.eup %572 }
 0x2de   : > { %v374_v31 = vmul.f32 %v573_v29, %v366_v21 }
 0x2e0   : > { %v381_v33 = vmul.f32 %v509_v30, %v374_v31 }
 0x2e2   : > { %v388_v34 = vadd.f32 %v510_v32, %v381_v33 }
 0x2e4   : > { %v389_v35 = vpack.c.bf16 %v388_v34, %v388_v34 }
 0x2e6   : > { %391 = vst.msk [vmem:[%s273_s11] sm:$0xf] %vm390_vm3, %v389_v35 }
 0x2e7 PF: > { %p17_p8 = scmp.ge.s32.totalorder %s701_s26, 4   ;;  %s817_s21 = smov %s630_s22 }
 0x2e8   : > { %s818_s22 = smov %s634_s23  ;;  %s819_s23 = smov %s711_s29 }
 0x2e9   : > { %s820_s24 = smov %s701_s26  ;;  %19 = sbr.rel (!%p17_p8) target bundleno = 3 (0x3), region = 92 }
 0x2f0   :  { %433 = vsyncpa [#allocation3], 1 }
 0x2f1   :  { %435 = vsyncpa [#allocation3 + $0x1], 1 }

// kernel: transformer_block.5
= control target key start
LH: loop header
LB: loop body
LE: loop exit
PB: predicated region body
PF: predicated region fallthrough
CT: control target
= control target key end

     0   :  { %12 = vsyncpa [#allocation3], 0  ;;  %s307_s21 = smov [#allocation2]   ;;  %s398_s0 = inlined_call_operand.vmem [shape: f32[2,64], index: 0, kind: input, shape index: {}]   ;;  %s399_s1 = inlined_call_operand.hbm [shape: bf16[64,256], index: 1, kind: input, shape index: {}]   ;;  %s400_s2 = inlined_call_operand.vmem [shape: f32[1,256], index: 2, kind: input, shape index: {}]   ;;  %s401_s3 = inlined_call_operand.vmem [shape: f32[2,1,64], index: 3, kind: output, shape index: {0}]   ;;  %s402_s4 = inlined_call_operand.vmem [shape: f32[2,1,64], index: 4, kind: output, shape index: {1}]   ;;  %s403_s5 = inlined_call_operand.vmem [shape: f32[2,1,64], index: 5, kind: output, shape index: {2}]   ;;  %s404_s6 = inlined_call_operand.vmem [shape: f32[2,1,64], index: 6, kind: output, shape index: {3}]  }
   0x1   :  { %s20_s22 = sshll.u32 %s307_s21, 4  ;;  %s283_s25 = scalar_lea.hbm %s399_s1, 1024  ;;  %s21_s22 = int_to_ptr.vmem [resolvable:$true] %s20_s22 }
   0x2   :  { %p284_p0 = scmp.ne.s32.totalorder %s399_s1, %s283_s25  ;;  %p287_p1 = scmp.lt.u32.totalorder %s283_s25, %s399_s1 }
   0x4   :  { %p289_p2 = pnand %p287_p1, %p284_p0 }
   0x6   :  { %292 = shalt.err (!%p289_p2)
}
   0x7   :  { %s293_s30 = scalar_lea.vmem %s21_s22, 1024  ;;  %p298_p4 = scmp.lt.s32.totalorder %s21_s22, %s21_s22 }
   0x8   :  { %p294_p3 = scmp.ne.s32.totalorder %s21_s22, %s293_s30  ;;  %p299_p5 = scmp.lt.s32.totalorder %s293_s30, %s293_s30 }
   0xa   :  { %p300_p6 = por %p299_p5, %p298_p4 }
   0xc   :  { %p301_p7 = pnand %p300_p6, %p294_p3 }
   0xe   :  { %304 = shalt.err (!%p301_p7)
}
   0xf   :  { %s308_s7 = smov 128   ;;  %s309_s8 = smov 8  }
  0x10   :  { %26 = dma.hbm_to_vmem [thread:$0]  %s399_s1, 1024, %s21_s22, [#allocation3], %s308_s7, %s308_s7, %s309_s8  }
  0x11   :  { %305 = dma.done.wait [#allocation3], 1024  }
  0x12   :  { %306 = vsyncadd [#allocation3], 4294966272  ;;  %v310_v0 = vmov 0   ;;  %v267_v1 = vld [vmem:[#allocation2 + $0x4] ss:$8 sps:$4 sm:$0xff]   ;;  %vm102_vm0 = vcmask 523264   ;;  %v52_v16 = vlaneseq }
  0x13   :  { %138 = vmatprep.mubr.bf16.mxu0 %v310_v0  ;;  %v269_v2 = vld [vmem:[#allocation2] ss:$8 sps:$4 sm:$0xff]   ;;  %106 = vmatprep.subr.bf16.mxu0 %v267_v1  ;;  %v270_v3 = vld [vmem:[#allocation2 + $0x14] ss:$8 sps:$4 sm:$0xff]   ;;  %v272_v4 = vld [vmem:[#allocation2 + $0x10] ss:$8 sps:$4 sm:$0xff]  }
  0x14   :  { %107 = vmatpush1.bf16.msra.mxu0 %v269_v2  ;;  %v273_v5 = vld [vmem:[#allocation2 + $0x24] ss:$8 sps:$4 sm:$0xff]   ;;  %v33_v6 = vld [vmem:[%s398_s0] sm:$0x3]  ;;  %v275_v8 = vld [vmem:[#allocation2 + $0x20] ss:$8 sps:$4 sm:$0xff]  }
  0x15   :  { %108 = vmatprep.subr.bf16.mxu0 %v270_v3  ;;  %v251_v7 = vmul.f32 -1.442695, %v33_v6  ;;  %v276_v9 = vld [vmem:[#allocation2 + $0x34] ss:$8 sps:$4 sm:$0xff]   ;;  %v278_v10 = vld [vmem:[#allocation2 + $0x30] ss:$8 sps:$4 sm:$0xff]  }
  0x16   :  { %v53_v17 = vshrl.u32 %v52_v16, 7  ;;  %v311_v18 = vmov 1966171168   ;;  %v50_v21 = vld [vmem:[%s400_s2] sm:$0x3]  ;;  %vm172_vm1 = vcmask 516096  }
  0x17   :  { %279 = vpow2.f32 %v251_v7  ;;  %v149_v19 = vunpack.c.l.s4 %v311_v18  ;;  %s312_s16 = smov 64  }
  0x18   :  { %109 = vmatpush1.bf16.msra.mxu0 %v272_v4  ;;  %v54_v20 = vsub.s32 0, %v53_v17  ;;  %v58_v22 = vsub.s32 1, %v53_v17 }
  0x19   :  { %110 = vmatprep.subr.bf16.mxu0 %v273_v5  ;;  %v150_v23 = vunpack.c.0.s8 %v149_v19 }
  0x1a   :  { %v55_v24 = vrot.slane %v50_v21, %v54_v20  ;;  %v59_v25 = vrot.slane %v50_v21, %v58_v22 }
  0x1b   :  { %v153_v26 = vsub.s32 %v150_v23, %v53_v17 }
  0x1c   :  { %111 = vmatpush1.bf16.msra.mxu0 %v275_v8 }
  0x1d   :  { %112 = vmatprep.subr.bf16.mxu0 %v276_v9 }
  0x20   :  { %113 = vmatpush1.bf16.msra.mxu0 %v278_v10 }
  0x21   :  { %v280_v11 = vpop.eup %279 }
  0x22   :  { %v37_v12 = vadd.f32 1.0, %v280_v11 }
  0x24   :  { %281 = vrcp.f32 %v37_v12 }
  0x2e   :  { %v282_v13 = vpop.eup %281 }
  0x2f   :  { %v40_v14 = vmul.f32 %v282_v13, %v33_v6 }
  0x31   :  { %v41_v15 = vpack.c.bf16 %v40_v14, %v40_v14 }
  0x33   :  { %260 = vmatmul.mubr.msk.bf16.vlgmr.msra.gmra.mrb[0].mxu0 %vm102_vm0, %v41_v15 }
 0x106   :  { %v140_v27 = vpop.f32.mrb[0].mxu0 }
 0x107   :  { %v141_v28 = vadd.f32 %v140_v27, %v55_v24  ;;  %v142_v29 = vpop.f32.mrb[1].mxu0 }
 0x108   :  { %v143_v30 = vadd.f32 %v142_v29, %v59_v25  ;;  %v144_v31 = vpop.f32.mrb[2].mxu0 }
 0x109   :  { %v154_v32 = vrot.slane %v141_v28, %v153_v26  ;;  %v145_v33 = vpop.f32.mrb[3].mxu0 }
 0x10a   :  { %v198_v34 = vrot.slane %v143_v30, %v153_v26 }
 0x10b   :  { %v155_v35 = vcombine.high %v154_v32, %v154_v32  ;;  %v162_v36 = vrot.slane %v154_v32, %v153_v26 }
 0x10c   :  { %v199_v37 = vcombine.high %v198_v34, %v198_v34  ;;  %v206_v38 = vrot.slane %v198_v34, %v153_v26 }
 0x10d   :  { %v178_v39 = vrot.slane %v162_v36, %v54_v20  ;;  %173 = vst.msk [vmem:[%s401_s3] sm:$0x1] %vm172_vm1, %v162_v36  ;;  %v169_v40 = vrot.slane %v155_v35, %v153_v26 }
 0x10e   :  { %v221_v41 = vrot.slane %v206_v38, %v54_v20  ;;  %216 = vst.msk [vmem:[%s403_s5] sm:$0x1] %vm172_vm1, %v206_v38  ;;  %v213_v42 = vrot.slane %v199_v37, %v153_v26 }
 0x10f   :  { %183 = vrot.lane.b32.xlu0 %v178_v39, %s312_s16  ;;  %174 = vst.msk [vmem:[%s401_s3 + $0x1] sm:$0x1] %vm172_vm1, %v169_v40  ;;  %v182_v43 = vrot.slane %v169_v40, %v54_v20 }
 0x110   :  { %226 = vrot.lane.b32.xlu1 %v221_v41, %s312_s16  ;;  %217 = vst.msk [vmem:[%s403_s5 + $0x1] sm:$0x1] %vm172_vm1, %v213_v42  ;;  %v225_v44 = vrot.slane %v213_v42, %v54_v20 }
 0x113   :  { %185 = vrot.lane.b32.xlu0 %v182_v43, %s312_s16 }
 0x114   :  { %228 = vrot.lane.b32.xlu1 %v225_v44, %s312_s16 }
 0x181   :  { %v184_v45 = vpop.permute.xlu0 %183 }
 0x182   :  { %189 = vst.msk [vmem:[%s402_s4] sm:$0x1] %vm172_vm1, %v184_v45  ;;  %v227_v46 = vpop.permute.xlu1 %226 }
 0x183   :  { %232 = vst.msk [vmem:[%s404_s6] sm:$0x1] %vm172_vm1, %v227_v46 }
 0x185   :  { %v186_v47 = vpop.permute.xlu0 %185 }
 0x186   :  { %190 = vst.msk [vmem:[%s402_s4 + $0x1] sm:$0x1] %vm172_vm1, %v186_v47  ;;  %v229_v48 = vpop.permute.xlu1 %228 }
 0x187   :  { %233 = vst.msk [vmem:[%s404_s6 + $0x1] sm:$0x1] %vm172_vm1, %v229_v48 }
 0x188   :  { %250 = vsyncpa [#allocation3], 1 }

// kernel: transformer_block.6
= control target key start
LH: loop header
LB: loop body
LE: loop exit
PB: predicated region body
PF: predicated region fallthrough
CT: control target
= control target key end

     0   :  { %s1443_s25 = smov 0   ;;  %s1445_s26 = smov 0   ;;  %s1649_s0 = inlined_call_operand.vmem [shape: f32[2,16,64], index: 0, kind: input, shape index: {}]   ;;  %s1650_s1 = inlined_call_operand.vmem [shape: f32[1,64], index: 1, kind: input, shape index: {}]   ;;  %s1651_s2 = inlined_call_operand.vmem [shape: f32[2,1,64], index: 2, kind: input, shape index: {}]   ;;  %s1652_s3 = inlined_call_operand.vmem [shape: bf16[64,192], index: 3, kind: input, shape index: {}]   ;;  %s1653_s4 = inlined_call_operand.vmem [shape: f32[1,64], index: 4, kind: input, shape index: {}]   ;;  %s1654_s5 = inlined_call_operand.vmem [shape: f32[1,64], index: 5, kind: input, shape index: {}]   ;;  %s1655_s6 = inlined_call_operand.vmem [shape: f32[1,64], index: 6, kind: input, shape index: {}]   ;;  %s1656_s7 = inlined_call_operand.vmem [shape: f32[1,64], index: 7, kind: input, shape index: {}]   ;;  %s1657_s8 = inlined_call_operand.vmem [shape: f32[16,64], index: 8, kind: input, shape index: {}]   ;;  %s1658_s9 = inlined_call_operand.vmem [shape: f32[16,64], index: 9, kind: input, shape index: {}]   ;;  %s1659_s10 = inlined_call_operand.vmem [shape: f32[16,64], index: 10, kind: input, shape index: {}]   ;;  %s1660_s11 = inlined_call_operand.vmem [shape: bf16[2,16,64], index: 11, kind: output, shape index: {0}]   ;;  %s1661_s12 = inlined_call_operand.vmem [shape: bf16[2,16,64], index: 12, kind: output, shape index: {1}]   ;;  %s1662_s13 = inlined_call_operand.vmem [shape: bf16[2,16,64], index: 13, kind: output, shape index: {2}]  }
   0x1   :  { %s1447_s27 = smov 0  }
   0x2 LB: > { %s36_s28 = sadd.s32 1, %s1361_s26  ;;  %p1248_p0 = scmp.ge.s32.totalorder %s1365_s27, 1  ;;  %s1365_s27 = sphi %s1447_s27, %s24_s27   ;;  %s1361_s26 = sphi %s1445_s26, %s1664_s26   ;;  %s1357_s25 = sphi %s1443_s25, %s1663_s25  }
   0x3   : > { %p38_p1 = scmp.ge.s32.totalorder %s36_s28, 2  ;;  %p458_p2 = scmp.lt.s32.totalorder %s1365_s27, 3 }
   0x5   : > { %s1666_s28 = smov (%p38_p1, %s36_s28), 0  ;;  %p459_p3 = pnand %p1248_p0, %p458_p2 }
   0x6   : > { %p547_p4 = scmp.lt.s32.totalorder (!%p459_p3), %s1357_s25, 1  ;;  %vm613_vm0 = vcmask (!%p459_p3), 523264   ;;  %v1319_v6 = vld [vmem:[%s1652_s3 + $0x4] ss:$8 sps:$4 sm:$0xff] (!%p459_p3)   ;;  %v1321_v7 = vld [vmem:[%s1652_s3] ss:$8 sps:$4 sm:$0xff] (!%p459_p3)   ;;  %v640_v21 = vlaneseq (!%p459_p3) }
   0x7   : > { %462 = sbr.rel (%p459_p3) target bundleno = 1322 (0x52a), region = 64  ;;  %699 = vmatprep.subr.bf16.mxu0 (!%p459_p3), %v1319_v6  ;;  %v1322_v8 = vld [vmem:[%s1652_s3 + $0x14] ss:$8 sps:$4 sm:$0xff] (!%p459_p3)   ;;  %v1324_v9 = vld [vmem:[%s1652_s3 + $0x10] ss:$8 sps:$4 sm:$0xff] (!%p459_p3)   ;;  %v1367_v14 = vmov (!%p459_p3), 0  }
   0x8   : > { %700 = vmatpush1.bf16.msra.mxu0 (!%p459_p3), %v1321_v7  ;;  %v1325_v10 = vld [vmem:[%s1652_s3 + $0x24] ss:$8 sps:$4 sm:$0xff] (!%p459_p3)   ;;  %v1327_v11 = vld [vmem:[%s1652_s3 + $0x20] ss:$8 sps:$4 sm:$0xff] (!%p459_p3)   ;;  %v1328_v12 = vld [vmem:[%s1652_s3 + $0x34] ss:$8 sps:$4 sm:$0xff] (!%p459_p3)   ;;  %731 = vmatprep.mubr.bf16.mxu0 (!%p459_p3), %v1367_v14 }
   0x9   : > { %701 = vmatprep.subr.bf16.mxu0 (!%p459_p3), %v1322_v8  ;;  %v1330_v13 = vld [vmem:[%s1652_s3 + $0x30] ss:$8 sps:$4 sm:$0xff] (!%p459_p3)   ;;  %v641_v22 = vshrl.u32 (!%p459_p3), %v640_v21, 7  ;;  %v1257_v28 = vld [vmem:[%s1650_s1] ss:$0 sm:$0xff] (!%p459_p3)  ;;  %vm906_vm1 = vcmask (!%p459_p3), 519168  }
   0xa   : > { %v1269_v47 = vld [vmem:[%s1655_s6] ss:$0 sm:$0xff] (!%p459_p3)  ;;  %s1369_s19 = smov (!%p459_p3), 56   ;;  %s1370_s20 = smov (!%p459_p3), 8   ;;  %vm872_vm2 = vcmask (!%p459_p3), 457728   ;;  %vm891_vm3 = vcmask (!%p459_p3), 64512  }
   0xb   : > { %v642_v27 = vsub.s32 (!%p459_p3), 0, %v641_v22  ;;  %v1270_v61 = vld [vmem:[%s1656_s7] ss:$0 sm:$0xff] (!%p459_p3)  ;;  %s1372_s22 = smov (!%p459_p3), 72  }
   0xc   : > { %702 = vmatpush1.bf16.msra.mxu0 (!%p459_p3), %v1324_v9 }
   0xd   : > { %703 = vmatprep.subr.bf16.mxu0 (!%p459_p3), %v1325_v10 }
   0xe   : > { %s1668_s25 = smov (!%p547_p4, %s1357_s25), 1 }
   0xf   : > { %s1279_s29 = sshll.u32 %s1668_s25, 4  ;;  %s558_s21 = scalar_lea.vmem %s1651_s2, %s1668_s25 }
  0x10   : > { %s554_s15 = scalar_lea.vmem %s1649_s0, %s1279_s29  ;;  %704 = vmatpush1.bf16.msra.mxu0 %v1327_v11  ;;  %v637_v23 = vld [vmem:[%s558_s21] sm:$0x1]  ;;  %s1502_s24 = sshll.u32 %s1668_s25, 3 }
  0x11   : > { %v608_v0 = vld [vmem:[%s554_s15] sm:$0xff]  ;;  %v609_v1 = vld [vmem:[%s554_s15 + $0x8] sm:$0xff]  ;;  %705 = vmatprep.subr.bf16.mxu0 %v1328_v12  ;;  %v638_v26 = vadd.f32 1.0, %v637_v23  ;;  %s1368_s29 = smov 64   ;;  %s605_s15 = scalar_lea.vmem %s1662_s13, %s1502_s24 }
  0x12   : > { %v611_v2 = vmul.f32 %v608_v0, %v608_v0  ;;  %v612_v3 = vmul.f32 %v609_v1, %v609_v1  ;;  %s1371_s21 = smov 120   ;;  %s595_s23 = scalar_lea.vmem %s1661_s12, %s1502_s24 }
  0x13   : > { %v643_v32 = vrot.slane %v638_v26, %v642_v27  ;;  %v1572_v26 = vld [vmem:[%s1657_s8] sm:$0xff] }
  0x14   : > { %v614_v4 = vsel %vm613_vm0, %v611_v2, 0.0  ;;  %v617_v5 = vsel %vm613_vm0, %v612_v3, 0.0  ;;  %706 = vmatpush1.bf16.msra.mxu0 %v1330_v13 }
  0x15   : > { %615 = vadd.xlane.f32.xlu0 %v614_v4 }
  0x19   : > { %618 = vadd.xlane.f32.xlu0 %v617_v5 }
  0xa2   : > { %v616_v15 = vpop.xlane.xlu0 %615 }
  0xa3   : > { %v621_v16 = vmul.f32 0.015625, %v616_v15 }
  0xa5   : > { %v623_v17 = vadd.f32 1e-05, %v621_v16 }
  0xa6   : > { %v619_v18 = vpop.xlane.xlu0 %618 }
  0xa7   : > { %1331 = vrsqrt.f32 %v623_v17  ;;  %v622_v19 = vmul.f32 0.015625, %v619_v18 }
  0xa9   : > { %v624_v20 = vadd.f32 1e-05, %v622_v19 }
  0xab   : > { %1333 = vrsqrt.f32 %v624_v20 }
  0xb1   : > { %v1332_v24 = vpop.eup %1331 }
  0xb2   : > { %v627_v25 = vmul.f32 %v1332_v24, %v608_v0 }
  0xb4   : > { %v635_v31 = vmul.f32 %v1257_v28, %v627_v25  ;;  %v1565_v25 = vld [vmem:[%s1657_s8 + $0x8] sm:$0xff] }
  0xb5   : > { %v1334_v29 = vpop.eup %1333 }
  0xb6   : > { %v628_v30 = vmul.f32 %v1334_v29, %v609_v1  ;;  %v645_v34 = vmul.f32 %v643_v32, %v635_v31 }
  0xb8   : > { %v636_v33 = vmul.f32 %v1257_v28, %v628_v30  ;;  %v1579_v28 = vld [vmem:[%s1658_s9] sm:$0xff] }
  0xba   : > { %v646_v35 = vmul.f32 %v643_v32, %v636_v33  ;;  %v1586_v32 = vld [vmem:[%s1659_s10] sm:$0xff] }
  0xbc   : > { %v647_v36 = vpack.c.bf16 %v646_v35, %v645_v34 }
  0xbe   : > { %1266 = vmatmul.mubr.msk.bf16.vlgmr.msra.gmra.mrb[0].mxu0 %vm613_vm0, %v647_v36 }
 0x191   : > { %v1504_v37 = vpop.f32.mrb[0].mxu0 }
 0x192   : > { %790 = vrot.lane.b32.xlu1 %v1504_v37, %s1368_s29  ;;  %v735_v38 = vpop.f32.mrb[1].mxu0  ;;  %v744_v59 = vsel %vm613_vm0, %v1504_v37, 0.0 }
 0x193   : > { %v1287_v39 = vpack.c.bf16 %v735_v38, %v735_v38  ;;  %v1512_v40 = vpop.f32.mrb[2].mxu0  ;;  %v853_v38 = vld [vmem:[%s1658_s9 + $0x8] sm:$0xff] }
 0x194   : > { %v739_v41 = vpop.f32.mrb[3].mxu0  ;;  %v747_v62 = vsel %vm613_vm0, %v1512_v40, 0.0 }
 0x195   : > { %995 = vst.msk [vmem:[%s605_s15] sm:$0xf] %vm906_vm1, %v1287_v39  ;;  %v1288_v42 = vpack.c.bf16 %v739_v41, %v739_v41 }
 0x196   : > { %792 = vrot.lane.b32.xlu1 %v1512_v40, %s1368_s29 }
 0x197   : > { %996 = vst.msk [vmem:[%s605_s15 + $0x4] sm:$0xf] %vm906_vm1, %v1288_v42 }
 0x204   : > { %v791_v43 = vpop.permute.xlu1 %790 }
 0x205   : > { %v796_v44 = vsel %vm613_vm0, %v791_v43, 0.0  ;;  %v855_v43 = vld [vmem:[%s1659_s10 + $0x8] sm:$0xff] }
 0x206   : > { %797 = vadd.xlane.f32.xlu0 %v796_v44 }
 0x208   : > { %v793_v45 = vpop.permute.xlu1 %792 }
 0x209   : > { %v799_v46 = vsel %vm613_vm0, %v793_v45, 0.0 }
 0x20a   : > { %800 = vadd.xlane.f32.xlu1 %v799_v46 }
 0x21b   : > { %835 = vrot.lane.b32.xlu1 %v1269_v47, %s1368_s29 }
 0x293   : > { %v798_v48 = vpop.xlane.xlu0 %797 }
 0x294   : > { %v802_v49 = vmul.f32 0.015625, %v798_v48 }
 0x296   : > { %v804_v50 = vsub.f32 %v1504_v37, %v802_v49 }
 0x297   : > { %v801_v51 = vpop.xlane.xlu1 %800 }
 0x298   : > { %v803_v52 = vmul.f32 0.015625, %v801_v51  ;;  %v806_v53 = vmul.f32 %v804_v50, %v804_v50 }
 0x29a   : > { %v805_v54 = vsub.f32 %v1512_v40, %v803_v52  ;;  %810 = vrot.lane.b32.xlu0 %v806_v53, %s1368_s29 }
 0x29b   : > { %v836_v63 = vpop.permute.xlu1 %835 }
 0x29c   : > { %v807_v55 = vmul.f32 %v805_v54, %v805_v54 }
 0x29e   : > { %812 = vrot.lane.b32.xlu0 %v807_v55, %s1368_s29 }
 0x30c   : > { %v811_v56 = vpop.permute.xlu0 %810 }
 0x30d   : > { %v816_v57 = vsel %vm613_vm0, %v811_v56, 0.0  ;;  %v1268_v56 = vld [vmem:[%s1654_s5] ss:$0 sm:$0xff] }
 0x30e   : > { %817 = vadd.xlane.f32.xlu0 %v816_v57 }
 0x310   : > { %v813_v58 = vpop.permute.xlu0 %812 }
 0x311   : > { %v819_v60 = vsel %vm613_vm0, %v813_v58, 0.0 }
 0x312   : > { %745 = vadd.xlane.f32.xlu0 %v744_v59  ;;  %820 = vadd.xlane.f32.xlu1 %v819_v60 }
 0x323   : > { %845 = vrot.lane.b32.xlu1 %v1270_v61, %s1368_s29 }
 0x347   : > { %748 = vadd.xlane.f32.xlu1 %v747_v62 }
 0x39b   : > { %v818_v0 = vpop.xlane.xlu0 %817 }
 0x39c   : > { %v822_v1 = vmul.f32 0.015625, %v818_v0 }
 0x39e   : > { %v824_v2 = vadd.f32 1e-05, %v822_v1 }
 0x39f   : > { %v821_v3 = vpop.xlane.xlu1 %820  ;;  %v746_v18 = vpop.xlane.xlu0 %745 }
 0x3a0   : > { %1335 = vrsqrt.f32 %v824_v2  ;;  %v823_v4 = vmul.f32 0.015625, %v821_v3  ;;  %v750_v20 = vmul.f32 0.015625, %v746_v18 }
 0x3a2   : > { %v825_v5 = vadd.f32 1e-05, %v823_v4  ;;  %v752_v22 = vsub.f32 %v1504_v37, %v750_v20 }
 0x3a3   : > { %v846_v8 = vpop.permute.xlu1 %845 }
 0x3a4   : > { %1337 = vrsqrt.f32 %v825_v5  ;;  %v754_v23 = vmul.f32 %v752_v22, %v752_v22 }
 0x3a6   : > { %v756_v24 = vsel %vm613_vm0, %v754_v23, 0.0 }
 0x3aa   : > { %v1336_v6 = vpop.eup %1335 }
 0x3ab   : > { %v828_v7 = vmul.f32 %v1336_v6, %v804_v50 }
 0x3ad   : > { %v838_v9 = vmul.f32 %v836_v63, %v828_v7 }
 0x3ae   : > { %v1338_v11 = vpop.eup %1337 }
 0x3af   : > { %v1538_v10 = vadd.f32 %v846_v8, %v838_v9  ;;  %v829_v12 = vmul.f32 %v1338_v11, %v805_v54  ;;  %v1267_v54 = vld [vmem:[%s1653_s4] ss:$0 sm:$0xff] }
 0x3b1   : > { %921 = vrot.lane.b32.xlu0 %v1538_v10, %s1369_s19  ;;  %947 = vrot.lane.b32.xlu1 %v1538_v10, %s1370_s20  ;;  %v839_v13 = vmul.f32 %v836_v63, %v829_v12 }
 0x3b3   : > { %v1548_v14 = vadd.f32 %v846_v8, %v839_v13 }
 0x3b5   : > { %927 = vrot.lane.b32.xlu0 %v1538_v10, %s1371_s21 }
 0x3b9   : > { %953 = vrot.lane.b32.xlu0 %v1538_v10, %s1372_s22 }
 0x3bd   : > { %923 = vrot.lane.b32.xlu0 %v1548_v14, %s1369_s19 }
 0x3c1   : > { %929 = vrot.lane.b32.xlu0 %v1548_v14, %s1371_s21 }
 0x3c5   : > { %949 = vrot.lane.b32.xlu0 %v1548_v14, %s1370_s20 }
 0x3c9   : > { %955 = vrot.lane.b32.xlu0 %v1548_v14, %s1372_s22 }
 0x3d4   : > { %v749_v15 = vpop.xlane.xlu1 %748 }
 0x3d5   : > { %v751_v16 = vmul.f32 0.015625, %v749_v15 }
 0x3d7   : > { %v753_v17 = vsub.f32 %v1512_v40, %v751_v16 }
 0x3d9   : > { %v755_v19 = vmul.f32 %v753_v17, %v753_v17 }
 0x3db   : > { %v759_v21 = vsel %vm613_vm0, %v755_v19, 0.0 }
 0x3dc   : > { %760 = vadd.xlane.f32.xlu1 %v759_v21 }
 0x3e8   : > { %757 = vadd.xlane.f32.xlu0 %v756_v24 }
 0x3ed   : > { %913 = vrot.lane.b32.xlu1 %v1565_v25, %s1368_s29 }
 0x3fe   : > { %911 = vrot.lane.b32.xlu0 %v1572_v26, %s1368_s29 }
 0x423   : > { %v922_v27 = vpop.permute.xlu0 %921  ;;  %v948_v33 = vpop.permute.xlu1 %947 }
 0x427   : > { %v928_v29 = vpop.permute.xlu0 %927 }
 0x428   : > { %v933_v30 = vsel %vm872_vm2, %v922_v27, %v928_v29 }
 0x429   : > { %v935_v31 = vmul.f32 %v933_v30, %v1579_v28 }
 0x42b   : > { %939 = vrot.lane.b32.xlu0 %v935_v31, %s1368_s29  ;;  %v954_v34 = vpop.permute.xlu0 %953 }
 0x42c   : > { %v959_v35 = vsel %vm891_vm3, %v948_v33, %v954_v34 }
 0x42d   : > { %v961_v36 = vmul.f32 %v959_v35, %v1586_v32 }
 0x42f   : > { %v924_v37 = vpop.permute.xlu0 %923  ;;  %965 = vrot.lane.b32.xlu0 %v961_v36, %s1368_s29 }
 0x433   : > { %v930_v39 = vpop.permute.xlu0 %929 }
 0x434   : > { %v934_v40 = vsel %vm872_vm2, %v924_v37, %v930_v39 }
 0x435   : > { %v936_v41 = vmul.f32 %v934_v40, %v853_v38 }
 0x437   : > { %v950_v42 = vpop.permute.xlu0 %949  ;;  %941 = vrot.lane.b32.xlu1 %v936_v41, %s1368_s29 }
 0x43b   : > { %v956_v44 = vpop.permute.xlu0 %955 }
 0x43c   : > { %v960_v45 = vsel %vm891_vm3, %v950_v42, %v956_v44 }
 0x43d   : > { %v962_v46 = vmul.f32 %v960_v45, %v855_v43 }
 0x43f   : > { %967 = vrot.lane.b32.xlu1 %v962_v46, %s1368_s29 }
 0x469   : > { %v761_v47 = vpop.xlane.xlu1 %760 }
 0x46a   : > { %v763_v48 = vmul.f32 0.015625, %v761_v47 }
 0x46c   : > { %v765_v49 = vadd.f32 1e-05, %v763_v48 }
 0x46d   : > { %v914_v6 = vpop.permute.xlu1 %913 }
 0x46e   : > { %1339 = vrsqrt.f32 %v765_v49  ;;  %v918_v8 = vmul.f32 %v914_v6, %v1548_v14 }
 0x475   : > { %v758_v50 = vpop.xlane.xlu0 %757 }
 0x476   : > { %v762_v51 = vmul.f32 0.015625, %v758_v50 }
 0x478   : > { %v1340_v52 = vpop.eup %1339  ;;  %v764_v53 = vadd.f32 1e-05, %v762_v51 }
 0x479   : > { %v769_v55 = vmul.f32 %v1340_v52, %v753_v17  ;;  %v912_v63 = vpop.permute.xlu0 %911 }
 0x47a   : > { %1341 = vrsqrt.f32 %v764_v53  ;;  %v917_v1 = vmul.f32 %v912_v63, %v1538_v10 }
 0x47b   : > { %v777_v57 = vmul.f32 %v1267_v54, %v769_v55 }
 0x47d   : > { %v785_v58 = vadd.f32 %v1268_v56, %v777_v57 }
 0x47f   : > { %862 = vrot.lane.b32.xlu1 %v785_v58, %s1371_s21  ;;  %v857_v19 = vmul.f32 %v1565_v25, %v785_v58 }
 0x483   : > { %868 = vrot.lane.b32.xlu1 %v785_v58, %s1369_s19 }
 0x484   : > { %v1342_v59 = vpop.eup %1341 }
 0x485   : > { %v768_v60 = vmul.f32 %v1342_v59, %v752_v22 }
 0x487   : > { %881 = vrot.lane.b32.xlu1 %v785_v58, %s1372_s22  ;;  %v776_v61 = vmul.f32 %v1267_v54, %v768_v60 }
 0x489   : > { %v784_v62 = vadd.f32 %v1268_v56, %v776_v61 }
 0x48b   : > { %860 = vrot.lane.b32.xlu0 %v784_v62, %s1371_s21  ;;  %887 = vrot.lane.b32.xlu1 %v785_v58, %s1370_s20  ;;  %v856_v33 = vmul.f32 %v1572_v26, %v784_v62 }
 0x48f   : > { %866 = vrot.lane.b32.xlu0 %v784_v62, %s1369_s19 }
 0x493   : > { %879 = vrot.lane.b32.xlu0 %v784_v62, %s1372_s22 }
 0x497   : > { %885 = vrot.lane.b32.xlu0 %v784_v62, %s1370_s20 }
 0x49d   : > { %v940_v0 = vpop.permute.xlu0 %939 }
 0x49e   : > { %v945_v2 = vadd.f32 %v940_v0, %v917_v1 }
 0x4a1   : > { %v966_v3 = vpop.permute.xlu0 %965 }
 0x4a2   : > { %v971_v4 = vadd.f32 %v966_v3, %v945_v2 }
 0x4a4   : > { %v1285_v5 = vpack.c.bf16 %v971_v4, %v971_v4 }
 0x4a6   : > { %979 = vrot.lane.b32.xlu0 %v1285_v5, %s1368_s29 }
 0x4a9   : > { %v942_v7 = vpop.permute.xlu1 %941 }
 0x4aa   : > { %v946_v9 = vadd.f32 %v942_v7, %v918_v8 }
 0x4b1   : > { %v968_v11 = vpop.permute.xlu1 %967 }
 0x4b2   : > { %v972_v12 = vadd.f32 %v968_v11, %v946_v9 }
 0x4b4   : > { %v1286_v13 = vpack.c.bf16 %v972_v12, %v972_v12 }
 0x4b6   : > { %981 = vrot.lane.b32.xlu1 %v1286_v13, %s1368_s29  ;;  %s585_s29 = scalar_lea.vmem %s1660_s11, %s1502_s24 }
 0x4f1   : > { %v863_v15 = vpop.permute.xlu1 %862 }
 0x4f5   : > { %v869_v16 = vpop.permute.xlu1 %868 }
 0x4f6   : > { %v874_v10 = vsel %vm872_vm2, %v863_v15, %v869_v16 }
 0x4f7   : > { %v876_v18 = vmul.f32 %v874_v10, %v853_v38 }
 0x4f9   : > { %v882_v17 = vpop.permute.xlu1 %881  ;;  %v878_v14 = vadd.f32 %v876_v18, %v857_v19 }
 0x4fd   : > { %v861_v20 = vpop.permute.xlu0 %860  ;;  %v888_v21 = vpop.permute.xlu1 %887 }
 0x4fe   : > { %v893_v22 = vsel %vm891_vm3, %v882_v17, %v888_v21 }
 0x4ff   : > { %v895_v23 = vmul.f32 %v893_v22, %v855_v43 }
 0x501   : > { %v897_v24 = vadd.f32 %v895_v23, %v878_v14  ;;  %v867_v27 = vpop.permute.xlu0 %866 }
 0x502   : > { %v873_v30 = vsel %vm872_vm2, %v861_v20, %v867_v27 }
 0x503   : > { %v1284_v29 = vpack.c.bf16 %v897_v24, %v897_v24  ;;  %v875_v25 = vmul.f32 %v873_v30, %v1579_v28 }
 0x505   : > { %908 = vst.msk [vmem:[%s585_s29 + $0x4] sm:$0xf] %vm906_vm1, %v1284_v29  ;;  %v880_v31 = vpop.permute.xlu0 %879  ;;  %v877_v36 = vadd.f32 %v875_v25, %v856_v33 }
 0x509   : > { %v886_v34 = vpop.permute.xlu0 %885 }
 0x50a   : > { %v892_v35 = vsel %vm891_vm3, %v880_v31, %v886_v34 }
 0x50b   : > { %v894_v37 = vmul.f32 %v892_v35, %v1586_v32 }
 0x50d   : > { %v896_v38 = vadd.f32 %v894_v37, %v877_v36 }
 0x50f   : > { %v1283_v39 = vpack.c.bf16 %v896_v38, %v896_v38 }
 0x511   : > { %907 = vst.msk [vmem:[%s585_s29] sm:$0xf] %vm906_vm1, %v1283_v39 }
 0x518   : > { %v980_v40 = vpop.permute.xlu0 %979 }
 0x519   : > { %985 = vst.msk [vmem:[%s595_s23] sm:$0xf] %vm906_vm1, %v980_v40 }
 0x528   : > { %v982_v28 = vpop.permute.xlu1 %981 }
 0x529   : > { %986 = vst.msk [vmem:[%s595_s23 + $0x4] sm:$0xf] %vm906_vm1, %v982_v28 }
 0x52a PF: > { %s24_s27 = sadd.s32 1, %s1365_s27   ;;  %s1663_s25 = smov %s1361_s26 }
 0x52b   : > { %p21_p5 = scmp.ge.s32.totalorder %s24_s27, 4   ;;  %s1664_s26 = smov %s1666_s28 }
 0x52d   :  { %23 = sbr.rel (!%p21_p5) target bundleno = 2 (0x2), region = 130 }

// kernel: transformer_block.8
= control target key start
LH: loop header
LB: loop body
LE: loop exit
PB: predicated region body
PF: predicated region fallthrough
CT: control target
= control target key end

     0   :  { %s2428_s21 = smov 0   ;;  %s2430_s22 = smov 0   ;;  %s2823_s0 = inlined_call_operand.vmem [shape: bf16[2,16,64], index: 0, kind: input, shape index: {}]   ;;  %s2824_s1 = inlined_call_operand.vmem [shape: bf16[2,16,64], index: 1, kind: input, shape index: {}]   ;;  %s2825_s2 = inlined_call_operand.vmem [shape: bf16[2,16,64], index: 2, kind: input, shape index: {}]   ;;  %s2826_s3 = inlined_call_operand.vmem [shape: s32[2,1,16], index: 3, kind: input, shape index: {}]   ;;  %s2827_s4 = inlined_call_operand.vmem [shape: bf16[2,8,64], index: 4, kind: input, shape index: {}]   ;;  %s2828_s5 = inlined_call_operand.vmem [shape: bf16[2,8,64], index: 5, kind: input, shape index: {}]   ;;  %s2829_s6 = inlined_call_operand.vmem [shape: s32[2,1,8], index: 6, kind: input, shape index: {}]   ;;  %s2830_s7 = inlined_call_operand.vmem [shape: f32[1,1,64], index: 7, kind: input, shape index: {}]   ;;  %s2831_s8 = inlined_call_operand.vmem [shape: bf16[64,64], index: 8, kind: input, shape index: {}]   ;;  %s2832_s9 = inlined_call_operand.vmem [shape: f32[2,16,64], index: 9, kind: input, shape index: {}]   ;;  %s2833_s10 = inlined_call_operand.vmem [shape: f32[1,64], index: 10, kind: input, shape index: {}]   ;;  %s2834_s11 = inlined_call_operand.vmem [shape: f32[2,1,64], index: 11, kind: input, shape index: {}]   ;;  %s2835_s12 = inlined_call_operand.vmem [shape: bf16[2,16,64], index: 12, kind: output, shape index: {}]  }
   0x1   :  { %s2432_s23 = smov 0  }
   0x2 LB: > { %s34_s24 = sadd.s32 1, %s2348_s22  ;;  %p2019_p0 = scmp.ge.s32.totalorder %s2352_s23, 1  ;;  %s2352_s23 = sphi %s2432_s23, %s22_s23   ;;  %s2348_s22 = sphi %s2430_s22, %s2837_s22   ;;  %s2344_s21 = sphi %s2428_s21, %s2836_s21  }
   0x3   : > { %p36_p1 = scmp.ge.s32.totalorder %s34_s24, 2  ;;  %p462_p2 = scmp.lt.s32.totalorder %s2352_s23, 3 }
   0x5   : > { %s2839_s24 = smov (%p36_p1, %s34_s24), 0  ;;  %p463_p3 = pnand %p2019_p0, %p462_p2 }
   0x6   : > { %p549_p4 = scmp.lt.s32.totalorder (!%p463_p3), %s2344_s21, 1  ;;  %v2354_v0 = vmov (!%p463_p3), 0.0   ;;  %vm2355_vm0 = vmmov (!%p463_p3), 0   ;;  %vm636_vm1 = vcmask (!%p463_p3), 130048   ;;  %s2356_s18 = smov (!%p463_p3), 112   ;;  %v626_v27 = vlaneseq (!%p463_p3) }
   0x7   : > { %466 = sbr.rel (%p463_p3) target bundleno = 1487 (0x5cf), region = 68  ;;  %2123 = vmatprep.subr.bf16.mxu1 (!%p463_p3), %v2354_v0  ;;  %2111 = vmatprep.subr.bf16.mxu0 (!%p463_p3), %v2354_v0  ;;  %s2357_s19 = smov (!%p463_p3), 96   ;;  %v2359_v32 = vmov (!%p463_p3), -1e+30   ;;  %vm809_vm4 = vcmask (!%p463_p3), 64512   ;;  %vm836_vm5 = vcmask (!%p463_p3), 1043456  }
   0x8   : > { %2125 = vmatprep.mubr.msk.bf16.mxu1 (!%p463_p3), %vm2355_vm0, %v2354_v0  ;;  %2113 = vmatprep.mubr.msk.bf16.mxu0 (!%p463_p3), %vm2355_vm0, %v2354_v0  ;;  %s2358_s20 = smov (!%p463_p3), 80   ;;  %v627_v29 = vshrl.u32 (!%p463_p3), %v626_v27, 7  ;;  %s2362_s27 = smov (!%p463_p3), 48   ;;  %vm1013_vm6 = vcmask (!%p463_p3), 261248   ;;  %vm1279_vm7 = vcmask (!%p463_p3), 392448   ;;  %vm1539_vm8 = vcmask (!%p463_p3), 523648  }
   0x9   : > { %vm1718_vm9 = vcmask (!%p463_p3), 523264   ;;  %vm1811_vm10 = vcmask (!%p463_p3), 519168  }
   0xa   : > { %v2528_v31 = vsub.s32 (!%p463_p3), 0, %v627_v29 }
   0xe   : > { %s2841_s21 = smov (!%p549_p4, %s2344_s21), 1 }
   0xf   : > { %s2026_s25 = sshll.u32 %s2841_s21, 2  ;;  %s2456_s26 = sshll.u32 %s2841_s21, 3 }
  0x10   : > { %s574_s29 = scalar_lea.vmem %s2827_s4, %s2026_s25  ;;  %s562_s14 = scalar_lea.vmem %s2824_s1, %s2456_s26 }
  0x11   : > { %v617_v1 = vld [vmem:[%s574_s29] sm:$0xf]  ;;  %s556_s17 = scalar_lea.vmem %s2823_s0, %s2456_s26  ;;  %s581_s29 = scalar_lea.vmem %s2829_s6, %s2841_s21 }
  0x12   : > { %v766_v2 = vsel %vm636_vm1, %v617_v1, 0  ;;  %v2040_v3 = vcombine.low %v617_v1, %v617_v1  ;;  %v2253_v4 = vld [vmem:[%s562_s14] sm:$0xff]   ;;  %s570_s14 = scalar_lea.vmem %s2826_s3, %s2841_s21 }
  0x13   : > { %2124 = vmatpush3.bf16.xpose.msra.mxu1 %v766_v2  ;;  %v2071_v5 = vld [vmem:[%s556_s17] sm:$0xff]   ;;  %886 = vrot.lane.b32.xlu0 %v2253_v4, %s2356_s18  ;;  %v641_v6 = vsel %vm636_vm1, %v2253_v4, 0  ;;  %s567_s17 = scalar_lea.vmem %s2825_s2, %s2456_s26 }
  0x14   : > { %v2072_v7 = vunpack.c.l.bf16 %v2071_v5  ;;  %v2073_v8 = vunpack.c.h.bf16 %v2071_v5  ;;  %1019 = vrot.lane.b32.xlu1 %v2040_v3, %s2356_s18  ;;  %2112 = vmatpush3.bf16.xpose.msra.mxu0 %v641_v6  ;;  %v622_v28 = vld [vmem:[%s581_s29] sm:$0x1]  ;;  %s578_s29 = scalar_lea.vmem %s2828_s5, %s2026_s25  ;;  %s2360_s25 = smov 16  }
  0x15   : > { %2135 = vmatprep.subr.bf16.mxu1 %v2354_v0  ;;  %2117 = vmatprep.subr.bf16.mxu0 %v2354_v0  ;;  %v619_v30 = vld [vmem:[%s570_s14] sm:$0x1]  ;;  %vm623_vm2 = vcmp.ne.s32.totalorder %v622_v28, 0 }
  0x16   : > { %v610_v9 = vmul.f32 0.25, %v2072_v7  ;;  %v611_v10 = vmul.f32 0.25, %v2073_v8  ;;  %vm620_vm3 = vcmp.ne.s32.totalorder %v619_v30, 0  ;;  %v624_v33 = vsel %vm623_vm2, 0.0, %v2359_v32  ;;  %v2560_v53 = vld [vmem:[%s567_s17] sm:$0xff]  }
  0x17   : > { %v621_v34 = vsel %vm620_vm3, 0.0, %v2359_v32  ;;  %v2531_v35 = vrot.slane %v624_v33, %v2528_v31 }
  0x18   : > { %v612_v11 = vpack.c.bf16 %v611_v10, %v610_v9  ;;  %1152 = vrot.lane.b32.xlu1 %v2253_v4, %s2357_s19  ;;  %v2534_v36 = vrot.slane %v621_v34, %v2528_v31 }
  0x1a   : > { %2126 = vmatmul.mubr.msk.bf16.vlgmr.msra.gmra.mrb[0].mxu1 %vm636_vm1, %v612_v11  ;;  %884 = vrot.lane.b32.xlu0 %v612_v11, %s2356_s18 }
  0x1b   : > { %2137 = vmatprep.mubr.msk.bf16.mxu1 %vm2355_vm0, %v2354_v0  ;;  %2114 = vmatmul.mubr.msk.bf16.vlgmr.msra.gmra.mrb[0].mxu0 %vm636_vm1, %v612_v11 }
  0x1c   : > { %1282 = vrot.lane.b32.xlu1 %v2040_v3, %s2357_s19  ;;  %2119 = vmatprep.mubr.msk.bf16.mxu0 %vm2355_vm0, %v2354_v0 }
  0x1d   : > { %2118 = vmatpush3.bf16.msra.mxu0 %v2560_v53 }
  0x1e   : > { %1150 = vrot.lane.b32.xlu0 %v612_v11, %s2357_s19  ;;  %2129 = vmatprep.subr.bf16.mxu0 %v2354_v0 }
  0x20   : > { %1410 = vrot.lane.b32.xlu1 %v612_v11, %s2358_s20 }
  0x22   : > { %1412 = vrot.lane.b32.xlu0 %v2253_v4, %s2358_s20 }
  0x26   : > { %1542 = vrot.lane.b32.xlu0 %v2040_v3, %s2358_s20 }
  0x85   : > { %v887_v12 = vpop.permute.xlu0 %886 }
  0x86   : > { %v892_v13 = vsel %vm636_vm1, %v887_v12, 0  ;;  %v1020_v14 = vpop.permute.xlu1 %1019 }
  0x87   : > { %2136 = vmatpush3.bf16.xpose.msra.mxu1 %v892_v13  ;;  %v1022_v16 = vsel %vm636_vm1, %v1020_v14, 0 }
  0x88   : > { %2147 = vmatprep.subr.bf16.mxu1 %v2354_v0 }
  0x8a   : > { %v1153_v17 = vpop.permute.xlu1 %1152 }
  0x8b   : > { %v1158_v18 = vsel %vm636_vm1, %v1153_v17, 0 }
  0x8c   : > { %v885_v15 = vpop.permute.xlu0 %884 }
  0x8e   : > { %2138 = vmatmul.mubr.msk.bf16.vlgmr.msra.gmra.mrb[4].mxu1 %vm636_vm1, %v885_v15  ;;  %v1283_v19 = vpop.permute.xlu1 %1282 }
  0x8f   : > { %2148 = vmatpush3.bf16.xpose.msra.mxu1 %v1022_v16  ;;  %2149 = vmatprep.mubr.msk.bf16.mxu1 %vm2355_vm0, %v2354_v0  ;;  %v1285_v21 = vsel %vm636_vm1, %v1283_v19, 0 }
  0x90   : > { %2159 = vmatprep.subr.bf16.mxu1 %v2354_v0  ;;  %v1151_v20 = vpop.permute.xlu0 %1150 }
  0x92   : > { %v1411_v25 = vpop.permute.xlu1 %1410 }
  0x94   : > { %v1413_v22 = vpop.permute.xlu0 %1412 }
  0x95   : > { %v1418_v23 = vsel %vm636_vm1, %v1413_v22, 0 }
  0x96   : > { %2150 = vmatmul.mubr.msk.bf16.vlgmr.msra.gmra.mrb[8].mxu1 %vm636_vm1, %v885_v15 }
  0x97   : > { %2160 = vmatpush3.bf16.xpose.msra.mxu1 %v1158_v18  ;;  %2161 = vmatprep.mubr.msk.bf16.mxu1 %vm2355_vm0, %v2354_v0 }
  0x98   : > { %2171 = vmatprep.subr.bf16.mxu1 %v2354_v0  ;;  %v1543_v24 = vpop.permute.xlu0 %1542 }
  0x99   : > { %v1545_v26 = vsel %vm636_vm1, %v1543_v24, 0 }
  0x9e   : > { %2162 = vmatmul.mubr.msk.bf16.vlgmr.msra.gmra.mrb[12].mxu1 %vm636_vm1, %v1151_v20 }
  0x9f   : > { %2172 = vmatpush3.bf16.xpose.msra.mxu1 %v1285_v21  ;;  %2173 = vmatprep.mubr.msk.bf16.mxu1 %vm2355_vm0, %v2354_v0 }
  0xa0   : > { %2183 = vmatprep.subr.bf16.mxu1 %v2354_v0 }
  0xa6   : > { %2174 = vmatmul.mubr.msk.bf16.vlgmr.msra.gmra.mrb[16].mxu1 %vm636_vm1, %v1151_v20 }
  0xa7   : > { %2184 = vmatpush3.bf16.xpose.msra.mxu1 %v1418_v23  ;;  %2185 = vmatprep.mubr.msk.bf16.mxu1 %vm2355_vm0, %v2354_v0 }
  0xa8   : > { %2195 = vmatprep.subr.bf16.mxu1 %v2354_v0 }
  0xae   : > { %2186 = vmatmul.mubr.msk.bf16.vlgmr.msra.gmra.mrb[20].mxu1 %vm636_vm1, %v1411_v25 }
  0xaf   : > { %2196 = vmatpush3.bf16.xpose.msra.mxu1 %v1545_v26  ;;  %2197 = vmatprep.mubr.msk.bf16.mxu1 %vm2355_vm0, %v2354_v0 }
  0xb0   : > { %2207 = vmatprep.subr.bf16.mxu1 %v2354_v0 }
  0xb6   : > { %2198 = vmatmul.mubr.msk.bf16.vlgmr.msra.gmra.mrb[24].mxu1 %vm636_vm1, %v1411_v25 }
  0xb7   : > { %2215 = vmatprep.mubr.msk.bf16.mxu1 %vm2355_vm0, %v2354_v0 }
  0xed   : > { %v802_v37 = vpop.f32.mrb[0].mxu1 }
  0xee   : > { %v2537_v38 = vadd.f32 %v802_v37, %v2531_v35  ;;  %v2127_v39 = vpop.f32.mrb[1].mxu1  ;;  %v677_v40 = vpop.f32.mrb[0].mxu0 }
  0xef   : > { %v805_v41 = vpop.f32.mrb[2].mxu1  ;;  %v2540_v42 = vadd.f32 %v677_v40, %v2534_v36  ;;  %v2115_v43 = vpop.f32.mrb[1].mxu0 }
  0xf0   : > { %v810_v44 = vsel %vm809_vm4, %v2537_v38, -inf  ;;  %v2545_v45 = vadd.f32 %v805_v41, %v2531_v35  ;;  %v2128_v46 = vpop.f32.mrb[3].mxu1  ;;  %v680_v47 = vpop.f32.mrb[2].mxu0 }
  0xf1   : > { %811 = vmax.xlane.f32.xlu0 %v810_v44  ;;  %v2548_v48 = vadd.f32 %v680_v47, %v2534_v36  ;;  %v684_v49 = vsel %vm636_vm1, %v2540_v42, -inf  ;;  %v2116_v50 = vpop.f32.mrb[3].mxu0 }
  0xf2   : > { %685 = vmax.xlane.f32.xlu1 %v684_v49  ;;  %v813_v52 = vsel %vm809_vm4, %v2545_v45, -inf }
  0xf3   : > { %v687_v51 = vsel %vm636_vm1, %v2548_v48, -inf }
  0xf5   : > { %688 = vmax.xlane.f32.xlu0 %v687_v51 }
  0xf6   : > { %814 = vmax.xlane.f32.xlu1 %v813_v52 }
 0x161   : > { %v928_v54 = vpop.f32.mrb[4].mxu1 }
 0x162   : > { %v2565_v55 = vadd.f32 %v928_v54, %v2534_v36  ;;  %v2139_v56 = vpop.f32.mrb[5].mxu1  ;;  %v2636_v54 = vld [vmem:[%s578_s29] sm:$0xf] }
 0x163   : > { %v931_v57 = vpop.f32.mrb[6].mxu1  ;;  %v2640_v56 = vcombine.low %v2636_v54, %v2636_v54 }
 0x164   : > { %v2568_v58 = vadd.f32 %v931_v57, %v2534_v36  ;;  %v2140_v59 = vpop.f32.mrb[7].mxu1  ;;  %v935_v60 = vsel %vm636_vm1, %v2565_v55, -inf }
 0x165   : > { %936 = vmax.xlane.f32.xlu0 %v935_v60 }
 0x166   : > { %v938_v61 = vsel %vm636_vm1, %v2568_v58, -inf }
 0x167   : > { %939 = vmax.xlane.f32.xlu1 %v938_v61 }
 0x169   : > { %v1058_v62 = vpop.f32.mrb[8].mxu1 }
 0x16a   : > { %v2575_v63 = vadd.f32 %v1058_v62, %v2531_v35  ;;  %v2151_v1 = vpop.f32.mrb[9].mxu1 }
 0x16b   : > { %v1061_v2 = vpop.f32.mrb[10].mxu1 }
 0x16c   : > { %v2578_v3 = vadd.f32 %v1061_v2, %v2531_v35  ;;  %v2152_v4 = vpop.f32.mrb[11].mxu1  ;;  %v1065_v5 = vsel %vm809_vm4, %v2575_v63, -inf }
 0x16d   : > { %1066 = vmax.xlane.f32.xlu0 %v1065_v5 }
 0x16e   : > { %v1068_v6 = vsel %vm809_vm4, %v2578_v3, -inf }
 0x16f   : > { %1069 = vmax.xlane.f32.xlu1 %v1068_v6 }
 0x171   : > { %v1194_v7 = vpop.f32.mrb[12].mxu1 }
 0x172   : > { %v2585_v8 = vadd.f32 %v1194_v7, %v2534_v36  ;;  %v2163_v9 = vpop.f32.mrb[13].mxu1 }
 0x173   : > { %v1197_v10 = vpop.f32.mrb[14].mxu1 }
 0x174   : > { %v2588_v11 = vadd.f32 %v1197_v10, %v2534_v36  ;;  %v2164_v12 = vpop.f32.mrb[15].mxu1  ;;  %v1201_v13 = vsel %vm636_vm1, %v2585_v8, -inf }
 0x175   : > { %1202 = vmax.xlane.f32.xlu0 %v1201_v13 }
 0x176   : > { %v1204_v14 = vsel %vm636_vm1, %v2588_v11, -inf }
 0x177   : > { %1205 = vmax.xlane.f32.xlu1 %v1204_v14 }
 0x179   : > { %v1321_v15 = vpop.f32.mrb[16].mxu1 }
 0x17a   : > { %v2595_v16 = vadd.f32 %v1321_v15, %v2531_v35  ;;  %v2175_v17 = vpop.f32.mrb[17].mxu1 }
 0x17b   : > { %v1324_v18 = vpop.f32.mrb[18].mxu1 }
 0x17c   : > { %v2598_v19 = vadd.f32 %v1324_v18, %v2531_v35  ;;  %v2176_v20 = vpop.f32.mrb[19].mxu1  ;;  %v1328_v21 = vsel %vm809_vm4, %v2595_v16, -inf }
 0x17d   : > { %1329 = vmax.xlane.f32.xlu0 %v1328_v21 }
 0x17e   : > { %v812_v22 = vpop.xlane.xlu0 %811  ;;  %v1331_v23 = vsel %vm809_vm4, %v2598_v19, -inf }
 0x17f   : > { %1332 = vmax.xlane.f32.xlu1 %v1331_v23  ;;  %v686_v24 = vpop.xlane.xlu1 %685  ;;  %v816_v57 = vsub.f32 %v2537_v38, %v812_v22 }
 0x180   : > { %v690_v60 = vsub.f32 %v2540_v42, %v686_v24 }
 0x181   : > { %v1454_v25 = vpop.f32.mrb[20].mxu1  ;;  %v818_v59 = vmul.f32 1.442695, %v816_v57 }
 0x182   : > { %v689_v26 = vpop.xlane.xlu0 %688  ;;  %v2605_v27 = vadd.f32 %v1454_v25, %v2534_v36  ;;  %v2187_v29 = vpop.f32.mrb[21].mxu1  ;;  %v692_v61 = vmul.f32 1.442695, %v690_v60 }
 0x183   : > { %v691_v28 = vsub.f32 %v2548_v48, %v689_v26  ;;  %v1457_v30 = vpop.f32.mrb[22].mxu1  ;;  %v815_v32 = vpop.xlane.xlu1 %814 }
 0x184   : > { %v2609_v33 = vadd.f32 %v1457_v30, %v2534_v36  ;;  %v817_v34 = vsub.f32 %v2545_v45, %v815_v32  ;;  %v2188_v37 = vpop.f32.mrb[23].mxu1  ;;  %v1461_v39 = vsel %vm636_vm1, %v2605_v27, -inf }
 0x185   : > { %v694_v40 = vmul.f32 1.442695, %v691_v28  ;;  %1462 = vmax.xlane.f32.xlu0 %v1461_v39 }
 0x186   : > { %v820_v41 = vmul.f32 1.442695, %v817_v34  ;;  %v1464_v43 = vsel %vm636_vm1, %v2609_v33, -inf }
 0x187   : > { %1465 = vmax.xlane.f32.xlu1 %v1464_v43 }
 0x188   : > { %2260 = vpow2.f32 %v820_v41 }
 0x189   : > { %v1581_v44 = vpop.f32.mrb[24].mxu1  ;;  %2262 = vpow2.f32 %v694_v40 }
 0x18a   : > { %v2199_v46 = vpop.f32.mrb[25].mxu1  ;;  %2264 = vpow2.f32 %v818_v59  ;;  %v2647_v62 = vadd.f32 %v1581_v44, %v2531_v35 }
 0x18b   : > { %v1584_v36 = vpop.f32.mrb[26].mxu1  ;;  %2266 = vpow2.f32 %v692_v61 }
 0x18c   : > { %v2617_v47 = vadd.f32 %v1584_v36, %v2531_v35  ;;  %v2200_v45 = vpop.f32.mrb[27].mxu1  ;;  %v1588_v1 = vsel %vm809_vm4, %v2647_v62, -inf }
 0x18e   : > { %v1591_v48 = vsel %vm809_vm4, %v2617_v47, -inf }
 0x18f   : > { %1592 = vmax.xlane.f32.xlu1 %v1591_v48 }
 0x192   : > { %v2621_v49 = vpop.eup %2260 }
 0x193   : > { %v825_v50 = vsel %vm809_vm4, %v2621_v49, 0.0  ;;  %v2625_v51 = vpop.eup %2262 }
 0x194   : > { %826 = vadd.xlane.f32.xlu1 %v825_v50  ;;  %v699_v52 = vsel %vm636_vm1, %v2625_v51, 0.0  ;;  %v2651_v2 = vpop.eup %2264 }
 0x195   : > { %v822_v38 = vsel %vm809_vm4, %v2651_v2, 0.0  ;;  %v2655_v4 = vpop.eup %2266 }
 0x196   : > { %v696_v42 = vsel %vm636_vm1, %v2655_v4, 0.0 }
 0x198   : > { %700 = vadd.xlane.f32.xlu1 %v699_v52 }
 0x19b   : > { %958 = vrot.lane.b32.xlu0 %v2560_v53, %s2356_s18 }
 0x1a9   : > { %1091 = vrot.lane.b32.xlu1 %v2640_v56, %s2356_s18  ;;  %s2361_s18 = smov 32  }
 0x1ba   : > { %1589 = vmax.xlane.f32.xlu0 %v1588_v1 }
 0x1be   : > { %823 = vadd.xlane.f32.xlu0 %v822_v38 }
 0x1c2   : > { %697 = vadd.xlane.f32.xlu0 %v696_v42 }
 0x1f2   : > { %v937_v5 = vpop.xlane.xlu0 %936 }
 0x1f3   : > { %v941_v35 = vsub.f32 %v2565_v55, %v937_v5 }
 0x1f4   : > { %v940_v6 = vpop.xlane.xlu1 %939 }
 0x1f5   : > { %v943_v7 = vmul.f32 1.442695, %v941_v35  ;;  %v942_v9 = vsub.f32 %v2568_v58, %v940_v6 }
 0x1f7   : > { %2268 = vpow2.f32 %v943_v7  ;;  %v945_v10 = vmul.f32 1.442695, %v942_v9 }
 0x1f9   : > { %2270 = vpow2.f32 %v945_v10 }
 0x1fa   : > { %v1067_v12 = vpop.xlane.xlu0 %1066 }
 0x1fb   : > { %v1071_v13 = vsub.f32 %v2575_v63, %v1067_v12 }
 0x1fc   : > { %v1070_v14 = vpop.xlane.xlu1 %1069 }
 0x1fd   : > { %v1073_v15 = vmul.f32 1.442695, %v1071_v13  ;;  %v1072_v17 = vsub.f32 %v2578_v3, %v1070_v14 }
 0x1ff   : > { %2272 = vpow2.f32 %v1073_v15  ;;  %v1075_v18 = vmul.f32 1.442695, %v1072_v17 }
 0x201   : > { %v2663_v20 = vpop.eup %2268  ;;  %2274 = vpow2.f32 %v1075_v18 }
 0x202   : > { %v1203_v55 = vpop.xlane.xlu0 %1202  ;;  %v947_v21 = vsel %vm636_vm1, %v2663_v20, 0.0 }
 0x203   : > { %v2667_v58 = vpop.eup %2270  ;;  %v1207_v22 = vsub.f32 %v2585_v8, %v1203_v55  ;;  %948 = vadd.xlane.f32.xlu0 %v947_v21 }
 0x204   : > { %v1206_v23 = vpop.xlane.xlu1 %1205  ;;  %v950_v63 = vsel %vm636_vm1, %v2667_v58, 0.0 }
 0x205   : > { %v1209_v24 = vmul.f32 1.442695, %v1207_v22  ;;  %v1208_v3 = vsub.f32 %v2588_v11, %v1206_v23  ;;  %951 = vadd.xlane.f32.xlu1 %v950_v63  ;;  %v838_v23 = vsel %vm836_vm5, %v2636_v54, 0 }
 0x207   : > { %2276 = vpow2.f32 %v1209_v24  ;;  %v1211_v25 = vmul.f32 1.442695, %v1208_v3 }
 0x209   : > { %v2673_v26 = vpop.eup %2272  ;;  %2278 = vpow2.f32 %v1211_v25 }
 0x20a   : > { %v1077_v28 = vsel %vm809_vm4, %v2673_v26, 0.0  ;;  %v1330_v11 = vpop.xlane.xlu0 %1329 }
 0x20b   : > { %v2677_v29 = vpop.eup %2274  ;;  %1078 = vadd.xlane.f32.xlu0 %v1077_v28  ;;  %v1334_v38 = vsub.f32 %v2595_v16, %v1330_v11 }
 0x20c   : > { %v1333_v8 = vpop.xlane.xlu1 %1332  ;;  %v1080_v30 = vsel %vm809_vm4, %v2677_v29, 0.0 }
 0x20d   : > { %v1335_v32 = vsub.f32 %v2598_v19, %v1333_v8  ;;  %1081 = vadd.xlane.f32.xlu1 %v1080_v30  ;;  %v1336_v42 = vmul.f32 1.442695, %v1334_v38 }
 0x20f   : > { %v1338_v34 = vmul.f32 1.442695, %v1335_v32 }
 0x211   : > { %v2682_v37 = vpop.eup %2276  ;;  %2280 = vpow2.f32 %v1338_v34 }
 0x212   : > { %v1213_v39 = vsel %vm636_vm1, %v2682_v37, 0.0  ;;  %v1463_v41 = vpop.xlane.xlu0 %1462 }
 0x213   : > { %v2686_v40 = vpop.eup %2278  ;;  %1214 = vadd.xlane.f32.xlu0 %v1213_v39  ;;  %v1467_v43 = vsub.f32 %v2605_v27, %v1463_v41 }
 0x214   : > { %v1466_v44 = vpop.xlane.xlu1 %1465  ;;  %v1216_v46 = vsel %vm636_vm1, %v2686_v40, 0.0 }
 0x215   : > { %v1468_v19 = vsub.f32 %v2609_v33, %v1466_v44  ;;  %1217 = vadd.xlane.f32.xlu1 %v1216_v46  ;;  %v1469_v36 = vmul.f32 1.442695, %v1467_v43 }
 0x216   : > { %v959_v35 = vpop.permute.xlu0 %958 }
 0x217   : > { %v1471_v45 = vmul.f32 1.442695, %v1468_v19  ;;  %2282 = vpow2.f32 %v1469_v36 }
 0x219   : > { %2284 = vpow2.f32 %v1471_v45 }
 0x21b   : > { %v2692_v48 = vpop.eup %2280 }
 0x21c   : > { %v1593_v50 = vpop.xlane.xlu1 %1592  ;;  %v1343_v52 = vsel %vm809_vm4, %v2692_v48, 0.0 }
 0x21d   : > { %v1595_v57 = vsub.f32 %v2617_v47, %v1593_v50  ;;  %1344 = vadd.xlane.f32.xlu1 %v1343_v52 }
 0x21f   : > { %v1598_v27 = vmul.f32 1.442695, %v1595_v57 }
 0x221   : > { %2286 = vpow2.f32 %v1598_v27  ;;  %v2697_v59 = vpop.eup %2282  ;;  %v827_v6 = vpop.xlane.xlu1 %826 }
 0x222   : > { %v1473_v33 = vsel %vm636_vm1, %v2697_v59, 0.0  ;;  %2288 = vpow2.f32 %v1336_v42 }
 0x223   : > { %v2701_v60 = vpop.eup %2284  ;;  %1474 = vadd.xlane.f32.xlu1 %v1473_v33 }
 0x224   : > { %v1476_v61 = vsel %vm636_vm1, %v2701_v60, 0.0 }
 0x225   : > { %v701_v13 = vpop.xlane.xlu1 %700 }
 0x227   : > { %1477 = vadd.xlane.f32.xlu1 %v1476_v61 }
 0x229   : > { %1224 = vrot.lane.b32.xlu0 %v2560_v53, %s2357_s19  ;;  %v1092_v54 = vpop.permute.xlu1 %1091 }
 0x22b   : > { %v2707_v1 = vpop.eup %2286 }
 0x22c   : > { %v1603_v47 = vsel %vm809_vm4, %v2707_v1, 0.0  ;;  %v2714_v5 = vpop.eup %2288 }
 0x22d   : > { %1604 = vadd.xlane.f32.xlu1 %v1603_v47  ;;  %v1340_v7 = vsel %vm809_vm4, %v2714_v5, 0.0 }
 0x23e   : > { %1351 = vrot.lane.b32.xlu1 %v2640_v56, %s2357_s19  ;;  %s594_s19 = scalar_lea.vmem %s2834_s11, %s2841_s21 }
 0x247   : > { %v1590_v9 = vpop.xlane.xlu0 %1589 }
 0x248   : > { %1341 = vadd.xlane.f32.xlu0 %v1340_v7  ;;  %v1594_v10 = vsub.f32 %v2647_v62, %v1590_v9 }
 0x24a   : > { %v1596_v12 = vmul.f32 1.442695, %v1594_v10 }
 0x24b   : > { %v824_v14 = vpop.xlane.xlu0 %823 }
 0x24c   : > { %2290 = vpow2.f32 %v1596_v12 }
 0x24d   : > { %2292 = vrcp.f32 %v701_v13 }
 0x24f   : > { %v698_v16 = vpop.xlane.xlu0 %697 }
 0x250   : > { %2294 = vrcp.f32 %v698_v16 }
 0x251   : > { %2296 = vrcp.f32 %v824_v14 }
 0x252   : > { %2298 = vrcp.f32 %v827_v6 }
 0x256   : > { %v2719_v15 = vpop.eup %2290 }
 0x257   : > { %v1600_v17 = vsel %vm809_vm4, %v2719_v15, 0.0  ;;  %v2293_v18 = vpop.eup %2292 }
 0x258   : > { %1601 = vadd.xlane.f32.xlu0 %v1600_v17  ;;  %v705_v62 = vmul.f32 %v2293_v18, %v2625_v51 }
 0x25a   : > { %v2295_v55 = vpop.eup %2294 }
 0x25b   : > { %v704_v21 = vmul.f32 %v2295_v55, %v2655_v4  ;;  %v2297_v63 = vpop.eup %2296 }
 0x25c   : > { %v2299_v24 = vpop.eup %2298  ;;  %v830_v3 = vmul.f32 %v2297_v63, %v2651_v2 }
 0x25d   : > { %v706_v22 = vpack.c.bf16 %v705_v62, %v704_v21  ;;  %v831_v51 = vmul.f32 %v2299_v24, %v2621_v49 }
 0x25f   : > { %2120 = vmatmul.mubr.msk.bf16.vlgmr.msra.gmra.mrb[4].mxu0 %vm636_vm1, %v706_v22  ;;  %v832_v25 = vpack.c.bf16 %v831_v51, %v830_v3 }
 0x260   : > { %2130 = vmatpush3.bf16.msra.mxu0 %v838_v23  ;;  %2131 = vmatprep.mubr.msk.bf16.mxu0 %vm2355_vm0, %v2354_v0 }
 0x261   : > { %2141 = vmatprep.subr.bf16.mxu0 %v2354_v0 }
 0x267   : > { %2132 = vmatmul.mubr.msk.bf16.vlgmr.msra.gmra.mrb[8].mxu0 %vm809_vm4, %v832_v25 }
 0x268   : > { %2142 = vmatpush3.bf16.msra.mxu0 %v959_v35  ;;  %2143 = vmatprep.mubr.msk.bf16.mxu0 %vm2355_vm0, %v2354_v0 }
 0x269   : > { %2153 = vmatprep.subr.bf16.mxu0 %v2354_v0 }
 0x26e   : > { %1484 = vrot.lane.b32.xlu0 %v2560_v53, %s2358_s20 }
 0x272   : > { %1611 = vrot.lane.b32.xlu0 %v2640_v56, %s2358_s20  ;;  %v1097_v56 = vsel %vm836_vm5, %v1092_v54, 0  ;;  %s2066_s20 = sshll.u32 %s2841_s21, 4 }
 0x273   : > { %s590_s16 = scalar_lea.vmem %s2832_s9, %s2066_s20 }
 0x290   : > { %v949_v2 = vpop.xlane.xlu0 %948 }
 0x291   : > { %2300 = vrcp.f32 %v949_v2 }
 0x292   : > { %v952_v4 = vpop.xlane.xlu1 %951 }
 0x293   : > { %2302 = vrcp.f32 %v952_v4 }
 0x298   : > { %v1079_v49 = vpop.xlane.xlu0 %1078 }
 0x299   : > { %2304 = vrcp.f32 %v1079_v49 }
 0x29a   : > { %v1082_v28 = vpop.xlane.xlu1 %1081 }
 0x29b   : > { %v2301_v8 = vpop.eup %2300  ;;  %2306 = vrcp.f32 %v1082_v28 }
 0x29c   : > { %v955_v32 = vmul.f32 %v2301_v8, %v2663_v20 }
 0x29d   : > { %v2303_v30 = vpop.eup %2302 }
 0x29e   : > { %v956_v11 = vmul.f32 %v2303_v30, %v2667_v58 }
 0x2a0   : > { %v1215_v34 = vpop.xlane.xlu0 %1214  ;;  %v957_v53 = vpack.c.bf16 %v956_v11, %v955_v32 }
 0x2a1   : > { %2308 = vrcp.f32 %v1215_v34 }
 0x2a2   : > { %v1218_v39 = vpop.xlane.xlu1 %1217  ;;  %2144 = vmatmul.mubr.msk.bf16.vlgmr.msra.gmra.mrb[12].mxu0 %vm636_vm1, %v957_v53 }
 0x2a3   : > { %v2305_v41 = vpop.eup %2304  ;;  %2310 = vrcp.f32 %v1218_v39  ;;  %2154 = vmatpush3.bf16.msra.mxu0 %v1097_v56  ;;  %2155 = vmatprep.mubr.msk.bf16.mxu0 %vm2355_vm0, %v2354_v0  ;;  %v2256_v39 = vld [vmem:[%s2831_s8] sm:$0xff]  }
 0x2a4   : > { %2165 = vmatprep.subr.bf16.mxu0 %v2354_v0  ;;  %v1085_v20 = vmul.f32 %v2305_v41, %v2673_v26  ;;  %v1225_v46 = vpop.permute.xlu0 %1224  ;;  %2208 = vmatpush3.bf16.msra.mxu1 %v2256_v39 }
 0x2a5   : > { %v2307_v43 = vpop.eup %2306  ;;  %2209 = vmatprep.subr.bf16.mxu1 %v2354_v0 }
 0x2a6   : > { %v1086_v58 = vmul.f32 %v2307_v43, %v2677_v29 }
 0x2a8   : > { %v1087_v44 = vpack.c.bf16 %v1086_v58, %v1085_v20  ;;  %v2257_v58 = vld [vmem:[%s2831_s8 + $0x8] sm:$0xff]  }
 0x2a9   : > { %2210 = vmatpush3.bf16.msra.mxu1 %v2257_v58 }
 0x2aa   : > { %2156 = vmatmul.mubr.msk.bf16.vlgmr.msra.gmra.mrb[16].mxu0 %vm809_vm4, %v1087_v44  ;;  %v1345_v45 = vpop.xlane.xlu1 %1344  ;;  %2211 = vmatprep.subr.bf16.mxu1 %v2354_v0 }
 0x2ab   : > { %v2309_v19 = vpop.eup %2308  ;;  %2166 = vmatpush3.bf16.msra.mxu0 %v1225_v46  ;;  %2167 = vmatprep.mubr.msk.bf16.mxu0 %vm2355_vm0, %v2354_v0  ;;  %2312 = vrcp.f32 %v1345_v45  ;;  %v2258_v46 = vld [vmem:[%s2831_s8 + $0x10] sm:$0xff]  }
 0x2ac   : > { %2177 = vmatprep.subr.bf16.mxu0 %v2354_v0  ;;  %v1221_v50 = vmul.f32 %v2309_v19, %v2682_v37 }
 0x2ad   : > { %v2311_v36 = vpop.eup %2310  ;;  %2212 = vmatpush3.bf16.msra.mxu1 %v2258_v46 }
 0x2ae   : > { %v1222_v52 = vmul.f32 %v2311_v36, %v2686_v40  ;;  %v2259_v36 = vld [vmem:[%s2831_s8 + $0x18] sm:$0xff]   ;;  %2213 = vmatprep.subr.bf16.mxu1 %v2354_v0 }
 0x2b0   : > { %v1223_v26 = vpack.c.bf16 %v1222_v52, %v1221_v50  ;;  %v1475_v57 = vpop.xlane.xlu1 %1474 }
 0x2b1   : > { %2214 = vmatpush3.bf16.msra.mxu1 %v2259_v36 }
 0x2b2   : > { %2168 = vmatmul.mubr.msk.bf16.vlgmr.msra.gmra.mrb[20].mxu0 %vm636_vm1, %v1223_v26 }
 0x2b3   : > { %2179 = vmatprep.mubr.msk.bf16.mxu0 %vm2355_vm0, %v2354_v0 }
 0x2b4   : > { %v1478_v29 = vpop.xlane.xlu1 %1477 }
 0x2b5   : > { %v2313_v37 = vpop.eup %2312 }
 0x2b6   : > { %v1349_v38 = vmul.f32 %v2313_v37, %v2692_v48 }
 0x2ba   : > { %v1605_v27 = vpop.xlane.xlu1 %1604 }
 0x2be   : > { %v1352_v33 = vpop.permute.xlu1 %1351 }
 0x2bf   : > { %v1357_v61 = vsel %vm836_vm5, %v1352_v33, 0 }
 0x2c0   : > { %2178 = vmatpush3.bf16.msra.mxu0 %v1357_v61 }
 0x2c1   : > { %2189 = vmatprep.subr.bf16.mxu0 %v2354_v0 }
 0x2d5   : > { %v1342_v47 = vpop.xlane.xlu0 %1341 }
 0x2d6   : > { %2314 = vrcp.f32 %v1342_v47 }
 0x2d7   : > { %2316 = vrcp.f32 %v1478_v29 }
 0x2d8   : > { %2318 = vrcp.f32 %v1475_v57 }
 0x2d9   : > { %2320 = vrcp.f32 %v1605_v27 }
 0x2e0   : > { %v2315_v40 = vpop.eup %2314 }
 0x2e1   : > { %v1348_v42 = vmul.f32 %v2315_v40, %v2714_v5  ;;  %v2317_v6 = vpop.eup %2316 }
 0x2e2   : > { %v2319_v9 = vpop.eup %2318  ;;  %v1482_v10 = vmul.f32 %v2317_v6, %v2701_v60 }
 0x2e3   : > { %v1350_v35 = vpack.c.bf16 %v1349_v38, %v1348_v42  ;;  %v1481_v12 = vmul.f32 %v2319_v9, %v2697_v59  ;;  %v2321_v14 = vpop.eup %2320 }
 0x2e4   : > { %v1609_v60 = vmul.f32 %v2321_v14, %v2707_v1 }
 0x2e5   : > { %2180 = vmatmul.mubr.msk.bf16.vlgmr.msra.gmra.mrb[24].mxu0 %vm809_vm4, %v1350_v35  ;;  %v1602_v7 = vpop.xlane.xlu0 %1601  ;;  %v1483_v48 = vpack.c.bf16 %v1482_v10, %v1481_v12 }
 0x2e6   : > { %2191 = vmatprep.mubr.msk.bf16.mxu0 %vm2355_vm0, %v2354_v0  ;;  %2322 = vrcp.f32 %v1602_v7  ;;  %v2052_v7 = vld [vmem:[%s2830_s7] ss:$0 sm:$0xff] }
 0x2e9   : > { %v1485_v13 = vpop.permute.xlu0 %1484 }
 0x2ea   : > { %2190 = vmatpush3.bf16.msra.mxu0 %v1485_v13 }
 0x2eb   : > { %2201 = vmatprep.subr.bf16.mxu0 %v2354_v0 }
 0x2ed   : > { %2192 = vmatmul.mubr.msk.bf16.vlgmr.msra.gmra.mrb[28].mxu0 %vm636_vm1, %v1483_v48  ;;  %v1612_v5 = vpop.permute.xlu0 %1611 }
 0x2ee   : > { %v1617_v16 = vsel %vm836_vm5, %v1612_v5, 0  ;;  %2203 = vmatprep.mubr.msk.bf16.mxu0 %vm2355_vm0, %v2354_v0 }
 0x2ef   : > { %2202 = vmatpush3.bf16.msra.mxu0 %v1617_v16 }
 0x2f0   : > { %v2323_v17 = vpop.eup %2322 }
 0x2f1   : > { %v1608_v59 = vmul.f32 %v2323_v17, %v2719_v15 }
 0x2f3   : > { %v1610_v18 = vpack.c.bf16 %v1609_v60, %v1608_v59 }
 0x2f5   : > { %2204 = vmatmul.mubr.msk.bf16.vlgmr.msra.gmra.mrb[32].mxu0 %vm809_vm4, %v1610_v18 }
 0x332   : > { %v750_v55 = vpop.f32.mrb[4].mxu0 }
 0x333   : > { %757 = vst.msk [vmem:[#allocation2] sm:$0xff] %vm636_vm1, %v750_v55  ;;  %v2121_v62 = vpop.f32.mrb[5].mxu0 }
 0x334   : > { %v753_v21 = vpop.f32.mrb[6].mxu0 }
 0x335   : > { %758 = vst.msk [vmem:[#allocation2 + $0x8] sm:$0xff] %vm636_vm1, %v753_v21  ;;  %v2122_v22 = vpop.f32.mrb[7].mxu0 }
 0x336   : > { %v1765_v22 = vld [vmem:[%s594_s19] sm:$0x1] }
 0x337   : > { %2324 = vtanh.f32 %v1765_v22 }
 0x33a   : > { %v874_v23 = vpop.f32.mrb[8].mxu0 }
 0x33b   : > { %881 = vst.msk [vmem:[#allocation3] sm:$0xff] %vm636_vm1, %v874_v23  ;;  %v2133_v63 = vpop.f32.mrb[9].mxu0 }
 0x33c   : > { %v877_v24 = vpop.f32.mrb[10].mxu0 }
 0x33d   : > { %882 = vst.msk [vmem:[#allocation3 + $0x8] sm:$0xff] %vm636_vm1, %v877_v24  ;;  %v2134_v1 = vpop.f32.mrb[11].mxu0 }
 0x375   : > { %v998_v15 = vpop.f32.mrb[12].mxu0 }
 0x376   : > { %1007 = vrot.lane.b32.xlu1 %v998_v15, %s2360_s25  ;;  %v2145_v3 = vpop.f32.mrb[13].mxu0 }
 0x377   : > { %v1001_v51 = vpop.f32.mrb[14].mxu0 }
 0x378   : > { %1009 = vrot.lane.b32.xlu0 %v1001_v51, %s2360_s25  ;;  %v2146_v25 = vpop.f32.mrb[15].mxu0  ;;  %v2325_v51 = vpop.eup %2324 }
 0x37d   : > { %v1133_v54 = vpop.f32.mrb[16].mxu0 }
 0x37e   : > { %1142 = vrot.lane.b32.xlu1 %v1133_v54, %s2360_s25  ;;  %v2157_v2 = vpop.f32.mrb[17].mxu0  ;;  %v2058_v54 = vld [vmem:[%s2833_s10] ss:$0 sm:$0xff] }
 0x37f   : > { %v1136_v4 = vpop.f32.mrb[18].mxu0  ;;  %v1797_v2 = vrot.slane %v2325_v51, %v2528_v31 }
 0x380   : > { %1144 = vrot.lane.b32.xlu0 %v1136_v4, %s2360_s25  ;;  %v2158_v49 = vpop.f32.mrb[19].mxu0 }
 0x385   : > { %v1264_v28 = vpop.f32.mrb[20].mxu0 }
 0x386   : > { %1273 = vrot.lane.b32.xlu1 %v1264_v28, %s2361_s18  ;;  %v2169_v8 = vpop.f32.mrb[21].mxu0 }
 0x387   : > { %v1267_v30 = vpop.f32.mrb[22].mxu0 }
 0x388   : > { %1275 = vrot.lane.b32.xlu0 %v1267_v30, %s2361_s18  ;;  %v2170_v32 = vpop.f32.mrb[23].mxu0  ;;  %v1763_v30 = vld [vmem:[%s590_s16] sm:$0xff] }
 0x3b8   : > { %v1393_v11 = vpop.f32.mrb[24].mxu0 }
 0x3b9   : > { %1402 = vrot.lane.b32.xlu1 %v1393_v11, %s2361_s18  ;;  %v2181_v34 = vpop.f32.mrb[25].mxu0 }
 0x3ba   : > { %v1396_v53 = vpop.f32.mrb[26].mxu0  ;;  %v1764_v34 = vld [vmem:[%s590_s16 + $0x8] sm:$0xff] }
 0x3bb   : > { %1404 = vrot.lane.b32.xlu0 %v1396_v53, %s2361_s18  ;;  %v2182_v56 = vpop.f32.mrb[27].mxu0 }
 0x3c0   : > { %v1524_v41 = vpop.f32.mrb[28].mxu0 }
 0x3c1   : > { %v2193_v43 = vpop.f32.mrb[29].mxu0 }
 0x3c2   : > { %v1527_v20 = vpop.f32.mrb[30].mxu0 }
 0x3c3   : > { %v2194_v44 = vpop.f32.mrb[31].mxu0 }
 0x3c8   : > { %v1653_v19 = vpop.f32.mrb[32].mxu0 }
 0x3c9   : > { %1662 = vrot.lane.b32.xlu1 %v1653_v19, %s2362_s27  ;;  %v2205_v45 = vpop.f32.mrb[33].mxu0 }
 0x3ca   : > { %v1656_v50 = vpop.f32.mrb[34].mxu0 }
 0x3cb   : > { %1664 = vrot.lane.b32.xlu0 %v1656_v50, %s2362_s27  ;;  %v2206_v52 = vpop.f32.mrb[35].mxu0 }
 0x3cd   : > { %1533 = vrot.lane.b32.xlu1 %v1524_v41, %s2362_s27 }
 0x3cf   : > { %1535 = vrot.lane.b32.xlu0 %v1527_v20, %s2362_s27  ;;  %s603_s27 = scalar_lea.vmem %s2835_s12, %s2456_s26 }
 0x3e8   : > { %v1008_v26 = vpop.permute.xlu1 %1007 }
 0x3e9   : > { %1014 = vst.msk [vmem:[#allocation2] sm:$0xff] %vm1013_vm6, %v1008_v26 }
 0x3ea   : > { %v1010_v57 = vpop.permute.xlu0 %1009 }
 0x3eb   : > { %1015 = vst.msk [vmem:[#allocation2 + $0x8] sm:$0xff] %vm1013_vm6, %v1010_v57 }
 0x3f0   : > { %v1143_v29 = vpop.permute.xlu1 %1142 }
 0x3f1   : > { %1148 = vst.msk [vmem:[#allocation3] sm:$0xff] %vm1013_vm6, %v1143_v29 }
 0x3f2   : > { %v1145_v27 = vpop.permute.xlu0 %1144 }
 0x3f3   : > { %1149 = vst.msk [vmem:[#allocation3 + $0x8] sm:$0xff] %vm1013_vm6, %v1145_v27 }
 0x3f8   : > { %v1274_v33 = vpop.permute.xlu1 %1273 }
 0x3f9   : > { %1280 = vst.msk [vmem:[#allocation2] sm:$0xff] %vm1279_vm7, %v1274_v33 }
 0x3fa   : > { %v1276_v61 = vpop.permute.xlu0 %1275 }
 0x3fb   : > { %1281 = vst.msk [vmem:[#allocation2 + $0x8] sm:$0xff] %vm1279_vm7, %v1276_v61 }
 0x42b   : > { %v1403_v0 = vpop.permute.xlu1 %1402 }
 0x42c   : > { %1408 = vst.msk [vmem:[#allocation3] sm:$0xff] %vm1279_vm7, %v1403_v0 }
 0x42d   : > { %v1405_v47 = vpop.permute.xlu0 %1404 }
 0x42e   : > { %1409 = vst.msk [vmem:[#allocation3 + $0x8] sm:$0xff] %vm1279_vm7, %v1405_v47 }
 0x43b   : > { %v1663_v37 = vpop.permute.xlu1 %1662 }
 0x43c   : > { %1668 = vst.msk [vmem:[#allocation3] sm:$0xff] %vm1539_vm8, %v1663_v37 }
 0x43d   : > { %v1665_v40 = vpop.permute.xlu0 %1664 }
 0x43e   : > { %1669 = vst.msk [vmem:[#allocation3 + $0x8] sm:$0xff] %vm1539_vm8, %v1665_v40 }
 0x43f   : > { %v1534_v38 = vpop.permute.xlu1 %1533 }
 0x440   : > { %1540 = vst.msk [vmem:[#allocation2] sm:$0xff] %vm1539_vm8, %v1534_v38 }
 0x441   : > { %v1536_v42 = vpop.permute.xlu0 %1535 }
 0x442   : > { %1541 = vst.msk [vmem:[#allocation2 + $0x8] sm:$0xff] %vm1539_vm8, %v1536_v42 }
 0x443   : > { %v1672_v35 = vld [vmem:[#allocation3] sm:$0xff] }
 0x444   : > { %v1681_v10 = vmul.f32 %v2052_v7, %v1672_v35 }
 0x445   : > { %v1673_v6 = vld [vmem:[#allocation3 + $0x8] sm:$0xff] }
 0x446   : > { %v1682_v12 = vmul.f32 %v2052_v7, %v1673_v6 }
 0x447   : > { %v1670_v9 = vld [vmem:[#allocation2] sm:$0xff] }
 0x448   : > { %v1683_v48 = vadd.f32 %v1681_v10, %v1670_v9 }
 0x449   : > { %v1671_v13 = vld [vmem:[#allocation2 + $0x8] sm:$0xff] }
 0x44a   : > { %v1684_v5 = vadd.f32 %v1682_v12, %v1671_v13 }
 0x44c   : > { %v1685_v14 = vpack.c.bf16 %v1684_v5, %v1683_v48 }
 0x44e   : > { %2216 = vmatmul.mubr.msk.bf16.vlgmr.msra.gmra.mrb[28].mxu1 %vm1718_vm9, %v1685_v14 }
 0x521   : > { %v1756_v16 = vpop.f32.mrb[28].mxu1 }
 0x522   : > { %v1768_v17 = vmul.f32 %v1756_v16, %v1756_v16  ;;  %v2217_v60 = vpop.f32.mrb[29].mxu1 }
 0x523   : > { %v1759_v59 = vpop.f32.mrb[30].mxu1 }
 0x524   : > { %v1769_v18 = vmul.f32 %v1759_v59, %v1759_v59  ;;  %v2218_v55 = vpop.f32.mrb[31].mxu1  ;;  %v1770_v62 = vsel %vm1718_vm9, %v1768_v17, 0.0 }
 0x525   : > { %1771 = vadd.xlane.f32.xlu1 %v1770_v62 }
 0x526   : > { %v1773_v21 = vsel %vm1718_vm9, %v1769_v18, 0.0 }
 0x527   : > { %1774 = vadd.xlane.f32.xlu0 %v1773_v21 }
 0x5b2   : > { %v1772_v23 = vpop.xlane.xlu1 %1771 }
 0x5b3   : > { %v1777_v63 = vmul.f32 0.015625, %v1772_v23 }
 0x5b4   : > { %v1775_v24 = vpop.xlane.xlu0 %1774 }
 0x5b5   : > { %v1779_v1 = vadd.f32 1e-05, %v1777_v63  ;;  %v1778_v15 = vmul.f32 0.015625, %v1775_v24 }
 0x5b7   : > { %2326 = vrsqrt.f32 %v1779_v1  ;;  %v1780_v3 = vadd.f32 1e-05, %v1778_v15 }
 0x5b9   : > { %2328 = vrsqrt.f32 %v1780_v3 }
 0x5c1   : > { %v2327_v25 = vpop.eup %2326 }
 0x5c2   : > { %v1783_v4 = vmul.f32 %v2327_v25, %v1756_v16 }
 0x5c3   : > { %v2329_v49 = vpop.eup %2328 }
 0x5c4   : > { %v1791_v28 = vmul.f32 %v2058_v54, %v1783_v4  ;;  %v1784_v8 = vmul.f32 %v2329_v49, %v1759_v59 }
 0x5c6   : > { %v1799_v32 = vmul.f32 %v1797_v2, %v1791_v28  ;;  %v1792_v11 = vmul.f32 %v2058_v54, %v1784_v8 }
 0x5c8   : > { %v1801_v53 = vadd.f32 %v1799_v32, %v1763_v30  ;;  %v1800_v56 = vmul.f32 %v1797_v2, %v1792_v11 }
 0x5ca   : > { %v2068_v39 = vpack.c.bf16 %v1801_v53, %v1801_v53  ;;  %v1802_v41 = vadd.f32 %v1800_v56, %v1764_v34 }
 0x5cc   : > { %1812 = vst.msk [vmem:[%s603_s27] sm:$0xf] %vm1811_vm10, %v2068_v39  ;;  %v2069_v43 = vpack.c.bf16 %v1802_v41, %v1802_v41 }
 0x5ce   : > { %1813 = vst.msk [vmem:[%s603_s27 + $0x4] sm:$0xf] %vm1811_vm10, %v2069_v43 }
 0x5cf PF: > { %s22_s23 = sadd.s32 1, %s2352_s23   ;;  %s2836_s21 = smov %s2348_s22 }
 0x5d0   : > { %p19_p5 = scmp.ge.s32.totalorder %s22_s23, 4   ;;  %s2837_s22 = smov %s2839_s24 }
 0x5d2   :  { %21 = sbr.rel (!%p19_p5) target bundleno = 2 (0x2), region = 122 }

// kernel: transformer_block.9
= control target key start
LH: loop header
LB: loop body
LE: loop exit
PB: predicated region body
PF: predicated region fallthrough
CT: control target
= control target key end

     0   :  { %13 = vsyncpa [#allocation5], 0  ;;  %s1646_s0 = inlined_call_operand.vmem [shape: bf16[2,16,64], index: 0, kind: input, shape index: {}]   ;;  %s1647_s1 = inlined_call_operand.vmem [shape: f32[1,64], index: 1, kind: input, shape index: {}]   ;;  %s1648_s2 = inlined_call_operand.vmem [shape: f32[2,1,64], index: 2, kind: input, shape index: {}]   ;;  %s1649_s3 = inlined_call_operand.vmem [shape: bf16[64,192], index: 3, kind: input, shape index: {}]   ;;  %s1650_s4 = inlined_call_operand.vmem [shape: bf16[64,192], index: 4, kind: input, shape index: {}]   ;;  %s1651_s5 = inlined_call_operand.vmem [shape: bf16[192,64], index: 5, kind: input, shape index: {}]   ;;  %s1652_s6 = inlined_call_operand.vmem [shape: f32[1,64], index: 6, kind: input, shape index: {}]   ;;  %s1653_s7 = inlined_call_operand.vmem [shape: f32[2,1,64], index: 7, kind: input, shape index: {}]   ;;  %s1654_s8 = inlined_call_operand.hbm [shape: f32[2,16,64], index: 8, kind: output, shape index: {}]  }
   0x1   :  { %15 = vsyncpa [#allocation5 + $0x1], 0  ;;  %s1383_s27 = smov 0   ;;  %s1385_s28 = smov 0  }
   0x2   :  { %s1387_s29 = smov 0   ;;  %s1389_s30 = smov 0  }
   0x3   :  { %s1391_s9 = smov 0   ;;  %s1393_s10 = smov 0  }
   0x4 LB: > { %s1069_s11 = sadd.s32 4294967295, %s1331_s10   ;;  %s1070_s12 = sadd.s32 4294967294, %s1331_s10   ;;  %s1331_s10 = sphi %s1393_s10, %s21_s10   ;;  %s1327_s9 = sphi %s1391_s9, %s1661_s9   ;;  %s1323_s30 = sphi %s1389_s30, %s1660_s30   ;;  %s1319_s29 = sphi %s1387_s29, %s1659_s29   ;;  %s1315_s28 = sphi %s1385_s28, %s1658_s28   ;;  %s1311_s27 = sphi %s1383_s27, %s1657_s27  }
   0x5   : > { %s40_s13 = sadd.s32 1, %s1327_s9  ;;  %s249_s14 = sadd.s32 1, %s1319_s29 }
   0x6   : > { %p42_p0 = scmp.ge.s32.totalorder %s40_s13, 2  ;;  %p259_p1 = scmp.ne.s32.totalorder %s1319_s29, %s1315_s28 }
   0x7   : > { %p260_p2 = scmp.eq.s32.totalorder %s1069_s11, 1  ;;  %p265_p3 = scmp.ne.s32.totalorder %s1315_s28, %s1311_s27 }
   0x8   : > { %s1663_s13 = smov (%p42_p0, %s40_s13), 0  ;;  %p266_p5 = scmp.eq.s32.totalorder %s1070_s12, 1 }
   0x9   : > { %p1423_p4 = por %p260_p2, %p259_p1  ;;  %s244_s16 = ssub.s32 %s1327_s9, %s1663_s13 }
   0xa   : > { %p1076_p6 = scmp.ge.s32.totalorder %s1331_s10, 1  ;;  %p247_p7 = scmp.eq.s32.totalorder %s244_s16, 0 }
   0xb   : > { %p1430_p8 = por %p266_p5, %p265_p3  ;;  %p342_p9 = scmp.lt.s32.totalorder %s1331_s10, 3 }
   0xc   : > { %s1436_s18 = scalar_select %p247_p7, %s1319_s29, %s249_s14  }
   0xd   : > { %p343_p10 = pnand %p1076_p6, %p342_p9 }
   0xe   : > { %p402_p11 = scmp.lt.s32.totalorder (!%p343_p10), %s1323_s30, 1  ;;  %vm448_vm0 = vcmask (!%p343_p10), 523264   ;;  %v1191_v7 = vld [vmem:[%s1649_s3 + $0x4] ss:$8 sps:$4 sm:$0xff] (!%p343_p10)   ;;  %v1193_v8 = vld [vmem:[%s1649_s3] ss:$8 sps:$4 sm:$0xff] (!%p343_p10)   ;;  %v475_v26 = vlaneseq (!%p343_p10) }
   0xf   : > { %346 = sbr.rel (%p343_p10) target bundleno = 866 (0x362), region = 52  ;;  %539 = vmatprep.subr.bf16.mxu1 (!%p343_p10), %v1191_v7  ;;  %v1194_v9 = vld [vmem:[%s1649_s3 + $0x14] ss:$8 sps:$4 sm:$0xff] (!%p343_p10)   ;;  %v1196_v10 = vld [vmem:[%s1649_s3 + $0x10] ss:$8 sps:$4 sm:$0xff] (!%p343_p10)   ;;  %v1333_v15 = vmov (!%p343_p10), 0  }
  0x10   : > { %540 = vmatpush1.bf16.msra.mxu1 (!%p343_p10), %v1193_v8  ;;  %v1197_v11 = vld [vmem:[%s1649_s3 + $0x24] ss:$8 sps:$4 sm:$0xff] (!%p343_p10)   ;;  %v1199_v12 = vld [vmem:[%s1649_s3 + $0x20] ss:$8 sps:$4 sm:$0xff] (!%p343_p10)   ;;  %v1200_v13 = vld [vmem:[%s1649_s3 + $0x34] ss:$8 sps:$4 sm:$0xff] (!%p343_p10)   ;;  %571 = vmatprep.mubr.bf16.mxu1 (!%p343_p10), %v1333_v15 }
  0x11   : > { %541 = vmatprep.subr.bf16.mxu1 (!%p343_p10), %v1194_v9  ;;  %v1202_v14 = vld [vmem:[%s1649_s3 + $0x30] ss:$8 sps:$4 sm:$0xff] (!%p343_p10)   ;;  %v1205_v16 = vld [vmem:[%s1650_s4 + $0x4] ss:$8 sps:$4 sm:$0xff] (!%p343_p10)   ;;  %808 = vmatprep.subr.bf16.mxu0 (!%p343_p10), %v1333_v15  ;;  %v1501_v27 = vshrl.u32 (!%p343_p10), %v475_v26, 7  ;;  %v1334_v59 = vmov (!%p343_p10), 0.0  }
  0x12   : > { %v1215_v17 = vld [vmem:[%s1651_s5] sm:$0xff] (!%p343_p10)   ;;  %v1216_v18 = vld [vmem:[%s1651_s5 + $0x8] sm:$0xff] (!%p343_p10)   ;;  %v1217_v19 = vld [vmem:[%s1651_s5 + $0x10] sm:$0xff] (!%p343_p10)   ;;  %484 = vst.msk [vmem:[#allocation2] sm:$0xff] (!%p343_p10), %vm448_vm0, %v1334_v59  ;;  %s398_s24 = sand.u32 (!%p343_p10), 1, %s1315_s28   ;;  %s1123_s25 = sshll.u32 (!%p343_p10), %s1323_s30, 8 }
  0x13   : > { %809 = vmatpush1.bf16.msra.mxu0 (!%p343_p10), %v1215_v17  ;;  %v477_v31 = vsub.s32 (!%p343_p10), 0, %v1501_v27  ;;  %v1080_v33 = vld [vmem:[%s1647_s1] ss:$0 sm:$0xff] (!%p343_p10)  ;;  %v1208_v43 = vld [vmem:[%s1650_s4 + $0x14] ss:$8 sps:$4 sm:$0xff] (!%p343_p10)   ;;  %v1220_v52 = vld [vmem:[%s1651_s5 + $0x28] sm:$0xff] (!%p343_p10)   ;;  %s1594_s16 = scalar_lea.hbm (!%p343_p10), %s1654_s8, %s1123_s25 }
  0x14   : > { %542 = vmatpush1.bf16.msra.mxu1 (!%p343_p10), %v1196_v10  ;;  %810 = vmatprep.subr.bf16.mxu0 (!%p343_p10), %v1333_v15  ;;  %v1203_v42 = vld [vmem:[%s1650_s4] ss:$8 sps:$4 sm:$0xff] (!%p343_p10)   ;;  %v1206_v45 = vld [vmem:[%s1650_s4 + $0x10] ss:$8 sps:$4 sm:$0xff] (!%p343_p10)   ;;  %v1211_v46 = vld [vmem:[%s1650_s4 + $0x24] ss:$8 sps:$4 sm:$0xff] (!%p343_p10)  }
  0x15   : > { %543 = vmatprep.subr.bf16.mxu1 (!%p343_p10), %v1197_v11  ;;  %v1209_v47 = vld [vmem:[%s1650_s4 + $0x20] ss:$8 sps:$4 sm:$0xff] (!%p343_p10)   ;;  %v1214_v48 = vld [vmem:[%s1650_s4 + $0x34] ss:$8 sps:$4 sm:$0xff] (!%p343_p10)   ;;  %v1212_v49 = vld [vmem:[%s1650_s4 + $0x30] ss:$8 sps:$4 sm:$0xff] (!%p343_p10)  }
  0x16   : > { %s1440_s19 = scalar_select %p402_p11, %s1323_s30, 1  ;;  %v1218_v50 = vld [vmem:[%s1651_s5 + $0x18] sm:$0xff]   ;;  %v1219_v51 = vld [vmem:[%s1651_s5 + $0x20] sm:$0xff]   ;;  %v1221_v53 = vld [vmem:[%s1651_s5 + $0x30] sm:$0xff]   ;;  %485 = vst.msk [vmem:[#allocation2 + $0x8] sm:$0xff] %vm448_vm0, %v1334_v59 }
  0x17   : > { %811 = vmatpush1.bf16.msra.mxu0 %v1216_v18  ;;  %v1222_v54 = vld [vmem:[%s1651_s5 + $0x38] sm:$0xff]   ;;  %v1223_v55 = vld [vmem:[%s1651_s5 + $0x40] sm:$0xff]   ;;  %v1224_v56 = vld [vmem:[%s1651_s5 + $0x48] sm:$0xff]   ;;  %s1600_s30 = scalar_lea.sflag [#allocation5], %s398_s24 }
  0x18   : > { %s1122_s20 = sshll.u32 %s1440_s19, 3  ;;  %544 = vmatpush1.bf16.msra.mxu1 %v1199_v12  ;;  %812 = vmatprep.subr.bf16.mxu0 %v1333_v15  ;;  %s413_s12 = scalar_lea.vmem %s1648_s2, %s1440_s19  ;;  %v1225_v57 = vld [vmem:[%s1651_s5 + $0x50] sm:$0xff]   ;;  %v1226_v58 = vld [vmem:[%s1651_s5 + $0x58] sm:$0xff]  }
  0x19   : > { %s409_s23 = scalar_lea.vmem %s1646_s0, %s1122_s20  ;;  %545 = vmatprep.subr.bf16.mxu1 %v1200_v13  ;;  %v472_v28 = vld [vmem:[%s413_s12] sm:$0x1]  ;;  %s434_s21 = scalar_lea.vmem %s1653_s7, %s1440_s19 }
  0x1a   : > { %v1125_v0 = vld [vmem:[%s409_s23] sm:$0xff]   ;;  %v473_v30 = vadd.f32 1.0, %v472_v28  ;;  %s1077_s19 = sshll.u32 %s398_s24, 4 }
  0x1b   : > { %v1446_v1 = vunpack.c.l.bf16 %v1125_v0  ;;  %v1448_v2 = vunpack.c.h.bf16 %v1125_v0  ;;  %813 = vmatpush1.bf16.msra.mxu0 %v1217_v19  ;;  %s400_s26 = scalar_lea.vmem [#allocation4], %s1077_s19 }
  0x1c   : > { %546 = vmatpush1.bf16.msra.mxu1 %v1202_v14  ;;  %814 = vmatprep.subr.bf16.mxu0 %v1333_v15  ;;  %v478_v35 = vrot.slane %v473_v30, %v477_v31  ;;  %s918_s11 = sshll.u32 %s400_s26, 4  ;;  %s1596_s11 = int_to_ptr.vmem [resolvable:$true] %s918_s11 }
  0x1d   : > { %v446_v3 = vmul.f32 %v1446_v1, %v1446_v1  ;;  %v447_v4 = vmul.f32 %v1448_v2, %v1448_v2  ;;  %630 = vmatprep.subr.bf16.mxu1 %v1205_v16  ;;  %s1253_s20 = scalar_lea.vmem %s1596_s11, 256 }
  0x1e   : > { %p1254_p12 = scmp.ne.s32.totalorder %s1596_s11, %s1253_s20 }
  0x1f   : > { %v449_v5 = vsel %vm448_vm0, %v446_v3, 0.0  ;;  %v452_v6 = vsel %vm448_vm0, %v447_v4, 0.0  ;;  %815 = vmatpush1.bf16.msra.mxu0 %v1218_v50 }
  0x20   : > { %450 = vadd.xlane.f32.xlu0 %v449_v5  ;;  %816 = vmatprep.subr.bf16.mxu0 %v1333_v15  ;;  %p1255_p13 = pnand %p1254_p12, %p1423_p4 }
  0x22   : > { %p1256_p0 = pneg %p1255_p13 }
  0x23   : > { %817 = vmatpush1.bf16.msra.mxu0 %v1219_v51 }
  0x24   : > { %453 = vadd.xlane.f32.xlu0 %v452_v6  ;;  %818 = vmatprep.subr.bf16.mxu0 %v1333_v15 }
  0x27   : > { %819 = vmatpush1.bf16.msra.mxu0 %v1220_v52 }
  0x28   : > { %820 = vmatprep.subr.bf16.mxu0 %v1333_v15 }
  0x2b   : > { %821 = vmatpush1.bf16.msra.mxu0 %v1221_v53 }
  0x2c   : > { %822 = vmatprep.subr.bf16.mxu0 %v1333_v15 }
  0x2f   : > { %823 = vmatpush1.bf16.msra.mxu0 %v1222_v54 }
  0x30   : > { %824 = vmatprep.subr.bf16.mxu0 %v1333_v15 }
  0x33   : > { %825 = vmatpush1.bf16.msra.mxu0 %v1223_v55 }
  0x34   : > { %826 = vmatprep.subr.bf16.mxu0 %v1333_v15 }
  0x37   : > { %827 = vmatpush1.bf16.msra.mxu0 %v1224_v56 }
  0x38   : > { %828 = vmatprep.subr.bf16.mxu0 %v1333_v15 }
  0x3b   : > { %829 = vmatpush1.bf16.msra.mxu0 %v1225_v57  ;;  %v1116_v57 = vld [vmem:[%s1652_s6] ss:$0 sm:$0xff] }
  0x3c   : > { %830 = vmatprep.subr.bf16.mxu0 %v1333_v15 }
  0x3f   : > { %831 = vmatpush1.bf16.msra.mxu0 %v1226_v58 }
  0xad   : > { %v451_v20 = vpop.xlane.xlu0 %450 }
  0xae   : > { %v456_v21 = vmul.f32 0.015625, %v451_v20 }
  0xb0   : > { %v458_v22 = vadd.f32 1e-05, %v456_v21 }
  0xb1   : > { %v454_v23 = vpop.xlane.xlu0 %453 }
  0xb2   : > { %1227 = vrsqrt.f32 %v458_v22  ;;  %v457_v24 = vmul.f32 0.015625, %v454_v23 }
  0xb4   : > { %v459_v25 = vadd.f32 1e-05, %v457_v24 }
  0xb6   : > { %1229 = vrsqrt.f32 %v459_v25 }
  0xbc   : > { %v1228_v29 = vpop.eup %1227 }
  0xbd   : > { %v462_v32 = vmul.f32 %v1228_v29, %v1446_v1 }
  0xbf   : > { %v470_v36 = vmul.f32 %v1080_v33, %v462_v32 }
  0xc0   : > { %v1230_v34 = vpop.eup %1229 }
  0xc1   : > { %v463_v37 = vmul.f32 %v1230_v34, %v1448_v2  ;;  %v480_v39 = vmul.f32 %v478_v35, %v470_v36  ;;  %v705_v34 = vld [vmem:[#allocation2] sm:$0xff]  ;;  %v706_v36 = vld [vmem:[#allocation2 + $0x8] sm:$0xff] }
  0xc3   : > { %v471_v38 = vmul.f32 %v1080_v33, %v463_v37 }
  0xc5   : > { %v481_v40 = vmul.f32 %v478_v35, %v471_v38 }
  0xc7   : > { %v482_v41 = vpack.c.bf16 %v481_v40, %v480_v39 }
  0xc9   : > { %483 = vst.msk [vmem:[#allocation3] sm:$0xff] %vm448_vm0, %v482_v41 }
  0xd0   : > { %v486_v44 = vld [vmem:[#allocation3] sm:$0xff] }
  0xd1   : > { %1089 = vmatmul.mubr.msk.bf16.vlgmr.msra.gmra.mrb[0].mxu1 %vm448_vm0, %v486_v44 }
  0xd2   : > { %631 = vmatpush1.bf16.msra.mxu1 %v1203_v42  ;;  %662 = vmatprep.mubr.bf16.mxu1 %v1333_v15 }
  0xd3   : > { %632 = vmatprep.subr.bf16.mxu1 %v1208_v43 }
  0xd6   : > { %633 = vmatpush1.bf16.msra.mxu1 %v1206_v45 }
  0xd7   : > { %634 = vmatprep.subr.bf16.mxu1 %v1211_v46 }
  0xda   : > { %635 = vmatpush1.bf16.msra.mxu1 %v1209_v47 }
  0xdb   : > { %636 = vmatprep.subr.bf16.mxu1 %v1214_v48  ;;  %v860_v48 = vld [vmem:[%s434_s21] sm:$0x1]  ;;  %s1335_s21 = smov [#allocation4]  }
  0xdc   : > { %s1257_s22 = sshll.u32 %s1335_s21, 4  ;;  %s1258_s22 = int_to_ptr.vmem [resolvable:$false] %s1257_s22 }
  0xdd   : > { %s1259_s23 = scalar_lea.vmem %s1258_s22, 512  ;;  %p1260_p1 = scmp.lt.s32.totalorder %s1596_s11, %s1258_s22 }
  0xde   : > { %637 = vmatpush1.bf16.msra.mxu1 %v1212_v49  ;;  %p1261_p2 = scmp.lt.s32.totalorder %s1259_s23, %s1253_s20 }
  0xe0   : > { %p1262_p3 = por %p1261_p2, %p1260_p1 }
  0xe1   : > { %1098 = vmatmul.mubr.msk.bf16.vlgmr.msra.gmra.mrb[4].mxu1 %vm448_vm0, %v486_v44 }
  0xe2   : > { %p1263_p5 = pnand %p1262_p3, %p1256_p0 }
 0x1a4   : > { %v573_v60 = vpop.f32.mrb[0].mxu1 }
 0x1a5   : > { %v1099_v61 = vmul.f32 -1.442695, %v573_v60  ;;  %v575_v62 = vpop.f32.mrb[1].mxu1 }
 0x1a6   : > { %v1100_v63 = vmul.f32 -1.442695, %v575_v62  ;;  %v577_v0 = vpop.f32.mrb[2].mxu1 }
 0x1a7   : > { %1231 = vpow2.f32 %v1099_v61  ;;  %v1101_v3 = vmul.f32 -1.442695, %v577_v0  ;;  %v579_v4 = vpop.f32.mrb[3].mxu1 }
 0x1a8   : > { %1233 = vpow2.f32 %v1100_v63  ;;  %v1102_v5 = vmul.f32 -1.442695, %v579_v4 }
 0x1a9   : > { %1235 = vpow2.f32 %v1101_v3 }
 0x1aa   : > { %1237 = vpow2.f32 %v1102_v5 }
 0x1b1   : > { %v1232_v6 = vpop.eup %1231 }
 0x1b2   : > { %v1234_v7 = vpop.eup %1233  ;;  %v685_v8 = vadd.f32 1.0, %v1232_v6 }
 0x1b3   : > { %v1236_v9 = vpop.eup %1235  ;;  %v686_v10 = vadd.f32 1.0, %v1234_v7 }
 0x1b4   : > { %v1238_v11 = vpop.eup %1237  ;;  %1239 = vrcp.f32 %v685_v8  ;;  %v687_v12 = vadd.f32 1.0, %v1236_v9  ;;  %v664_v13 = vpop.f32.mrb[4].mxu1 }
 0x1b5   : > { %1241 = vrcp.f32 %v686_v10  ;;  %v688_v14 = vadd.f32 1.0, %v1238_v11  ;;  %v666_v15 = vpop.f32.mrb[5].mxu1 }
 0x1b6   : > { %1243 = vrcp.f32 %v687_v12  ;;  %v668_v16 = vpop.f32.mrb[6].mxu1 }
 0x1b7   : > { %1245 = vrcp.f32 %v688_v14  ;;  %v670_v17 = vpop.f32.mrb[7].mxu1 }
 0x1b8   : > { %1247 = vtanh.f32 %v860_v48 }
 0x1be   : > { %v1240_v18 = vpop.eup %1239 }
 0x1bf   : > { %v1242_v19 = vpop.eup %1241  ;;  %v697_v20 = vmul.f32 %v1240_v18, %v573_v60 }
 0x1c0   : > { %v1244_v21 = vpop.eup %1243  ;;  %v698_v22 = vmul.f32 %v1242_v19, %v575_v62 }
 0x1c1   : > { %v1246_v23 = vpop.eup %1245  ;;  %v699_v24 = vmul.f32 %v1244_v21, %v577_v0  ;;  %v701_v25 = vmul.f32 %v697_v20, %v664_v13 }
 0x1c2   : > { %v700_v26 = vmul.f32 %v1246_v23, %v579_v4  ;;  %v702_v28 = vmul.f32 %v698_v22, %v666_v15  ;;  %v1248_v55 = vpop.eup %1247 }
 0x1c3   : > { %v703_v29 = vmul.f32 %v699_v24, %v668_v16  ;;  %v894_v58 = vrot.slane %v1248_v55, %v477_v31 }
 0x1c4   : > { %v704_v30 = vmul.f32 %v700_v26, %v670_v17 }
 0x1c5   : > { %v707_v32 = vpack.c.bf16 %v703_v29, %v701_v25 }
 0x1c6   : > { %v708_v33 = vpack.c.bf16 %v704_v30, %v702_v28 }
 0x1c8   : > { %1115 = vmatprep.mubr.msk.bf16.mxu0 %vm448_vm0, %v708_v33 }
 0x1c9   : > { %841 = vmatmul.mubr.bf16.vlgmr.msra.gmra.mrb[0].mxu0 %v707_v32 }
 0x29c   : > { %v842_v35 = vpop.f32.mrb[0].mxu0 }
 0x29d   : > { %v849_v37 = vadd.f32 %v842_v35, %v705_v34  ;;  %v844_v38 = vpop.f32.mrb[1].mxu0 }
 0x29e   : > { %v845_v39 = vpop.f32.mrb[2].mxu0 }
 0x29f   : > { %851 = vst.msk [vmem:[#allocation2] sm:$0xff] %vm448_vm0, %v849_v37  ;;  %v850_v40 = vadd.f32 %v845_v39, %v706_v36  ;;  %v847_v41 = vpop.f32.mrb[3].mxu0 }
 0x2a1   : > { %852 = vst.msk [vmem:[#allocation2 + $0x8] sm:$0xff] %vm448_vm0, %v850_v40 }
 0x2a6   : > { %v862_v42 = vld [vmem:[#allocation2] sm:$0xff] }
 0x2a7   : > { %v865_v43 = vmul.f32 %v862_v42, %v862_v42 }
 0x2a8   : > { %v863_v44 = vld [vmem:[#allocation2 + $0x8] sm:$0xff] }
 0x2a9   : > { %v867_v45 = vsel %vm448_vm0, %v865_v43, 0.0  ;;  %v866_v46 = vmul.f32 %v863_v44, %v863_v44 }
 0x2aa   : > { %868 = vadd.xlane.f32.xlu1 %v867_v45 }
 0x2ab   : > { %v870_v47 = vsel %vm448_vm0, %v866_v46, 0.0 }
 0x2ae   : > { %871 = vadd.xlane.f32.xlu1 %v870_v47 }
 0x337   : > { %v869_v49 = vpop.xlane.xlu1 %868 }
 0x338   : > { %v874_v50 = vmul.f32 0.015625, %v869_v49 }
 0x33a   : > { %v876_v51 = vadd.f32 1e-05, %v874_v50 }
 0x33b   : > { %v872_v52 = vpop.xlane.xlu1 %871 }
 0x33c   : > { %1249 = vrsqrt.f32 %v876_v51  ;;  %v875_v53 = vmul.f32 0.015625, %v872_v52 }
 0x33e   : > { %v877_v54 = vadd.f32 1e-05, %v875_v53 }
 0x340   : > { %1251 = vrsqrt.f32 %v877_v54 }
 0x346   : > { %v1250_v56 = vpop.eup %1249 }
 0x347   : > { %v880_v59 = vmul.f32 %v1250_v56, %v862_v42 }
 0x349   : > { %v888_v60 = vmul.f32 %v1116_v57, %v880_v59 }
 0x34a   : > { %v1252_v61 = vpop.eup %1251 }
 0x34b   : > { %v896_v62 = vmul.f32 %v894_v58, %v888_v60  ;;  %v881_v63 = vmul.f32 %v1252_v61, %v863_v44 }
 0x34d   : > { %v889_v0 = vmul.f32 %v1116_v57, %v881_v63  ;;  %v898_v3 = vadd.f32 %v1446_v1, %v896_v62 }
 0x34f   : > { %v897_v4 = vmul.f32 %v894_v58, %v889_v0  ;;  %900 = vst.msk [vmem:[%s400_s26] sm:$0xff] %vm448_vm0, %v898_v3 }
 0x351   : > { %v899_v27 = vadd.f32 %v1448_v2, %v897_v4 }
 0x353   : > { %901 = vst.msk [vmem:[%s400_s26 + $0x8] sm:$0xff] %vm448_vm0, %v899_v27 }
 0x354   : > { %1266 = shalt.err (!%p1263_p5)
}
 0x355   : > { %s1267_s24 = scalar_lea.hbm %s1594_s16, 256  ;;  %s1271_s26 = scalar_lea.hbm %s1654_s8, 512 }
 0x356   : > { %p1268_p6 = scmp.ne.s32.totalorder %s1594_s16, %s1267_s24  ;;  %p1272_p10 = scmp.lt.u32.totalorder %s1594_s16, %s1654_s8 }
 0x357   : > { %p1273_p11 = scmp.lt.u32.totalorder %s1271_s26, %s1267_s24  ;;  %p1275_p13 = scmp.lt.u32.totalorder %s1267_s24, %s1594_s16 }
 0x358   : > { %p1269_p7 = pnand %p1268_p6, %p1423_p4 }
 0x359   : > { %p1274_p12 = por %p1273_p11, %p1272_p10 }
 0x35a   : > { %p1270_p9 = pneg %p1269_p7 }
 0x35b   : > { %p1276_p0 = por %p1275_p13, %p1274_p12 }
 0x35d   : > { %p1277_p1 = pnand %p1276_p0, %p1270_p9 }
 0x35f   : > { %1280 = shalt.err (!%p1277_p1)
}
 0x360   : > { %s1336_s20 = smov 128   ;;  %s1337_s21 = smov 8  }
 0x361   : > { %1132 = dma.vmem_to_hbm [thread:$0]  (%p1423_p4), %s1596_s11, 256, %s1594_s16, %s1600_s30, %s1336_s20, %s1336_s20, %s1337_s21  }
 0x362 PF: > { %p1138_p2 = scmp.ge.s32.totalorder %s1331_s10, 2  ;;  %s933_s22 = sand.u32 1, %s1311_s27  }
 0x363   : > { %s934_s23 = scalar_lea.sflag [#allocation5], %s933_s22 }
 0x364   : > { %p1135_p3 = pnand %p1138_p2, %p1430_p8 }
 0x366   : > { %1306 = dma.done.wait (!%p1135_p3), %s934_s23, 256  }
 0x367   : > { %1308 = vsyncadd (!%p1135_p3), %s934_s23, 4294967040  ;;  %s21_s10 = sadd.s32 1, %s1331_s10   ;;  %s1657_s27 = smov %s1315_s28 }
 0x368   : > { %p18_p5 = scmp.ge.s32.totalorder %s21_s10, 4   ;;  %s1658_s28 = smov %s1319_s29 }
 0x369   : > { %s1659_s29 = smov %s1436_s18  ;;  %s1660_s30 = smov %s1327_s9 }
 0x36a   : > { %s1661_s9 = smov %s1663_s13  ;;  %20 = sbr.rel (!%p18_p5) target bundleno = 4 (0x4), region = 110 }
 0x371   :  { %939 = vsyncpa [#allocation5], 1 }
 0x372   :  { %941 = vsyncpa [#allocation5 + $0x1], 1 }

</bundles_post_ra>
